<compile_context>
chip_gen: v7x
topology: tpu7x:2x2x1
jax: 0.10.0
libtpu: 0.0.40
codegen_flags: <defaults>
</compile_context>

<pallas_src>
import functools

import jax
import jax.numpy as jnp
from jax.experimental import pallas as pl
from jax.experimental.pallas import tpu as pltpu


# ----------------------------------------------------------------------------- kernel
def encoder_kernel(d8p,
                   x_ref,
                   w1_ref, b1_ref,
                   w2_ref, b2_ref,
                   w3l_ref, w3g_ref, b3_ref,
                   w4_ref, b4_ref,
                   wqkv_ref, bqkv_ref,
                   gamma_ref,
                   out_ref):
    bt, n, cin = x_ref.shape
    d = out_ref.shape[-1]
    m = bt * n
    bf16 = jnp.bfloat16
    f32 = jnp.float32

    x = x_ref[...].reshape(m, cin)                                   # (M, Cin) f32

    # ---- first_conv: Conv1d(C,128,1) + folded BN + ReLU.
    # K = Cin is tiny (3): unrolled VPU FMAs instead of a >97%-wasted MXU pass.
    if cin <= 8:
        h = x[:, 0:1] * w1_ref[0:1, :]
        for c in range(1, cin):
            h = h + x[:, c:c + 1] * w1_ref[c:c + 1, :]
    else:
        h = jnp.dot(x, w1_ref[...], preferred_element_type=f32)
    h = jnp.maximum(h + b1_ref[...], 0.0)                            # (M, 128) f32

    # ---- first_conv: Conv1d(128,256,1)
    f = jnp.dot(h.astype(bf16), w2_ref[...],
                preferred_element_type=f32) + b2_ref[...]            # (M, 256) f32

    # ---- global max over the N points of each batch element
    fg = jnp.max(f.reshape(bt, n, -1), axis=1)                       # (Bt, 256)

    # ---- second_conv: Conv1d(512,512,1) + folded BN + ReLU, concat eliminated:
    #      cat([global, local]) @ W3  ==  global @ W3[:256]  +  local @ W3[256:]
    g = jnp.dot(fg.astype(bf16), w3g_ref[...],
                preferred_element_type=f32)                          # (Bt, 512)
    hl = jnp.dot(f.astype(bf16), w3l_ref[...],
                 preferred_element_type=f32)                         # (M, 512)
    h2 = hl.reshape(bt, n, -1) + g[:, None, :] + b3_ref[...]
    h2 = jnp.maximum(h2, 0.0).reshape(m, -1)                         # (M, 512)

    # ---- second_conv: Conv1d(512, D, 1)
    feat = jnp.dot(h2.astype(bf16), w4_ref[...],
                   preferred_element_type=f32) + b4_ref[...]         # (M, D)

    # ---- Dropout(0.5): identity in eval mode.

    # ---- EnhancedSelfAttention (SAGAN-style 1x1-conv QKV, softmax over keys,
    #      gamma residual).  Fused lane-padded QKV projection; zero padding of q/k
    #      does not change q @ k^T.
    qkv = jnp.dot(feat.astype(bf16), wqkv_ref[...],
                  preferred_element_type=f32) + bqkv_ref[...]        # (M, 2*d8p + D)
    qkv = qkv.reshape(bt, n, -1)
    q = qkv[:, :, 0:d8p].astype(bf16)                                # (Bt, N, d8p)
    k = qkv[:, :, d8p:2 * d8p].astype(bf16)                          # (Bt, N, d8p)
    v = qkv[:, :, 2 * d8p:].astype(bf16)                             # (Bt, N, D)

    logits = jnp.einsum('bnd,bmd->bnm', q, k,
                        preferred_element_type=f32)                  # (Bt, N, N)
    logits = logits - jnp.max(logits, axis=-1, keepdims=True)
    p = jnp.exp(logits)
    attn = p * pl.reciprocal(jnp.sum(p, axis=-1, keepdims=True), approx=True)
    att = jnp.einsum('bnm,bmd->bnd', attn.astype(bf16), v,
                     preferred_element_type=f32)                     # (Bt, N, D)

    out = gamma_ref[0, 0] * att + feat.reshape(bt, n, d)

    # ---- final max-pool over points -> (Bt, D)
    out_ref[0] = jnp.max(out, axis=1)


_PARAM_ORDER = ("w1", "b1", "w2", "b2", "w3l", "w3g", "b3", "w4", "b4", "wqkv", "bqkv")


def _choose_block_b(B, N, target_rows=256):
    """Batch enough point-cloud rows per grid step to fill the MXU M dimension,
    while keeping >= 2 grid steps when possible (so both v7x TensorCores get work)."""
    bt = max(1, min(B, -(-target_rows // N)))
    while bt > 1 and -(-B // bt) < 2:
        bt = max(1, bt // 2)
    return bt


# ----------------------------------------------------------------------------- wrapper
@functools.partial(jax.jit, static_argnames=("block_b",))
def encoder_forward(x_bnc, kparams, *, block_b=None):
    """x_bnc: (B, N, Cin) float32  ->  (B, D) float32."""
    B, N, Cin = x_bnc.shape
    D = kparams["w4"].shape[1]
    d8p = (kparams["wqkv"].shape[1] - D) // 2

    bt = block_b if block_b is not None else _choose_block_b(B, N)
    nb = (B + bt - 1) // bt
    B_pad = nb * bt
    if B_pad != B:
        x_bnc = jnp.pad(x_bnc, ((0, B_pad - B), (0, 0), (0, 0)))

    def full_spec(a):
        nd = a.ndim
        return pl.BlockSpec(a.shape, lambda b, _nd=nd: (0,) * _nd)

    in_specs = [pl.BlockSpec((bt, N, Cin), lambda b: (b, 0, 0))]
    in_specs += [full_spec(kparams[k]) for k in _PARAM_ORDER]
    in_specs += [pl.BlockSpec(memory_space=pltpu.MemorySpace.SMEM)]      # gamma scalar

    out = pl.pallas_call(
        functools.partial(encoder_kernel, d8p),
        out_shape=jax.ShapeDtypeStruct((nb, bt, D), jnp.float32),
        grid=(nb,),
        in_specs=in_specs,
        out_specs=pl.BlockSpec((1, bt, D), lambda b: (b, 0, 0)),
        compiler_params=pltpu.CompilerParams(
            dimension_semantics=("parallel",),
            vmem_limit_bytes=32 * 1024 * 1024),
    )(x_bnc, *[kparams[k] for k in _PARAM_ORDER], kparams["gamma"])
    return out.reshape(B_pad, D)[:B]


# ----------------------------------------------------------------------------- param prep
def prepare_params(raw, matmul_dtype=jnp.bfloat16):
    """Fold eval-mode BN into conv weights, split w3 (concat elimination), fuse + pad QKV,
    and cast matmul weights to bf16."""
    eps = 1e-5
    f32 = jnp.float32

    s1 = raw["bn1_gamma"] / jnp.sqrt(raw["bn1_var"] + eps)
    t1 = raw["bn1_beta"] - raw["bn1_mean"] * s1
    s2 = raw["bn2_gamma"] / jnp.sqrt(raw["bn2_var"] + eps)
    t2 = raw["bn2_beta"] - raw["bn2_mean"] * s2

    w1f = raw["w1"] * s1[None, :]                       # (Cin, 128)  BN1 folded
    b1f = raw["b1"] * s1 + t1                           # (128,)

    w3 = raw["w3"] * s2[None, :]                        # (512, 512)  BN2 folded (columns)
    b3f = raw["b3"] * s2 + t2                           # (512,)
    w3g, w3l = w3[:256, :], w3[256:, :]                 # cat order: [global, local]

    d8 = raw["wq"].shape[1]
    d8p = max(128, ((d8 + 127) // 128) * 128)           # lane-dense padded q/k width

    def pad_cols(w, b, width):
        wp = jnp.zeros((w.shape[0], width), w.dtype).at[:, :w.shape[1]].set(w)
        bp = jnp.zeros((width,), b.dtype).at[:b.shape[0]].set(b)
        return wp, bp

    wq, bq = pad_cols(raw["wq"], raw["bq"], d8p)
    wk, bk = pad_cols(raw["wk"], raw["bk"], d8p)
    wqkv = jnp.concatenate([wq, wk, raw["wv"]], axis=1)          # (D, 2*d8p + D)
    bqkv = jnp.concatenate([bq, bk, raw["bv"]], axis=0)

    return dict(
        w1=w1f.astype(f32), b1=b1f.reshape(1, -1).astype(f32),
        w2=raw["w2"].astype(matmul_dtype), b2=raw["b2"].reshape(1, -1).astype(f32),
        w3l=w3l.astype(matmul_dtype), w3g=w3g.astype(matmul_dtype),
        b3=b3f.reshape(1, -1).astype(f32),
        w4=raw["w4"].astype(matmul_dtype), b4=raw["b4"].reshape(1, -1).astype(f32),
        wqkv=wqkv.astype(matmul_dtype), bqkv=bqkv.reshape(1, -1).astype(f32),
        gamma=jnp.reshape(raw["gamma"], (1, 1)).astype(f32),
    )


# ----------------------------------------------------------------------------- references
def encoder_ref_mirrored(x, kp):
    """Pure-JAX mirror of the kernel math (same folded params / bf16 casts)."""
    bf16, f32 = jnp.bfloat16, jnp.float32
    D = kp["w4"].shape[1]
    d8p = (kp["wqkv"].shape[1] - D) // 2
    cin = x.shape[-1]

    h = x[..., 0:1] * kp["w1"][0:1, :]
    for c in range(1, cin):
        h = h + x[..., c:c + 1] * kp["w1"][c:c + 1, :]
    h = jnp.maximum(h + kp["b1"], 0.0)
    f = jnp.einsum('bnc,ck->bnk', h.astype(bf16), kp["w2"],
                   preferred_element_type=f32) + kp["b2"]
    fg = jnp.max(f, axis=1)
    g = jnp.dot(fg.astype(bf16), kp["w3g"], preferred_element_type=f32)
    hl = jnp.einsum('bnc,ck->bnk', f.astype(bf16), kp["w3l"], preferred_element_type=f32)
    h2 = jnp.maximum(hl + g[:, None, :] + kp["b3"], 0.0)
    feat = jnp.einsum('bnc,ck->bnk', h2.astype(bf16), kp["w4"],
                      preferred_element_type=f32) + kp["b4"]
    qkv = jnp.einsum('bnc,ck->bnk', feat.astype(bf16), kp["wqkv"],
                     preferred_element_type=f32) + kp["bqkv"]
    q = qkv[..., 0:d8p].astype(bf16)
    k = qkv[..., d8p:2 * d8p].astype(bf16)
    v = qkv[..., 2 * d8p:].astype(bf16)
    logits = jnp.einsum('bnd,bmd->bnm', q, k, preferred_element_type=f32)
    attn = jax.nn.softmax(logits, axis=-1)
    att = jnp.einsum('bnm,bmd->bnd', attn.astype(bf16), v, preferred_element_type=f32)
    out = kp["gamma"][0, 0] * att + feat
    return jnp.max(out, axis=1)


def encoder_ref_f32(x, raw):
    """Eval-mode forward of the original module, un-folded, full f32."""
    eps = 1e-5

    def bn(v, g, b, m, var):
        return g * (v - m) / jnp.sqrt(var + eps) + b

    h = jnp.einsum('bnc,ck->bnk', x, raw["w1"]) + raw["b1"]
    h = jnp.maximum(bn(h, raw["bn1_gamma"], raw["bn1_beta"],
                       raw["bn1_mean"], raw["bn1_var"]), 0.0)
    f = jnp.einsum('bnc,ck->bnk', h, raw["w2"]) + raw["b2"]
    fg = jnp.max(f, axis=1, keepdims=True)
    cat = jnp.concatenate([jnp.broadcast_to(fg, f.shape), f], axis=-1)
    h2 = jnp.einsum('bnc,ck->bnk', cat, raw["w3"]) + raw["b3"]
    h2 = jnp.maximum(bn(h2, raw["bn2_gamma"], raw["bn2_beta"],
                        raw["bn2_mean"], raw["bn2_var"]), 0.0)
    feat = jnp.einsum('bnc,ck->bnk', h2, raw["w4"]) + raw["b4"]
    q = jnp.einsum('bnc,ck->bnk', feat, raw["wq"]) + raw["bq"]
    k = jnp.einsum('bnc,ck->bnk', feat, raw["wk"]) + raw["bk"]
    v = jnp.einsum('bnc,ck->bnk', feat, raw["wv"]) + raw["bv"]
    attn = jax.nn.softmax(jnp.einsum('bnd,bmd->bnm', q, k), axis=-1)
    att = jnp.einsum('bnm,bmd->bnd', attn, v)
    return jnp.max(raw["gamma"] * att + feat, axis=1)


# ----------------------------------------------------------------------------- params
def init_raw_params(key, channels, latent_dim):
    d8 = latent_dim // 8
    ks = jax.random.split(key, 18)

    def w(k, shape, scale=0.05):
        return (scale * jax.random.normal(k, shape)).astype(jnp.float32)

    def bn_stats(k, c):
        k1, k2, k3, k4 = jax.random.split(k, 4)
        return (
            (1.0 + 0.1 * jax.random.normal(k1, (c,))).astype(jnp.float32),   # gamma
            (0.1 * jax.random.normal(k2, (c,))).astype(jnp.float32),         # beta
            (0.05 * jax.random.normal(k3, (c,))).astype(jnp.float32),        # running mean
            jnp.abs(1.0 + 0.1 * jax.random.normal(k4, (c,))).astype(jnp.float32),  # var
        )

    g1, be1, m1, v1 = bn_stats(ks[16], 128)
    g2, be2, m2, v2 = bn_stats(ks[17], 512)

    return dict(
        w1=w(ks[0], (channels, 128)), b1=w(ks[1], (128,)),
        w2=w(ks[2], (128, 256)), b2=w(ks[3], (256,)),
        w3=w(ks[4], (512, 512)), b3=w(ks[5], (512,)),
        w4=w(ks[6], (512, latent_dim)), b4=w(ks[7], (latent_dim,)),
        wq=w(ks[8], (latent_dim, d8)), bq=w(ks[9], (d8,)),
        wk=w(ks[10], (latent_dim, d8)), bk=w(ks[11], (d8,)),
        wv=w(ks[12], (latent_dim, latent_dim)), bv=w(ks[13], (latent_dim,)),
        bn1_gamma=g1, bn1_beta=be1, bn1_mean=m1, bn1_var=v1,
        bn2_gamma=g2, bn2_beta=be2, bn2_mean=m2, bn2_var=v2,
        # PyTorch inits gamma to 0 (making attention a no-op); use 0.5 so the
        # attention path is actually exercised.  Deterministic either way.
        gamma=jnp.float32(0.5),
    )


# ----------------------------------------------------------------------------- main
if __name__ == "__main__":
    B, N, channels, latent_dim = 4, 64, 3, 128

    key = jax.random.PRNGKey(0)
    k_x, k_p = jax.random.split(key)
    # PyTorch input is (B, channels, N); kernel layout is (B, N, channels).
    x_bcn = jax.random.normal(k_x, (B, channels, N), dtype=jnp.float32)
    x_bnc = jnp.transpose(x_bcn, (0, 2, 1))

    raw = init_raw_params(k_p, channels, latent_dim)
    kparams = prepare_params(raw)

    out = jax.block_until_ready(encoder_forward(x_bnc, kparams))
    assert out.shape == (B, latent_dim), out.shape

    # Tight check against a pure-JAX mirror of the kernel math (same bf16 casts).
    ref_m = encoder_ref_mirrored(x_bnc, kparams)
    err_m = float(jnp.max(jnp.abs(out - ref_m)))
    assert jnp.allclose(out, ref_m, rtol=2e-3, atol=2e-3), err_m

    # Looser check against the full-f32, un-folded eval-mode semantics.
    ref_f = encoder_ref_f32(x_bnc, raw)
    err_f = float(jnp.max(jnp.abs(out - ref_f)))
    assert jnp.allclose(out, ref_f, rtol=3e-2, atol=3e-2), err_f

    print("KERNEL_OK")
</pallas_src>

<mosaic_0001>
module attributes {stable_mosaic.version = 11 : i64} {
  func.func @encoder_kernel(%arg0: i32, %arg1: memref<2x64x3xf32, #tpu.memory_space<vmem>>, %arg2: memref<3x128xf32, #tpu.memory_space<vmem>>, %arg3: memref<1x128xf32, #tpu.memory_space<vmem>>, %arg4: memref<128x256xbf16, #tpu.memory_space<vmem>>, %arg5: memref<1x256xf32, #tpu.memory_space<vmem>>, %arg6: memref<256x512xbf16, #tpu.memory_space<vmem>>, %arg7: memref<256x512xbf16, #tpu.memory_space<vmem>>, %arg8: memref<1x512xf32, #tpu.memory_space<vmem>>, %arg9: memref<512x128xbf16, #tpu.memory_space<vmem>>, %arg10: memref<1x128xf32, #tpu.memory_space<vmem>>, %arg11: memref<128x384xbf16, #tpu.memory_space<vmem>>, %arg12: memref<1x384xf32, #tpu.memory_space<vmem>>, %arg13: memref<1x1xf32, #tpu.memory_space<smem>>, %arg14: memref<1x2x128xf32, #tpu.memory_space<vmem>>) attributes {dimension_semantics = [#tpu.dimension_semantics<parallel>], iteration_bounds = array<i64: 2>, scalar_prefetch = 0 : i64, scratch_operands = 0 : i64, tpu.core_type = #tpu.core_type<tc>, window_params = [{transform_indices = @transform_0, window_bounds = array<i64: 2, 64, 3>}, {pipeline_mode = #tpu.pipeline_mode<synchronous>, transform_indices = @transform_1, window_bounds = array<i64: 3, 128>}, {pipeline_mode = #tpu.pipeline_mode<synchronous>, transform_indices = @transform_2, window_bounds = array<i64: 1, 128>}, {pipeline_mode = #tpu.pipeline_mode<synchronous>, transform_indices = @transform_3, window_bounds = array<i64: 128, 256>}, {pipeline_mode = #tpu.pipeline_mode<synchronous>, transform_indices = @transform_4, window_bounds = array<i64: 1, 256>}, {pipeline_mode = #tpu.pipeline_mode<synchronous>, transform_indices = @transform_5, window_bounds = array<i64: 256, 512>}, {pipeline_mode = #tpu.pipeline_mode<synchronous>, transform_indices = @transform_6, window_bounds = array<i64: 256, 512>}, {pipeline_mode = #tpu.pipeline_mode<synchronous>, transform_indices = @transform_7, window_bounds = array<i64: 1, 512>}, {pipeline_mode = #tpu.pipeline_mode<synchronous>, transform_indices = @transform_8, window_bounds = array<i64: 512, 128>}, {pipeline_mode = #tpu.pipeline_mode<synchronous>, transform_indices = @transform_9, window_bounds = array<i64: 1, 128>}, {pipeline_mode = #tpu.pipeline_mode<synchronous>, transform_indices = @transform_10, window_bounds = array<i64: 128, 384>}, {pipeline_mode = #tpu.pipeline_mode<synchronous>, transform_indices = @transform_11, window_bounds = array<i64: 1, 384>}, {transform_indices = @transform_12, window_bounds = array<i64: 1, 1>}, {transform_indices = @transform_13, window_bounds = array<i64: 1, 2, 128>}]} {
    %c0 = arith.constant 0 : index
    %c0_0 = arith.constant 0 : index
    %c0_1 = arith.constant 0 : index
    %0 = vector.load %arg1[%c0, %c0_0, %c0_1] : memref<2x64x3xf32, #tpu.memory_space<vmem>>, vector<2x64x3xf32>
    %1 = vector.shape_cast %0 : vector<2x64x3xf32> to vector<128x3xf32>
    %2 = vector.extract_strided_slice %1 {offsets = [0, 0], sizes = [128, 1], strides = [1, 1]} : vector<128x3xf32> to vector<128x1xf32>
    %c0_2 = arith.constant 0 : index
    %c0_3 = arith.constant 0 : index
    %3 = vector.load %arg2[%c0_2, %c0_3] : memref<3x128xf32, #tpu.memory_space<vmem>>, vector<1x128xf32>
    %4 = vector.broadcast %2 : vector<128x1xf32> to vector<128x128xf32>
    %5 = vector.broadcast %3 : vector<1x128xf32> to vector<128x128xf32>
    %6 = arith.mulf %4, %5 : vector<128x128xf32>
    %7 = vector.extract_strided_slice %1 {offsets = [0, 1], sizes = [128, 1], strides = [1, 1]} : vector<128x3xf32> to vector<128x1xf32>
    %c1 = arith.constant 1 : index
    %c0_4 = arith.constant 0 : index
    %8 = vector.load %arg2[%c1, %c0_4] : memref<3x128xf32, #tpu.memory_space<vmem>>, vector<1x128xf32>
    %9 = vector.broadcast %7 : vector<128x1xf32> to vector<128x128xf32>
    %10 = vector.broadcast %8 : vector<1x128xf32> to vector<128x128xf32>
    %11 = arith.mulf %9, %10 : vector<128x128xf32>
    %12 = arith.addf %6, %11 : vector<128x128xf32>
    %13 = vector.extract_strided_slice %1 {offsets = [0, 2], sizes = [128, 1], strides = [1, 1]} : vector<128x3xf32> to vector<128x1xf32>
    %c2 = arith.constant 2 : index
    %c0_5 = arith.constant 0 : index
    %14 = vector.load %arg2[%c2, %c0_5] : memref<3x128xf32, #tpu.memory_space<vmem>>, vector<1x128xf32>
    %15 = vector.broadcast %13 : vector<128x1xf32> to vector<128x128xf32>
    %16 = vector.broadcast %14 : vector<1x128xf32> to vector<128x128xf32>
    %17 = arith.mulf %15, %16 : vector<128x128xf32>
    %18 = arith.addf %12, %17 : vector<128x128xf32>
    %c0_6 = arith.constant 0 : index
    %c0_7 = arith.constant 0 : index
    %19 = vector.load %arg3[%c0_6, %c0_7] : memref<1x128xf32, #tpu.memory_space<vmem>>, vector<1x128xf32>
    %20 = vector.broadcast %19 : vector<1x128xf32> to vector<128x128xf32>
    %21 = arith.addf %18, %20 : vector<128x128xf32>
    %cst = arith.constant 0.000000e+00 : f32
    %22 = vector.broadcast %cst : f32 to vector<128x128xf32>
    %23 = arith.maximumf %21, %22 : vector<128x128xf32>
    %24 = arith.truncf %23 : vector<128x128xf32> to vector<128x128xbf16>
    %c0_8 = arith.constant 0 : index
    %c0_9 = arith.constant 0 : index
    %25 = vector.load %arg4[%c0_8, %c0_9] : memref<128x256xbf16, #tpu.memory_space<vmem>>, vector<128x256xbf16>
    %cst_10 = arith.constant dense<0.000000e+00> : vector<128x256xf32>
    %26 = tpu.matmul %24, %25, %cst_10 {dimension_numbers = #tpu.dot_dimension_numbers<[1], [0], [0], [1], [0, 0, 1, 1], [], []>} : vector<128x128xbf16>, vector<128x256xbf16>, vector<128x256xf32> -> vector<128x256xf32>
    %c0_11 = arith.constant 0 : index
    %c0_12 = arith.constant 0 : index
    %27 = vector.load %arg5[%c0_11, %c0_12] : memref<1x256xf32, #tpu.memory_space<vmem>>, vector<1x256xf32>
    %28 = vector.broadcast %27 : vector<1x256xf32> to vector<128x256xf32>
    %29 = arith.addf %26, %28 : vector<128x256xf32>
    %30 = vector.shape_cast %29 : vector<128x256xf32> to vector<2x64x256xf32>
    %cst_13 = arith.constant dense<0xFF800000> : vector<2x256xf32>
    %31 = vector.multi_reduction <maximumf>, %30, %cst_13 [1] : vector<2x64x256xf32> to vector<2x256xf32>
    %32 = arith.truncf %31 : vector<2x256xf32> to vector<2x256xbf16>
    %c0_14 = arith.constant 0 : index
    %c0_15 = arith.constant 0 : index
    %33 = vector.load %arg7[%c0_14, %c0_15] : memref<256x512xbf16, #tpu.memory_space<vmem>>, vector<256x512xbf16>
    %cst_16 = arith.constant dense<0.000000e+00> : vector<2x512xf32>
    %34 = tpu.matmul %32, %33, %cst_16 {dimension_numbers = #tpu.dot_dimension_numbers<[1], [0], [0], [1], [0, 0, 1, 1], [], []>} : vector<2x256xbf16>, vector<256x512xbf16>, vector<2x512xf32> -> vector<2x512xf32>
    %35 = arith.truncf %29 : vector<128x256xf32> to vector<128x256xbf16>
    %c0_17 = arith.constant 0 : index
    %c0_18 = arith.constant 0 : index
    %36 = vector.load %arg6[%c0_17, %c0_18] : memref<256x512xbf16, #tpu.memory_space<vmem>>, vector<256x512xbf16>
    %cst_19 = arith.constant dense<0.000000e+00> : vector<128x512xf32>
    %37 = tpu.matmul %35, %36, %cst_19 {dimension_numbers = #tpu.dot_dimension_numbers<[1], [0], [0], [1], [0, 0, 1, 1], [], []>} : vector<128x256xbf16>, vector<256x512xbf16>, vector<128x512xf32> -> vector<128x512xf32>
    %38 = vector.shape_cast %37 : vector<128x512xf32> to vector<2x64x512xf32>
    %39 = vector.shape_cast %34 : vector<2x512xf32> to vector<2x1x512xf32>
    %40 = vector.broadcast %39 : vector<2x1x512xf32> to vector<2x64x512xf32>
    %41 = arith.addf %38, %40 : vector<2x64x512xf32>
    %c0_20 = arith.constant 0 : index
    %c0_21 = arith.constant 0 : index
    %42 = vector.load %arg8[%c0_20, %c0_21] : memref<1x512xf32, #tpu.memory_space<vmem>>, vector<1x512xf32>
    %43 = vector.shape_cast %42 : vector<1x512xf32> to vector<1x1x512xf32>
    %44 = vector.broadcast %43 : vector<1x1x512xf32> to vector<2x64x512xf32>
    %45 = arith.addf %41, %44 : vector<2x64x512xf32>
    %cst_22 = arith.constant 0.000000e+00 : f32
    %46 = vector.broadcast %cst_22 : f32 to vector<2x64x512xf32>
    %47 = arith.maximumf %45, %46 : vector<2x64x512xf32>
    %48 = vector.shape_cast %47 : vector<2x64x512xf32> to vector<128x512xf32>
    %49 = arith.truncf %48 : vector<128x512xf32> to vector<128x512xbf16>
    %c0_23 = arith.constant 0 : index
    %c0_24 = arith.constant 0 : index
    %50 = vector.load %arg9[%c0_23, %c0_24] : memref<512x128xbf16, #tpu.memory_space<vmem>>, vector<512x128xbf16>
    %cst_25 = arith.constant dense<0.000000e+00> : vector<128x128xf32>
    %51 = tpu.matmul %49, %50, %cst_25 {dimension_numbers = #tpu.dot_dimension_numbers<[1], [0], [0], [1], [0, 0, 1, 1], [], []>} : vector<128x512xbf16>, vector<512x128xbf16>, vector<128x128xf32> -> vector<128x128xf32>
    %c0_26 = arith.constant 0 : index
    %c0_27 = arith.constant 0 : index
    %52 = vector.load %arg10[%c0_26, %c0_27] : memref<1x128xf32, #tpu.memory_space<vmem>>, vector<1x128xf32>
    %53 = vector.broadcast %52 : vector<1x128xf32> to vector<128x128xf32>
    %54 = arith.addf %51, %53 : vector<128x128xf32>
    %55 = arith.truncf %54 : vector<128x128xf32> to vector<128x128xbf16>
    %c0_28 = arith.constant 0 : index
    %c0_29 = arith.constant 0 : index
    %56 = vector.load %arg11[%c0_28, %c0_29] : memref<128x384xbf16, #tpu.memory_space<vmem>>, vector<128x384xbf16>
    %cst_30 = arith.constant dense<0.000000e+00> : vector<128x384xf32>
    %57 = tpu.matmul %55, %56, %cst_30 {dimension_numbers = #tpu.dot_dimension_numbers<[1], [0], [0], [1], [0, 0, 1, 1], [], []>} : vector<128x128xbf16>, vector<128x384xbf16>, vector<128x384xf32> -> vector<128x384xf32>
    %c0_31 = arith.constant 0 : index
    %c0_32 = arith.constant 0 : index
    %58 = vector.load %arg12[%c0_31, %c0_32] : memref<1x384xf32, #tpu.memory_space<vmem>>, vector<1x384xf32>
    %59 = vector.broadcast %58 : vector<1x384xf32> to vector<128x384xf32>
    %60 = arith.addf %57, %59 : vector<128x384xf32>
    %61 = vector.shape_cast %60 : vector<128x384xf32> to vector<2x64x384xf32>
    %62 = vector.extract_strided_slice %61 {offsets = [0, 0, 0], sizes = [2, 64, 128], strides = [1, 1, 1]} : vector<2x64x384xf32> to vector<2x64x128xf32>
    %63 = arith.truncf %62 : vector<2x64x128xf32> to vector<2x64x128xbf16>
    %64 = vector.extract_strided_slice %61 {offsets = [0, 0, 128], sizes = [2, 64, 128], strides = [1, 1, 1]} : vector<2x64x384xf32> to vector<2x64x128xf32>
    %65 = arith.truncf %64 : vector<2x64x128xf32> to vector<2x64x128xbf16>
    %66 = vector.extract_strided_slice %61 {offsets = [0, 0, 256], sizes = [2, 64, 128], strides = [1, 1, 1]} : vector<2x64x384xf32> to vector<2x64x128xf32>
    %67 = arith.truncf %66 : vector<2x64x128xf32> to vector<2x64x128xbf16>
    "tpu.trace_start"() <{level = 10 : i32, message = "bnd,bmd->bnm"}> : () -> ()
    %cst_33 = arith.constant dense<0.000000e+00> : vector<2x64x64xf32>
    %68 = tpu.matmul %63, %65, %cst_33 {dimension_numbers = #tpu.dot_dimension_numbers<[2], [2], [1], [1], [0, 0, 0, 1, 1, 1], [0], [0]>} : vector<2x64x128xbf16>, vector<2x64x128xbf16>, vector<2x64x64xf32> -> vector<2x64x64xf32>
    "tpu.trace_stop"() : () -> ()
    %cst_34 = arith.constant dense<0xFF800000> : vector<2x64xf32>
    %69 = vector.multi_reduction <maximumf>, %68, %cst_34 [2] : vector<2x64x64xf32> to vector<2x64xf32>
    %70 = vector.shape_cast %69 : vector<2x64xf32> to vector<2x64x1xf32>
    %71 = vector.broadcast %70 : vector<2x64x1xf32> to vector<2x64x64xf32>
    %72 = arith.subf %68, %71 : vector<2x64x64xf32>
    %73 = math.exp %72 : vector<2x64x64xf32>
    %cst_35 = arith.constant dense<0.000000e+00> : vector<2x64xf32>
    %74 = vector.multi_reduction <add>, %73, %cst_35 [2] : vector<2x64x64xf32> to vector<2x64xf32>
    %75 = vector.shape_cast %74 : vector<2x64xf32> to vector<2x64x1xf32>
    %76 = tpu.reciprocal %75 {approx = true} : vector<2x64x1xf32> -> vector<2x64x1xf32>
    %77 = vector.broadcast %76 : vector<2x64x1xf32> to vector<2x64x64xf32>
    %78 = arith.mulf %73, %77 : vector<2x64x64xf32>
    %79 = arith.truncf %78 : vector<2x64x64xf32> to vector<2x64x64xbf16>
    "tpu.trace_start"() <{level = 10 : i32, message = "bnm,bmd->bnd"}> : () -> ()
    %cst_36 = arith.constant dense<0.000000e+00> : vector<2x64x128xf32>
    %80 = tpu.matmul %79, %67, %cst_36 {dimension_numbers = #tpu.dot_dimension_numbers<[2], [1], [1], [2], [0, 0, 0, 1, 1, 2], [0], [0]>} : vector<2x64x64xbf16>, vector<2x64x128xbf16>, vector<2x64x128xf32> -> vector<2x64x128xf32>
    "tpu.trace_stop"() : () -> ()
    %c0_37 = arith.constant 0 : index
    %c0_38 = arith.constant 0 : index
    %81 = memref.load %arg13[%c0_37, %c0_38] : memref<1x1xf32, #tpu.memory_space<smem>>
    %82 = vector.broadcast %81 : f32 to vector<2x64x128xf32>
    %83 = arith.mulf %82, %80 : vector<2x64x128xf32>
    %84 = vector.shape_cast %54 : vector<128x128xf32> to vector<2x64x128xf32>
    %85 = arith.addf %83, %84 : vector<2x64x128xf32>
    %cst_39 = arith.constant dense<0xFF800000> : vector<2x128xf32>
    %86 = vector.multi_reduction <maximumf>, %85, %cst_39 [1] : vector<2x64x128xf32> to vector<2x128xf32>
    %c0_40 = arith.constant 0 : index
    %c0_41 = arith.constant 0 : index
    %c0_42 = arith.constant 0 : index
    %87 = vector.load %arg14[%c0_40, %c0_41, %c0_42] : memref<1x2x128xf32, #tpu.memory_space<vmem>>, vector<1x2x128xf32>
    %88 = vector.shape_cast %87 : vector<1x2x128xf32> to vector<2x128xf32>
    %89 = vector.shape_cast %86 : vector<2x128xf32> to vector<1x2x128xf32>
    tpu.vector_store %arg14[%c0_40, %c0_41, %c0_42], %89 {strides = array<i32>} : memref<1x2x128xf32, #tpu.memory_space<vmem>>, vector<1x2x128xf32>,
    return
  }
  func.func @transform_0(%arg0: i32) -> (i32, i32, i32) {
    %c0_i32 = arith.constant 0 : i32
    %c0_i32_0 = arith.constant 0 : i32
    %c0_i32_1 = arith.constant 0 : i32
    return %arg0, %c0_i32, %c0_i32_0 : i32, i32, i32
  }
  func.func @transform_1(%arg0: i32) -> (i32, i32) {
    %c0_i32 = arith.constant 0 : i32
    %c0_i32_0 = arith.constant 0 : i32
    %c0_i32_1 = arith.constant 0 : i32
    return %c0_i32, %c0_i32_0 : i32, i32
  }
  func.func @transform_2(%arg0: i32) -> (i32, i32) {
    %c0_i32 = arith.constant 0 : i32
    %c0_i32_0 = arith.constant 0 : i32
    %c0_i32_1 = arith.constant 0 : i32
    return %c0_i32, %c0_i32_0 : i32, i32
  }
  func.func @transform_3(%arg0: i32) -> (i32, i32) {
    %c0_i32 = arith.constant 0 : i32
    %c0_i32_0 = arith.constant 0 : i32
    %c0_i32_1 = arith.constant 0 : i32
    return %c0_i32, %c0_i32_0 : i32, i32
  }
  func.func @transform_4(%arg0: i32) -> (i32, i32) {
    %c0_i32 = arith.constant 0 : i32
    %c0_i32_0 = arith.constant 0 : i32
    %c0_i32_1 = arith.constant 0 : i32
    return %c0_i32, %c0_i32_0 : i32, i32
  }
  func.func @transform_5(%arg0: i32) -> (i32, i32) {
    %c0_i32 = arith.constant 0 : i32
    %c0_i32_0 = arith.constant 0 : i32
    %c0_i32_1 = arith.constant 0 : i32
    return %c0_i32, %c0_i32_0 : i32, i32
  }
  func.func @transform_6(%arg0: i32) -> (i32, i32) {
    %c0_i32 = arith.constant 0 : i32
    %c0_i32_0 = arith.constant 0 : i32
    %c0_i32_1 = arith.constant 0 : i32
    return %c0_i32, %c0_i32_0 : i32, i32
  }
  func.func @transform_7(%arg0: i32) -> (i32, i32) {
    %c0_i32 = arith.constant 0 : i32
    %c0_i32_0 = arith.constant 0 : i32
    %c0_i32_1 = arith.constant 0 : i32
    return %c0_i32, %c0_i32_0 : i32, i32
  }
  func.func @transform_8(%arg0: i32) -> (i32, i32) {
    %c0_i32 = arith.constant 0 : i32
    %c0_i32_0 = arith.constant 0 : i32
    %c0_i32_1 = arith.constant 0 : i32
    return %c0_i32, %c0_i32_0 : i32, i32
  }
  func.func @transform_9(%arg0: i32) -> (i32, i32) {
    %c0_i32 = arith.constant 0 : i32
    %c0_i32_0 = arith.constant 0 : i32
    %c0_i32_1 = arith.constant 0 : i32
    return %c0_i32, %c0_i32_0 : i32, i32
  }
  func.func @transform_10(%arg0: i32) -> (i32, i32) {
    %c0_i32 = arith.constant 0 : i32
    %c0_i32_0 = arith.constant 0 : i32
    %c0_i32_1 = arith.constant 0 : i32
    return %c0_i32, %c0_i32_0 : i32, i32
  }
  func.func @transform_11(%arg0: i32) -> (i32, i32) {
    %c0_i32 = arith.constant 0 : i32
    %c0_i32_0 = arith.constant 0 : i32
    %c0_i32_1 = arith.constant 0 : i32
    return %c0_i32, %c0_i32_0 : i32, i32
  }
  func.func @transform_12(%arg0: i32) -> (i32, i32) {
    %c0_i32 = arith.constant 0 : i32
    %c0_i32_0 = arith.constant 0 : i32
    %c0_i32_1 = arith.constant 0 : i32
    return %c0_i32, %c0_i32_0 : i32, i32
  }
  func.func @transform_13(%arg0: i32) -> (i32, i32, i32) {
    %c0_i32 = arith.constant 0 : i32
    %c0_i32_0 = arith.constant 0 : i32
    %c0_i32_1 = arith.constant 0 : i32
    return %arg0, %c0_i32, %c0_i32_0 : i32, i32, i32
  }
}

</mosaic_0001>

<bundles_post_ra>
// kernel: encoder_forward.1
= control target key start
LH: loop header
LB: loop body
LE: loop exit
PB: predicated region body
PF: predicated region fallthrough
CT: control target
= control target key end

     0   :  { %s6435_s0 = inlined_call_operand.vmem [shape: f32[4,64,3], index: 0, kind: input, shape index: {}]   ;;  %s6436_s1 = inlined_call_operand.vmem [shape: f32[3,128], index: 1, kind: input, shape index: {}]   ;;  %s6437_s2 = inlined_call_operand.vmem [shape: f32[1,128], index: 2, kind: input, shape index: {}]   ;;  %s6438_s3 = inlined_call_operand.hbm [shape: bf16[128,256], index: 3, kind: input, shape index: {}]   ;;  %s6439_s4 = inlined_call_operand.vmem [shape: f32[1,256], index: 4, kind: input, shape index: {}]   ;;  %s6440_s5 = inlined_call_operand.hbm [shape: bf16[256,512], index: 5, kind: input, shape index: {}]   ;;  %s6441_s6 = inlined_call_operand.hbm [shape: bf16[256,512], index: 6, kind: input, shape index: {}]   ;;  %s6442_s7 = inlined_call_operand.vmem [shape: f32[1,512], index: 7, kind: input, shape index: {}]   ;;  %s6443_s8 = inlined_call_operand.vmem [shape: bf16[512,128], index: 8, kind: input, shape index: {}]   ;;  %s6444_s9 = inlined_call_operand.vmem [shape: f32[1,128], index: 9, kind: input, shape index: {}]   ;;  %s6445_s10 = inlined_call_operand.hbm [shape: bf16[128,384], index: 10, kind: input, shape index: {}]   ;;  %s6446_s11 = inlined_call_operand.vmem [shape: f32[1,384], index: 11, kind: input, shape index: {}]   ;;  %s6447_s12 = inlined_call_operand.<no memory space> [shape: f32[1,1], index: 12, kind: input, shape index: {}]   ;;  %s6448_s13 = inlined_call_operand.hbm [shape: f32[2,2,128], index: 13, kind: output, shape index: {}]  }
   0x1   :  { %6461 = sst [smem:[#allocation22_spill]] %s6440_s5 }
   0x2   :  { %6462 = sst [smem:[#allocation23_spill]] %s6448_s13 }
   0x3   :  { %18 = sst [smem:[#allocation2]] %s6447_s12 }
   0x4   :  { %19 = vsyncpa [#allocation4], 0 }
   0x5   :  { %20 = vsyncpa [#allocation7], 0 }
   0x6   :  { %21 = vsyncpa [#allocation10], 0 }
   0x7   :  { %22 = vsyncpa [#allocation5], 0 }
   0x8   :  { %24 = vsyncpa [#allocation5 + $0x1], 0  ;;  %s5345_s27 = smov 0   ;;  %s5347_s28 = smov 0  }
   0x9   :  { %s5349_s29 = smov 0   ;;  %s5351_s30 = smov 0  }
   0xa LB: > { %6463 = sst [smem:[#allocation16_spill]] %s5243_s27  ;;  %s5366_s12 = sadd.s32 4294967295, %s5255_s30   ;;  %s5255_s30 = sphi %s5351_s30, %s6490_s30   ;;  %s5251_s29 = sphi %s5349_s29, %s6492_s29   ;;  %s5247_s28 = sphi %s5347_s28, %s6494_s28   ;;  %s5243_s27 = sphi %s5345_s27, %s6493_s27  }
   0xb   : > { %6464 = sst [smem:[#allocation17_spill]] %s5251_s29  ;;  %s4101_s14 = sadd.s32 4294967294, %s5255_s30  }
   0xc   : > { %6465 = sst [smem:[#allocation18_spill]] %s5255_s30  ;;  %s5370_s15 = sadd.s32 1, %s5255_s30  }
   0xd   : > { %6466 = sst [smem:[#allocation19_spill]] %s5370_s15  ;;  %s315_s16 = sadd.s32 1, %s5251_s29 }
   0xe   : > { %s312_s17 = ssub.s32 %s5255_s30, %s5370_s15  ;;  %p325_p0 = scmp.ne.s32.totalorder %s5251_s29, %s5247_s28 }
   0xf   : > { %p313_p1 = scmp.eq.s32.totalorder %s312_s17, 0  ;;  %p326_p2 = scmp.eq.s32.totalorder %s5366_s12, 1 }
  0x10   : > { %p331_p3 = scmp.ne.s32.totalorder %s5247_s28, %s5243_s27  ;;  %p332_p4 = scmp.eq.s32.totalorder %s4101_s14, 1 }
  0x11   : > { %s5381_s18 = scalar_select %p313_p1, %s5251_s29, %s315_s16  }
  0x12   : > { %p5383_p5 = por %p326_p2, %p325_p0  ;;  %p5387_p6 = por %p332_p4, %p331_p3 }
  0x13   : > { %6467 = sst [smem:[#allocation20_spill]] %s5381_s18  ;;  %p4102_p7 = scmp.ge.s32.totalorder %s5255_s30, 1 }
  0x14   : > { %s6468_s19 = scalar_select %p5383_p5, 1, 0 }
  0x15   : > { %s6469_s20 = scalar_select %p5387_p6, 1, 0 }
  0x16   : > { %p339_p8 = scmp.lt.s32.totalorder %s5255_s30, 3  ;;  %p6452_p9 = scmp.eq.s32.totalorder %s5366_s12, 0 }
  0x17   : > { %6470 = sst [smem:[#allocation21_spill]] %s6469_s20  ;;  %s5257_s22 = smov [#allocation6]  }
  0x18   : > { %p5394_p10 = pnand %p4102_p7, %p339_p8  ;;  %s373_s23 = sshll.u32 %s5257_s22, 4  ;;  %s374_s23 = int_to_ptr.vmem [resolvable:$true] %s373_s23 }
  0x19   : > { %s5258_s25 = smov [#allocation3]   ;;  %s6473_s5 = sld [smem:[#allocation22_spill]] }
  0x1a   : > { %s6471_s21 = scalar_select %p5394_p10, 1, 0 }
  0x1b   : > { %p4625_p11 = pneg %p5394_p10  ;;  %s357_s26 = sshll.u32 %s5258_s25, 4  ;;  %s5406_s26 = int_to_ptr.vmem [resolvable:$true] %s357_s26 }
  0x1d   : > { %p5402_p12 = pnand %p6452_p9, %p4625_p11 }
  0x1f   : > { %s5069_s17 = scalar_lea.hbm %s6473_s5, 8192  ;;  %p5416_p0 = pneg %p5402_p12 }
  0x20   : > { %p5070_p13 = scmp.ne.s32.totalorder %s6473_s5, %s5069_s17  ;;  %p5076_p3 = scmp.lt.u32.totalorder %s5069_s17, %s6473_s5 }
  0x22   : > { %p5072_p1 = pnand %p5416_p0, %p5070_p13 }
  0x24   : > { %p5073_p2 = pneg %p5072_p1 }
  0x26   : > { %p5078_p4 = pnand %p5076_p3, %p5073_p2 }
  0x28   : > { %5081 = shalt.err (!%p5078_p4)
}
  0x29   : > { %s5082_s14 = scalar_lea.vmem %s374_s23, 8192  ;;  %p5090_p9 = scmp.lt.s32.totalorder %s374_s23, %s374_s23 }
  0x2a   : > { %p5083_p7 = scmp.ne.s32.totalorder %s374_s23, %s5082_s14  ;;  %p5091_p6 = scmp.lt.s32.totalorder %s5082_s14, %s5082_s14 }
  0x2c   : > { %p5085_p8 = pnand %p5083_p7, %p5416_p0  ;;  %p5092_p5 = por %p5091_p6, %p5090_p9 }
  0x2e   : > { %p5086_p11 = pneg %p5085_p8 }
  0x30   : > { %p5093_p10 = pnand %p5092_p5, %p5086_p11 }
  0x32   : > { %5096 = shalt.err (!%p5093_p10)
}
  0x33   : > { %s6459_s29 = smov 256   ;;  %s6460_s18 = smov 16  }
  0x34   : > { %4631 = dma.hbm_to_vmem [thread:$0]  (!%p5402_p12), %s6473_s5, 8192, %s374_s23, [#allocation7], %s6459_s29, %s6459_s29, %s6460_s18  }
  0x35   : > { %s5097_s20 = scalar_lea.hbm %s6438_s3, 2048 }
  0x36   : > { %p5098_p5 = scmp.ne.s32.totalorder %s6438_s3, %s5097_s20  ;;  %p5104_p10 = scmp.lt.u32.totalorder %s5097_s20, %s6438_s3 }
  0x38   : > { %p5100_p6 = pnand %p5098_p5, %p5416_p0 }
  0x3a   : > { %p5101_p9 = pneg %p5100_p6 }
  0x3c   : > { %p5106_p13 = pnand %p5104_p10, %p5101_p9 }
  0x3e   : > { %5109 = shalt.err (!%p5106_p13)
}
  0x3f   : > { %s5110_s23 = scalar_lea.vmem %s5406_s26, 2048  ;;  %p5118_p4 = scmp.lt.s32.totalorder %s5406_s26, %s5406_s26 }
  0x40   : > { %p5111_p1 = scmp.ne.s32.totalorder %s5406_s26, %s5110_s23  ;;  %p5119_p7 = scmp.lt.s32.totalorder %s5110_s23, %s5110_s23 }
  0x42   : > { %p5113_p2 = pnand %p5111_p1, %p5416_p0  ;;  %p5120_p8 = por %p5119_p7, %p5118_p4 }
  0x44   : > { %p5114_p3 = pneg %p5113_p2 }
  0x46   : > { %p5121_p11 = pnand %p5120_p8, %p5114_p3 }
  0x48   : > { %5124 = shalt.err (!%p5121_p11)
}
  0x49   : > { %s5261_s27 = smov 128   ;;  %s5262_s13 = smov 8  }
  0x4a   : > { %4628 = dma.hbm_to_vmem [thread:$0]  (!%p5402_p12), %s6438_s3, 2048, %s5406_s26, [#allocation4], %s5261_s27, %s5261_s27, %s5262_s13  }
  0x4b   : > { %s5263_s15 = smov [#allocation8]   ;;  %s5264_s17 = smov [#allocation9]  }
  0x4c   : > { %s386_s16 = sshll.u32 %s5263_s15, 4  ;;  %s408_s25 = sshll.u32 %s5264_s17, 4  ;;  %s387_s16 = int_to_ptr.vmem [resolvable:$true] %s386_s16  ;;  %s5458_s25 = int_to_ptr.vmem [resolvable:$true] %s408_s25 }
  0x4d   : > { %s5125_s29 = scalar_lea.hbm %s6441_s6, 8192 }
  0x4e   : > { %p5126_p5 = scmp.ne.s32.totalorder %s6441_s6, %s5125_s29  ;;  %p5132_p10 = scmp.lt.u32.totalorder %s5125_s29, %s6441_s6 }
  0x50   : > { %p5128_p6 = pnand %p5126_p5, %p5416_p0 }
  0x52   : > { %p5129_p9 = pneg %p5128_p6 }
  0x54   : > { %p5134_p13 = pnand %p5132_p10, %p5129_p9 }
  0x56   : > { %5137 = shalt.err (!%p5134_p13)
}
  0x57   : > { %s5138_s27 = scalar_lea.vmem %s387_s16, 8192  ;;  %p5146_p4 = scmp.lt.s32.totalorder %s387_s16, %s387_s16 }
  0x58   : > { %p5139_p1 = scmp.ne.s32.totalorder %s387_s16, %s5138_s27  ;;  %p5147_p7 = scmp.lt.s32.totalorder %s5138_s27, %s5138_s27 }
  0x5a   : > { %p5141_p2 = pnand %p5139_p1, %p5416_p0  ;;  %p5148_p8 = por %p5147_p7, %p5146_p4 }
  0x5c   : > { %p5142_p3 = pneg %p5141_p2 }
  0x5e   : > { %p5149_p11 = pnand %p5148_p8, %p5142_p3 }
  0x60   : > { %5152 = shalt.err (!%p5149_p11)
}
  0x61   : > { %s6475_s5 = smov 16   ;;  %s6476_s18 = smov 256  }
  0x62   : > { %4634 = dma.hbm_to_vmem [thread:$0]  (!%p5402_p12), %s6441_s6, 8192, %s387_s16, [#allocation7], %s6476_s18, %s6476_s18, %s6475_s5  }
  0x63   : > { %s5153_s17 = scalar_lea.hbm %s6445_s10, 3072 }
  0x64   : > { %p5154_p5 = scmp.ne.s32.totalorder %s6445_s10, %s5153_s17  ;;  %p5160_p10 = scmp.lt.u32.totalorder %s5153_s17, %s6445_s10 }
  0x66   : > { %p5156_p6 = pnand %p5154_p5, %p5416_p0 }
  0x68   : > { %p5157_p9 = pneg %p5156_p6 }
  0x6a   : > { %p5162_p13 = pnand %p5160_p10, %p5157_p9 }
  0x6c   : > { %5165 = shalt.err (!%p5162_p13)
}
  0x6d   : > { %s5166_s16 = scalar_lea.vmem %s5458_s25, 3072  ;;  %p5174_p4 = scmp.lt.s32.totalorder %s5458_s25, %s5458_s25 }
  0x6e   : > { %p5167_p1 = scmp.ne.s32.totalorder %s5458_s25, %s5166_s16  ;;  %p5175_p7 = scmp.lt.s32.totalorder %s5166_s16, %s5166_s16 }
  0x70   : > { %p5169_p2 = pnand %p5167_p1, %p5416_p0  ;;  %p5176_p8 = por %p5175_p7, %p5174_p4 }
  0x72   : > { %p5170_p3 = pneg %p5169_p2 }
  0x74   : > { %p5177_p11 = pnand %p5176_p8, %p5170_p3 }
  0x76   : > { %5180 = shalt.err (!%p5177_p11)
}
  0x77   : > { %s5265_s27 = smov 192   ;;  %s5266_s5 = smov 12  }
  0x78   : > { %4637 = dma.hbm_to_vmem [thread:$0]  (!%p5402_p12), %s6445_s10, 3072, %s5458_s25, [#allocation10], %s5265_s27, %s5265_s27, %s5266_s5  }
  0x79   : > { %p6477_p5 = scmp.ne.s32.totalorder %s6471_s21, 0 }
  0x7a   : > { %p6478_p0 = scmp.eq.s32.totalorder (!%p6477_p5), %s5366_s12, 0 }
  0x7b   : > { %440 = sbr.rel (%p6477_p5) target bundleno = 2255 (0x8cf), region = 72 }
  0x82   : > { %5226 = dma.done.wait (%p6478_p0), [#allocation4], 2048   ;;  %p6479_p6 = pmov %p6478_p0 }
  0x83   : > { %p6480_p9 = pmov %p6478_p0 }
  0x84   : > { %5228 = vsyncadd (%p6479_p6), [#allocation4], 4294965248 }
  0x85   : > { %5230 = dma.done.wait (%p6480_p9), [#allocation7], 16384   ;;  %p6481_p10 = pmov %p6478_p0 }
  0x86   : > { %p6482_p13 = pmov %p6478_p0 }
  0x87   : > { %5232 = vsyncadd (%p6481_p10), [#allocation7], 4294950912 }
  0x88   : > { %5234 = dma.done.wait (%p6482_p13), [#allocation10], 3072   ;;  %p6483_p12 = pmov %p6478_p0 }
  0x89   : > { %s4114_s21 = sshll.u32 %s5366_s12, 1  ;;  %v5267_v0 = vmov 2   ;;  %v5268_v1 = vmov 1   ;;  %v5269_v2 = vmov 0   ;;  %v4725_v6 = vld [vmem:[#allocation3 + $0x4] ss:$8 sps:$4 sm:$0xff]  }
  0x8a   : > { %5236 = vsyncadd (%p6483_p12), [#allocation10], 4294964224  ;;  %4698 = vset.pattern.permute.xlu0 %v5267_v0  ;;  %4697 = vset.pattern.permute.xlu1 %v5268_v1  ;;  %p498_p1 = scmp.lt.s32.totalorder %s4114_s21, 3  ;;  %v4727_v7 = vld [vmem:[#allocation3] ss:$8 sps:$4 sm:$0xff]   ;;  %vm1220_vm0 = vcmask 1041409  }
  0x8b   : > { %1011 = vmatprep.mubr.bf16.mxu0 %v5269_v2  ;;  %979 = vmatprep.subr.bf16.mxu0 %v4725_v6  ;;  %v4728_v9 = vld [vmem:[#allocation3 + $0x14] ss:$8 sps:$4 sm:$0xff]   ;;  %v4730_v10 = vld [vmem:[#allocation3 + $0x10] ss:$8 sps:$4 sm:$0xff]   ;;  %v4731_v11 = vld [vmem:[#allocation3 + $0x24] ss:$8 sps:$4 sm:$0xff]  }
  0x8c   : > { %s6496_s21 = smov (!%p498_p1, %s4114_s21), 3  ;;  %980 = vmatpush1.bf16.msra.mxu0 %v4727_v7  ;;  %v4733_v12 = vld [vmem:[#allocation3 + $0x20] ss:$8 sps:$4 sm:$0xff]   ;;  %v4734_v13 = vld [vmem:[#allocation3 + $0x34] ss:$8 sps:$4 sm:$0xff]   ;;  %vm3583_vm1 = vcmask 523264  }
  0x8d   : > { %s4334_s24 = sshll.u32 %s6496_s21, 6  ;;  %981 = vmatprep.subr.bf16.mxu0 %v4728_v9  ;;  %v4736_v14 = vld [vmem:[#allocation3 + $0x30] ss:$8 sps:$4 sm:$0xff]   ;;  %v4737_v15 = vld [vmem:[#allocation3 + $0x44] ss:$8 sps:$4 sm:$0xff]   ;;  %s3922_s21 = sld [smem:[#allocation2]] }
  0x8e   : > { %s5525_s29 = scalar_lea.vmem %s6435_s0, %s4334_s24  ;;  %v4739_v17 = vld [vmem:[#allocation3 + $0x40] ss:$8 sps:$4 sm:$0xff]   ;;  %v4740_v19 = vld [vmem:[#allocation3 + $0x54] ss:$8 sps:$4 sm:$0xff]   ;;  %v4742_v20 = vld [vmem:[#allocation3 + $0x50] ss:$8 sps:$4 sm:$0xff]  }
  0x8f   : > { %v505_v3 = vld [vmem:[%s5525_s29] sm:$0xff]  ;;  %v507_v4 = vld [vmem:[%s5525_s29 + $0x10] sm:$0xff]  ;;  %v506_v5 = vld [vmem:[%s5525_s29 + $0x8] sm:$0xff]  ;;  %s494_s24 = sand.u32 1, %s5247_s28   ;;  %s4331_s25 = sshll.u32 %s5366_s12, 5 }
  0x90   : > { %725 = vperm.xlu0 %4698, %v505_v3   ;;  %624 = vperm.xlu1 %4697, %v505_v3   ;;  %v509_v8 = vld [vmem:[%s5525_s29 + $0x20] sm:$0xff]  ;;  %v508_v16 = vld [vmem:[%s5525_s29 + $0x18] sm:$0xff]  ;;  %v510_v18 = vld [vmem:[%s5525_s29 + $0x28] sm:$0xff]  ;;  %s4113_s22 = sshll.u32 %s494_s24, 1  ;;  %s6484_s14 = sld [smem:[#allocation23_spill]] }
  0x91   : > { %982 = vmatpush1.bf16.msra.mxu0 %v4730_v10  ;;  %v512_v21 = vld [vmem:[%s5525_s29 + $0x38] sm:$0xff]  ;;  %v4743_v22 = vld [vmem:[#allocation3 + $0x64] ss:$8 sps:$4 sm:$0xff]   ;;  %v4745_v23 = vld [vmem:[#allocation3 + $0x60] ss:$8 sps:$4 sm:$0xff]   ;;  %s3988_s30 = scalar_lea.sflag [#allocation5], %s494_s24 }
  0x92   : > { %983 = vmatprep.subr.bf16.mxu0 %v4731_v11  ;;  %v4746_v24 = vld [vmem:[#allocation3 + $0x74] ss:$8 sps:$4 sm:$0xff]   ;;  %v514_v25 = vld [vmem:[%s5525_s29 + $0x48] sm:$0xff]  ;;  %v4748_v26 = vld [vmem:[#allocation3 + $0x70] ss:$8 sps:$4 sm:$0xff]   ;;  %p6485_p3 = scmp.ne.s32.totalorder %s6468_s19, 0 }
  0x93   : > { %v516_v27 = vld [vmem:[%s5525_s29 + $0x58] sm:$0xff]  ;;  %v511_v28 = vld [vmem:[%s5525_s29 + $0x30] sm:$0xff]  ;;  %v513_v29 = vld [vmem:[%s5525_s29 + $0x40] sm:$0xff]  ;;  %s5271_s12 = smov [#allocation11]  }
  0x94   : > { %733 = vperm.xlu0 %4698, %v507_v4   ;;  %628 = vperm.xlu1 %4697, %v506_v5   ;;  %v515_v30 = vld [vmem:[%s5525_s29 + $0x50] sm:$0xff]  ;;  %v517_v31 = vld [vmem:[%s5525_s29 + $0x60] sm:$0xff]  ;;  %v518_v32 = vld [vmem:[%s5525_s29 + $0x68] sm:$0xff]  ;;  %s5185_s16 = sshll.u32 %s5271_s12, 4  ;;  %s5186_s16 = int_to_ptr.vmem [resolvable:$false] %s5185_s16 }
  0x95   : > { %984 = vmatpush1.bf16.msra.mxu0 %v4733_v12  ;;  %v520_v33 = vld [vmem:[%s5525_s29 + $0x78] sm:$0xff]  ;;  %v519_v34 = vld [vmem:[%s5525_s29 + $0x70] sm:$0xff]  ;;  %v5571_v41 = vld [vmem:[%s6436_s1 + $0x1] ss:$0 sm:$0xff]  ;;  %s496_s29 = scalar_lea.vmem [#allocation11], %s4113_s22  ;;  %s5187_s27 = scalar_lea.vmem %s5186_s16, 64 }
  0x96   : > { %985 = vmatprep.subr.bf16.mxu0 %v4734_v13  ;;  %v5576_v42 = vld [vmem:[%s6436_s1] ss:$0 sm:$0xff]  ;;  %v5581_v43 = vld [vmem:[%s6436_s1 + $0x2] ss:$0 sm:$0xff]  ;;  %s4001_s20 = sshll.u32 %s496_s29, 4  ;;  %s6392_s23 = scalar_lea.hbm %s6484_s14, %s4331_s25  ;;  %s6394_s20 = int_to_ptr.vmem [resolvable:$true] %s4001_s20 }
  0x97   : > { %v5592_v55 = vld [vmem:[%s6437_s2] ss:$0 sm:$0xff]  ;;  %s5181_s26 = scalar_lea.vmem %s6394_s20, 32  ;;  %p5188_p8 = scmp.lt.s32.totalorder %s6394_s20, %s5186_s16 }
  0x98   : > { %741 = vperm.xlu0 %4698, %v509_v8   ;;  %4699 = vset.pattern.permute.xlu1 %v5267_v0  ;;  %p5182_p2 = scmp.ne.s32.totalorder %s6394_s20, %s5181_s26  ;;  %p5189_p11 = scmp.lt.s32.totalorder %s5187_s27, %s5181_s26 }
  0x99   : > { %729 = vperm.xlu1 %4699, %v506_v5   ;;  %986 = vmatpush1.bf16.msra.mxu0 %v4736_v14 }
  0x9a   : > { %987 = vmatprep.subr.bf16.mxu0 %v4737_v15  ;;  %p5183_p4 = pnand %p5182_p2, %p6485_p3  ;;  %p5190_p5 = por %p5189_p11, %p5188_p8 }
  0x9c   : > { %4705 = vset.pattern.permute.xlu0 %v5269_v2  ;;  %p5184_p7 = pneg %p5183_p4 }
  0x9d   : > { %524 = vperm.xlu0 %4705, %v505_v3   ;;  %4700 = vset.pattern.permute.xlu1 %v5269_v2 }
  0x9e   : > { %534 = vperm.xlu1 %4700, %v507_v4   ;;  %988 = vmatpush1.bf16.msra.mxu0 %v4739_v17  ;;  %p5191_p0 = pnand %p5190_p5, %p5184_p7 }
  0x9f   : > { %989 = vmatprep.subr.bf16.mxu0 %v4740_v19 }
  0xa1   : > { %529 = vperm.xlu0 %4705, %v506_v5  }
  0xa2   : > { %4701 = vset.pattern.permute.xlu1 %v5268_v1  ;;  %990 = vmatpush1.bf16.msra.mxu0 %v4742_v20 }
  0xa3   : > { %632 = vperm.xlu1 %4701, %v507_v4   ;;  %991 = vmatprep.subr.bf16.mxu0 %v4743_v22 }
  0xa5   : > { %539 = vperm.xlu0 %4705, %v508_v16  }
  0xa6   : > { %992 = vmatpush1.bf16.msra.mxu0 %v4745_v23 }
  0xa7   : > { %636 = vperm.xlu1 %4701, %v508_v16   ;;  %993 = vmatprep.subr.bf16.mxu0 %v4746_v24 }
  0xa9   : > { %549 = vperm.xlu0 %4705, %v510_v18  }
  0xaa   : > { %994 = vmatpush1.bf16.msra.mxu0 %v4748_v26 }
  0xab   : > { %4702 = vset.pattern.permute.xlu1 %v5267_v0 }
  0xac   : > { %737 = vperm.xlu1 %4702, %v508_v16  }
  0xad   : > { %559 = vperm.xlu0 %4705, %v512_v21  }
  0xb0   : > { %4703 = vset.pattern.permute.xlu1 %v5269_v2 }
  0xb1   : > { %544 = vperm.xlu1 %4703, %v509_v8   ;;  %569 = vperm.xlu0 %4705, %v514_v25  }
  0xb5   : > { %4704 = vset.pattern.permute.xlu1 %v5268_v1  ;;  %579 = vperm.xlu0 %4705, %v516_v27  }
  0xb6   : > { %640 = vperm.xlu1 %4704, %v509_v8  }
  0xb9   : > { %4714 = vset.pattern.permute.xlu0 %v5267_v0 }
  0xba   : > { %644 = vperm.xlu1 %4704, %v510_v18   ;;  %749 = vperm.xlu0 %4714, %v511_v28  }
  0xbe   : > { %4706 = vset.pattern.permute.xlu1 %v5267_v0  ;;  %757 = vperm.xlu0 %4714, %v513_v29  }
  0xbf   : > { %745 = vperm.xlu1 %4706, %v510_v18  }
  0xc2   : > { %765 = vperm.xlu0 %4714, %v515_v30  }
  0xc3   : > { %4707 = vset.pattern.permute.xlu1 %v5269_v2 }
  0xc4   : > { %554 = vperm.xlu1 %4707, %v511_v28  }
  0xc6   : > { %773 = vperm.xlu0 %4714, %v517_v31  }
  0xc8   : > { %4708 = vset.pattern.permute.xlu1 %v5268_v1 }
  0xc9   : > { %648 = vperm.xlu1 %4708, %v511_v28  }
  0xca   : > { %4719 = vset.pattern.permute.xlu0 %v5269_v2 }
  0xcb   : > { %589 = vperm.xlu0 %4719, %v518_v32  }
  0xcd   : > { %652 = vperm.xlu1 %4708, %v512_v21  }
  0xcf   : > { %599 = vperm.xlu0 %4719, %v520_v33  }
  0xd1   : > { %4709 = vset.pattern.permute.xlu1 %v5267_v0 }
  0xd2   : > { %753 = vperm.xlu1 %4709, %v512_v21  }
  0xd3   : > { %4723 = vset.pattern.permute.xlu0 %v5267_v0 }
  0xd4   : > { %781 = vperm.xlu0 %4723, %v519_v34  }
  0xd6   : > { %4710 = vset.pattern.permute.xlu1 %v5269_v2 }
  0xd7   : > { %564 = vperm.xlu1 %4710, %v513_v29  }
  0xdb   : > { %4711 = vset.pattern.permute.xlu1 %v5268_v1 }
  0xdc   : > { %656 = vperm.xlu1 %4711, %v513_v29  }
  0xe0   : > { %660 = vperm.xlu1 %4711, %v514_v25  }
  0xe4   : > { %4712 = vset.pattern.permute.xlu1 %v5267_v0 }
  0xe5   : > { %761 = vperm.xlu1 %4712, %v514_v25  }
  0xe9   : > { %4713 = vset.pattern.permute.xlu1 %v5269_v2 }
  0xea   : > { %574 = vperm.xlu1 %4713, %v515_v30  }
  0xee   : > { %4715 = vset.pattern.permute.xlu1 %v5268_v1 }
  0xef   : > { %664 = vperm.xlu1 %4715, %v515_v30  }
  0xf3   : > { %668 = vperm.xlu1 %4715, %v516_v27  }
  0xf7   : > { %4716 = vset.pattern.permute.xlu1 %v5267_v0 }
  0xf8   : > { %769 = vperm.xlu1 %4716, %v516_v27  }
  0xfc   : > { %4717 = vset.pattern.permute.xlu1 %v5269_v2 }
  0xfd   : > { %584 = vperm.xlu1 %4717, %v517_v31  }
 0x101   : > { %4718 = vset.pattern.permute.xlu1 %v5268_v1 }
 0x102   : > { %672 = vperm.xlu1 %4718, %v517_v31  }
 0x106   : > { %676 = vperm.xlu1 %4718, %v518_v32  }
 0x10a   : > { %4720 = vset.pattern.permute.xlu1 %v5267_v0 }
 0x10b   : > { %777 = vperm.xlu1 %4720, %v518_v32  }
 0x10f   : > { %4721 = vset.pattern.permute.xlu1 %v5269_v2  ;;  %v625_v35 = vpop.permute.xlu1 %624  ;;  %v726_v36 = vpop.permute.xlu0 %725 }
 0x110   : > { %594 = vperm.xlu1 %4721, %v519_v34   ;;  %v691_v45 = vmul.f32 %v5571_v41, %v625_v35  ;;  %v792_v46 = vmul.f32 %v5581_v43, %v726_v36 }
 0x113   : > { %v629_v37 = vpop.permute.xlu1 %628  ;;  %v734_v38 = vpop.permute.xlu0 %733 }
 0x114   : > { %4722 = vset.pattern.permute.xlu1 %v5268_v1  ;;  %v692_v51 = vmul.f32 %v5571_v41, %v629_v37  ;;  %v794_v63 = vmul.f32 %v5581_v43, %v734_v38 }
 0x115   : > { %680 = vperm.xlu1 %4722, %v519_v34  }
 0x117   : > { %v742_v39 = vpop.permute.xlu0 %741 }
 0x118   : > { %v730_v40 = vpop.permute.xlu1 %729  ;;  %v796_v25 = vmul.f32 %v5581_v43, %v742_v39 }
 0x119   : > { %684 = vperm.xlu1 %4722, %v520_v33   ;;  %v793_v56 = vmul.f32 %v5581_v43, %v730_v40 }
 0x11c   : > { %v525_v44 = vpop.permute.xlu0 %524 }
 0x11d   : > { %v606_v47 = vmul.f32 %v5576_v42, %v525_v44  ;;  %4724 = vset.pattern.permute.xlu1 %v5267_v0  ;;  %v535_v48 = vpop.permute.xlu1 %534 }
 0x11e   : > { %785 = vperm.xlu1 %4724, %v520_v33   ;;  %v608_v59 = vmul.f32 %v5576_v42, %v535_v48 }
 0x11f   : > { %v707_v49 = vadd.f32 %v691_v45, %v606_v47 }
 0x120   : > { %v530_v50 = vpop.permute.xlu0 %529 }
 0x121   : > { %v808_v52 = vadd.f32 %v792_v46, %v707_v49  ;;  %v607_v53 = vmul.f32 %v5576_v42, %v530_v50 }
 0x122   : > { %v633_v54 = vpop.permute.xlu1 %632 }
 0x123   : > { %v708_v57 = vadd.f32 %v692_v51, %v607_v53  ;;  %v693_v58 = vmul.f32 %v5571_v41, %v633_v54  ;;  %v831_v62 = vadd.f32 %v5592_v55, %v808_v52 }
 0x124   : > { %v540_v61 = vpop.permute.xlu0 %539 }
 0x125   : > { %v809_v60 = vadd.f32 %v793_v56, %v708_v57  ;;  %v709_v0 = vadd.f32 %v693_v58, %v608_v59  ;;  %v609_v4 = vmul.f32 %v5576_v42, %v540_v61  ;;  %v847_v6 = vmax.f32 %v831_v62, 0.0 }
 0x126   : > { %v637_v1 = vpop.permute.xlu1 %636 }
 0x127   : > { %v832_v3 = vadd.f32 %v5592_v55, %v809_v60  ;;  %v694_v5 = vmul.f32 %v5571_v41, %v637_v1  ;;  %v810_v8 = vadd.f32 %v794_v63, %v709_v0 }
 0x128   : > { %v550_v17 = vpop.permute.xlu0 %549 }
 0x129   : > { %v848_v7 = vmax.f32 %v832_v3, 0.0  ;;  %v710_v11 = vadd.f32 %v694_v5, %v609_v4  ;;  %v833_v14 = vadd.f32 %v5592_v55, %v810_v8  ;;  %v611_v28 = vmul.f32 %v5576_v42, %v550_v17 }
 0x12b   : > { %v738_v9 = vpop.permute.xlu1 %737  ;;  %v863_v10 = vpack.c.bf16 %v848_v7, %v847_v6  ;;  %v849_v19 = vmax.f32 %v833_v14, 0.0 }
 0x12c   : > { %v795_v12 = vmul.f32 %v5581_v43, %v738_v9  ;;  %v560_v24 = vpop.permute.xlu0 %559 }
 0x12d   : > { %1012 = vmatmul.mubr.bf16.vlgmr.msra.gmra.mrb[0].mxu0 %v863_v10  ;;  %v613_v53 = vmul.f32 %v5576_v42, %v560_v24 }
 0x12e   : > { %v811_v13 = vadd.f32 %v795_v12, %v710_v11  ;;  %1021 = vmatprep.mubr.bf16.mxu0 %v5269_v2 }
 0x130   : > { %v834_v15 = vadd.f32 %v5592_v55, %v811_v13  ;;  %v545_v16 = vpop.permute.xlu1 %544  ;;  %v570_v31 = vpop.permute.xlu0 %569 }
 0x131   : > { %v610_v23 = vmul.f32 %v5576_v42, %v545_v16  ;;  %v615_v11 = vmul.f32 %v5576_v42, %v570_v31 }
 0x132   : > { %v850_v18 = vmax.f32 %v834_v15, 0.0 }
 0x134   : > { %v864_v20 = vpack.c.bf16 %v850_v18, %v849_v19  ;;  %v580_v40 = vpop.permute.xlu0 %579 }
 0x135   : > { %v641_v21 = vpop.permute.xlu1 %640 }
 0x136   : > { %v695_v22 = vmul.f32 %v5571_v41, %v641_v21  ;;  %1022 = vmatmul.mubr.bf16.gmra.mrb[4].mxu0 %v864_v20 }
 0x137   : > { %1031 = vmatprep.mubr.bf16.mxu0 %v5269_v2 }
 0x138   : > { %v711_v26 = vadd.f32 %v695_v22, %v610_v23 }
 0x139   : > { %v645_v27 = vpop.permute.xlu1 %644  ;;  %v750_v48 = vpop.permute.xlu0 %749 }
 0x13a   : > { %v696_v29 = vmul.f32 %v5571_v41, %v645_v27  ;;  %v812_v30 = vadd.f32 %v796_v25, %v711_v26  ;;  %v798_v51 = vmul.f32 %v5581_v43, %v750_v48 }
 0x13c   : > { %v712_v33 = vadd.f32 %v696_v29, %v611_v28  ;;  %v835_v36 = vadd.f32 %v5592_v55, %v812_v30 }
 0x13d   : > { %v758_v6 = vpop.permute.xlu0 %757 }
 0x13e   : > { %v746_v32 = vpop.permute.xlu1 %745  ;;  %v851_v44 = vmax.f32 %v835_v36, 0.0  ;;  %v800_v9 = vmul.f32 %v5581_v43, %v758_v6 }
 0x13f   : > { %v797_v34 = vmul.f32 %v5581_v43, %v746_v32  ;;  %v617_v32 = vmul.f32 %v5576_v42, %v580_v40 }
 0x141   : > { %v813_v35 = vadd.f32 %v797_v34, %v712_v33  ;;  %v766_v26 = vpop.permute.xlu0 %765 }
 0x142   : > { %v802_v29 = vmul.f32 %v5581_v43, %v766_v26  ;;  %v4749_v26 = vld [vmem:[#allocation8 + $0x4] ss:$16 sps:$4 sm:$0xff]  }
 0x143   : > { %v836_v37 = vadd.f32 %v5592_v55, %v813_v35  ;;  %v555_v38 = vpop.permute.xlu1 %554  ;;  %1547 = vmatprep.subr.bf16.mxu1 %v4749_v26  ;;  %v4821_v26 = vld [vmem:[#allocation8 + $0x184] ss:$16 sps:$4 sm:$0xff]  }
 0x144   : > { %v612_v49 = vmul.f32 %v5576_v42, %v555_v38 }
 0x145   : > { %v852_v39 = vmax.f32 %v836_v37, 0.0 }
 0x147   : > { %v865_v45 = vpack.c.bf16 %v852_v39, %v851_v44 }
 0x148   : > { %v649_v46 = vpop.permute.xlu1 %648 }
 0x149   : > { %v697_v47 = vmul.f32 %v5571_v41, %v649_v46  ;;  %1032 = vmatmul.mubr.bf16.gmra.mrb[8].mxu0 %v865_v45 }
 0x14a   : > { %1041 = vmatprep.mubr.bf16.mxu0 %v5269_v2 }
 0x14b   : > { %v713_v50 = vadd.f32 %v697_v47, %v612_v49  ;;  %v774_v47 = vpop.permute.xlu0 %773 }
 0x14c   : > { %v653_v52 = vpop.permute.xlu1 %652 }
 0x14d   : > { %v698_v54 = vmul.f32 %v5571_v41, %v653_v52  ;;  %v814_v56 = vadd.f32 %v798_v51, %v713_v50 }
 0x14f   : > { %v714_v58 = vadd.f32 %v698_v54, %v613_v53  ;;  %v837_v60 = vadd.f32 %v5592_v55, %v814_v56  ;;  %v590_v51 = vpop.permute.xlu0 %589  ;;  %v804_v54 = vmul.f32 %v5581_v43, %v774_v47  ;;  %v4783_v47 = vld [vmem:[#allocation8 + $0xac] ss:$16 sps:$4 sm:$0xff]  }
 0x150   : > { %v619_v56 = vmul.f32 %v5576_v42, %v590_v51  ;;  %v4787_v51 = vld [vmem:[#allocation8 + $0xc8] ss:$16 sps:$4 sm:$0xff]  }
 0x151   : > { %v754_v57 = vpop.permute.xlu1 %753  ;;  %v853_v0 = vmax.f32 %v837_v60, 0.0 }
 0x152   : > { %v799_v59 = vmul.f32 %v5581_v43, %v754_v57 }
 0x154   : > { %v815_v61 = vadd.f32 %v799_v59, %v714_v58 }
 0x156   : > { %v838_v62 = vadd.f32 %v5592_v55, %v815_v61  ;;  %v565_v63 = vpop.permute.xlu1 %564 }
 0x157   : > { %v614_v7 = vmul.f32 %v5576_v42, %v565_v63 }
 0x158   : > { %v854_v1 = vmax.f32 %v838_v62, 0.0 }
 0x15a   : > { %v866_v3 = vpack.c.bf16 %v854_v1, %v853_v0 }
 0x15b   : > { %v657_v4 = vpop.permute.xlu1 %656 }
 0x15c   : > { %v699_v5 = vmul.f32 %v5571_v41, %v657_v4  ;;  %1042 = vmatmul.mubr.bf16.gmra.mrb[12].mxu0 %v866_v3  ;;  %v600_v3 = vpop.permute.xlu0 %599 }
 0x15d   : > { %1051 = vmatprep.mubr.bf16.mxu0 %v5269_v2 }
 0x15e   : > { %v715_v8 = vadd.f32 %v699_v5, %v614_v7 }
 0x15f   : > { %v661_v10 = vpop.permute.xlu1 %660 }
 0x160   : > { %v700_v12 = vmul.f32 %v5571_v41, %v661_v10  ;;  %v816_v13 = vadd.f32 %v800_v9, %v715_v8  ;;  %v782_v9 = vpop.permute.xlu0 %781 }
 0x162   : > { %v716_v15 = vadd.f32 %v700_v12, %v615_v11  ;;  %v839_v17 = vadd.f32 %v5592_v55, %v816_v13  ;;  %v806_v12 = vmul.f32 %v5581_v43, %v782_v9  ;;  %v4813_v9 = vld [vmem:[#allocation8 + $0x14c] ss:$16 sps:$4 sm:$0xff]  }
 0x164   : > { %v762_v14 = vpop.permute.xlu1 %761  ;;  %v855_v21 = vmax.f32 %v839_v17, 0.0 }
 0x165   : > { %v801_v16 = vmul.f32 %v5581_v43, %v762_v14 }
 0x167   : > { %v817_v18 = vadd.f32 %v801_v16, %v716_v15  ;;  %v621_v15 = vmul.f32 %v5576_v42, %v600_v3  ;;  %v4805_v3 = vld [vmem:[#allocation8 + $0x128] ss:$16 sps:$4 sm:$0xff]  }
 0x169   : > { %v840_v19 = vadd.f32 %v5592_v55, %v817_v18  ;;  %v575_v20 = vpop.permute.xlu1 %574 }
 0x16a   : > { %v616_v27 = vmul.f32 %v5576_v42, %v575_v20 }
 0x16b   : > { %v856_v22 = vmax.f32 %v840_v19, 0.0 }
 0x16d   : > { %v867_v23 = vpack.c.bf16 %v856_v22, %v855_v21 }
 0x16e   : > { %v665_v24 = vpop.permute.xlu1 %664 }
 0x16f   : > { %v701_v25 = vmul.f32 %v5571_v41, %v665_v24  ;;  %1052 = vmatmul.mubr.bf16.gmra.mrb[16].mxu0 %v867_v23 }
 0x170   : > { %1061 = vmatprep.mubr.bf16.mxu0 %v5269_v2 }
 0x171   : > { %v717_v28 = vadd.f32 %v701_v25, %v616_v27  ;;  %v4753_v27 = vld [vmem:[#allocation8 + $0xc] ss:$16 sps:$4 sm:$0xff]  }
 0x172   : > { %v669_v30 = vpop.permute.xlu1 %668  ;;  %1588 = vmatprep.subr.bf16.mxu0 %v4753_v27  ;;  %v4825_v27 = vld [vmem:[#allocation8 + $0x18c] ss:$16 sps:$4 sm:$0xff]  }
 0x173   : > { %v702_v31 = vmul.f32 %v5571_v41, %v669_v30  ;;  %v818_v33 = vadd.f32 %v802_v29, %v717_v28  ;;  %v4751_v28 = vld [vmem:[#allocation8 + $0x8] ss:$16 sps:$4 sm:$0xff]   ;;  %v4759_v29 = vld [vmem:[#allocation8 + $0x2c] ss:$16 sps:$4 sm:$0xff]   ;;  %v4760_v30 = vld [vmem:[#allocation8 + $0x20] ss:$16 sps:$4 sm:$0xff]  }
 0x174   : > { %1589 = vmatpush1.bf16.msra.mxu0 %v4751_v28 }
 0x175   : > { %v718_v35 = vadd.f32 %v702_v31, %v617_v32  ;;  %v841_v37 = vadd.f32 %v5592_v55, %v818_v33  ;;  %1590 = vmatprep.subr.bf16.mxu0 %v4759_v29  ;;  %v4763_v31 = vld [vmem:[#allocation8 + $0x48] ss:$16 sps:$4 sm:$0xff]   ;;  %v4765_v32 = vld [vmem:[#allocation8 + $0x4c] ss:$16 sps:$4 sm:$0xff]   ;;  %v4766_v33 = vld [vmem:[#allocation8 + $0x40] ss:$16 sps:$4 sm:$0xff]  }
 0x176   : > { %v4826_v29 = vld [vmem:[#allocation8 + $0x180] ss:$16 sps:$4 sm:$0xff]  }
 0x177   : > { %v770_v34 = vpop.permute.xlu1 %769  ;;  %v857_v45 = vmax.f32 %v841_v37, 0.0  ;;  %v4772_v37 = vld [vmem:[#allocation8 + $0x60] ss:$16 sps:$4 sm:$0xff]  }
 0x178   : > { %v803_v36 = vmul.f32 %v5581_v43, %v770_v34  ;;  %v4767_v34 = vld [vmem:[#allocation8 + $0x64] ss:$16 sps:$4 sm:$0xff]  }
 0x17a   : > { %v819_v38 = vadd.f32 %v803_v36, %v718_v35  ;;  %v4771_v35 = vld [vmem:[#allocation8 + $0x6c] ss:$16 sps:$4 sm:$0xff]   ;;  %v4769_v36 = vld [vmem:[#allocation8 + $0x68] ss:$16 sps:$4 sm:$0xff]  }
 0x17c   : > { %v842_v39 = vadd.f32 %v5592_v55, %v819_v38  ;;  %v585_v44 = vpop.permute.xlu1 %584  ;;  %v4773_v38 = vld [vmem:[#allocation8 + $0x84] ss:$16 sps:$4 sm:$0xff]  }
 0x17d   : > { %v618_v40 = vmul.f32 %v5576_v42, %v585_v44  ;;  %v4775_v44 = vld [vmem:[#allocation8 + $0x88] ss:$16 sps:$4 sm:$0xff]  }
 0x17e   : > { %v858_v46 = vmax.f32 %v842_v39, 0.0  ;;  %v4777_v39 = vld [vmem:[#allocation8 + $0x8c] ss:$16 sps:$4 sm:$0xff]  }
 0x180   : > { %v868_v48 = vpack.c.bf16 %v858_v46, %v857_v45  ;;  %v4778_v45 = vld [vmem:[#allocation8 + $0x80] ss:$16 sps:$4 sm:$0xff]   ;;  %v4779_v46 = vld [vmem:[#allocation8 + $0xa4] ss:$16 sps:$4 sm:$0xff]  }
 0x181   : > { %v673_v49 = vpop.permute.xlu1 %672 }
 0x182   : > { %v703_v50 = vmul.f32 %v5571_v41, %v673_v49  ;;  %1062 = vmatmul.mubr.bf16.gmra.mrb[20].mxu0 %v868_v48  ;;  %v4781_v48 = vld [vmem:[#allocation8 + $0xa8] ss:$16 sps:$4 sm:$0xff]   ;;  %v4784_v49 = vld [vmem:[#allocation8 + $0xa0] ss:$16 sps:$4 sm:$0xff]  }
 0x183   : > { %1071 = vmatprep.mubr.bf16.mxu0 %v5269_v2 }
 0x184   : > { %v719_v52 = vadd.f32 %v703_v50, %v618_v40  ;;  %v4785_v50 = vld [vmem:[#allocation8 + $0xc4] ss:$16 sps:$4 sm:$0xff]   ;;  %v4789_v40 = vld [vmem:[#allocation8 + $0xcc] ss:$16 sps:$4 sm:$0xff]  }
 0x185   : > { %v677_v53 = vpop.permute.xlu1 %676 }
 0x186   : > { %v704_v57 = vmul.f32 %v5571_v41, %v677_v53  ;;  %v820_v58 = vadd.f32 %v804_v54, %v719_v52  ;;  %v4790_v52 = vld [vmem:[#allocation8 + $0xc0] ss:$16 sps:$4 sm:$0xff]   ;;  %v4791_v53 = vld [vmem:[#allocation8 + $0xe4] ss:$16 sps:$4 sm:$0xff]   ;;  %v4795_v54 = vld [vmem:[#allocation8 + $0xec] ss:$16 sps:$4 sm:$0xff]  }
 0x188   : > { %v720_v60 = vadd.f32 %v704_v57, %v619_v56  ;;  %v843_v63 = vadd.f32 %v5592_v55, %v820_v58  ;;  %v4793_v56 = vld [vmem:[#allocation8 + $0xe8] ss:$16 sps:$4 sm:$0xff]   ;;  %v4796_v57 = vld [vmem:[#allocation8 + $0xe0] ss:$16 sps:$4 sm:$0xff]   ;;  %v4797_v58 = vld [vmem:[#allocation8 + $0x104] ss:$16 sps:$4 sm:$0xff]  }
 0x18a   : > { %v778_v59 = vpop.permute.xlu1 %777  ;;  %v859_v5 = vmax.f32 %v843_v63, 0.0  ;;  %v4803_v63 = vld [vmem:[#allocation8 + $0x124] ss:$16 sps:$4 sm:$0xff]  }
 0x18b   : > { %v805_v61 = vmul.f32 %v5581_v43, %v778_v59  ;;  %v4801_v59 = vld [vmem:[#allocation8 + $0x10c] ss:$16 sps:$4 sm:$0xff]  }
 0x18d   : > { %v821_v62 = vadd.f32 %v805_v61, %v720_v60  ;;  %v889_v60 = vlaneseq  ;;  %v4799_v61 = vld [vmem:[#allocation8 + $0x108] ss:$16 sps:$4 sm:$0xff]  }
 0x18f   : > { %v844_v0 = vadd.f32 %v5592_v55, %v821_v62  ;;  %v595_v1 = vpop.permute.xlu1 %594  ;;  %v4802_v62 = vld [vmem:[#allocation8 + $0x100] ss:$16 sps:$4 sm:$0xff]  }
 0x190   : > { %v620_v10 = vmul.f32 %v5576_v42, %v595_v1  ;;  %v4755_v42 = vld [vmem:[#allocation8 + $0x24] ss:$16 sps:$4 sm:$0xff]   ;;  %v5660_v1 = vshrl.u32 %v889_v60, 7 }
 0x191   : > { %v860_v4 = vmax.f32 %v844_v0, 0.0  ;;  %v4807_v0 = vld [vmem:[#allocation8 + $0x12c] ss:$16 sps:$4 sm:$0xff]   ;;  %v4847_v60 = vld [vmem:[#allocation6 + $0x4] ss:$16 sps:$4 sm:$0xff]  }
 0x193   : > { %v869_v6 = vpack.c.bf16 %v860_v4, %v859_v5  ;;  %v4808_v4 = vld [vmem:[#allocation8 + $0x120] ss:$16 sps:$4 sm:$0xff]  }
 0x194   : > { %v681_v7 = vpop.permute.xlu1 %680  ;;  %v887_v5 = vld [vmem:[%s6439_s4] sm:$0x3] }
 0x195   : > { %v705_v8 = vmul.f32 %v5571_v41, %v681_v7  ;;  %1072 = vmatmul.mubr.bf16.gmra.mrb[24].mxu0 %v869_v6  ;;  %v5666_v6 = vsub.s32 0, %v5660_v1  ;;  %v5669_v7 = vsub.s32 1, %v5660_v1 }
 0x196   : > { %1081 = vmatprep.mubr.bf16.mxu0 %v5269_v2 }
 0x197   : > { %v721_v11 = vadd.f32 %v705_v8, %v620_v10  ;;  %v4809_v8 = vld [vmem:[#allocation8 + $0x144] ss:$16 sps:$4 sm:$0xff]   ;;  %v4811_v10 = vld [vmem:[#allocation8 + $0x148] ss:$16 sps:$4 sm:$0xff]  }
 0x198   : > { %v685_v13 = vpop.permute.xlu1 %684 }
 0x199   : > { %v706_v14 = vmul.f32 %v5571_v41, %v685_v13  ;;  %v822_v16 = vadd.f32 %v806_v12, %v721_v11  ;;  %v4754_v41 = vld [vmem:[#allocation8] ss:$16 sps:$4 sm:$0xff]   ;;  %v5672_v12 = vrot.slane %v887_v5, %v5666_v6 }
 0x19a   : > { %1548 = vmatpush1.bf16.msra.mxu1 %v4754_v41  ;;  %v4814_v11 = vld [vmem:[#allocation8 + $0x140] ss:$16 sps:$4 sm:$0xff]  }
 0x19b   : > { %v722_v18 = vadd.f32 %v706_v14, %v621_v15  ;;  %v845_v20 = vadd.f32 %v5592_v55, %v822_v16  ;;  %1549 = vmatprep.subr.bf16.mxu1 %v4755_v42  ;;  %v5675_v14 = vrot.slane %v887_v5, %v5669_v7  ;;  %v4815_v15 = vld [vmem:[#allocation8 + $0x164] ss:$16 sps:$4 sm:$0xff]   ;;  %v4819_v16 = vld [vmem:[#allocation8 + $0x16c] ss:$16 sps:$4 sm:$0xff]   ;;  %v4823_v42 = vld [vmem:[#allocation8 + $0x188] ss:$16 sps:$4 sm:$0xff]  }
 0x19d   : > { %v786_v17 = vpop.permute.xlu1 %785  ;;  %v861_v23 = vmax.f32 %v845_v20, 0.0 }
 0x19e   : > { %v807_v19 = vmul.f32 %v5581_v43, %v786_v17  ;;  %v4757_v43 = vld [vmem:[#allocation8 + $0x28] ss:$16 sps:$4 sm:$0xff]   ;;  %1550 = vmatpush1.bf16.msra.mxu1 %v4760_v30 }
 0x19f   : > { %1591 = vmatpush1.bf16.msra.mxu0 %v4757_v43 }
 0x1a0   : > { %v823_v21 = vadd.f32 %v807_v19, %v722_v18  ;;  %1592 = vmatprep.subr.bf16.mxu0 %v4765_v32  ;;  %v4817_v18 = vld [vmem:[#allocation8 + $0x168] ss:$16 sps:$4 sm:$0xff]   ;;  %v4820_v19 = vld [vmem:[#allocation8 + $0x160] ss:$16 sps:$4 sm:$0xff]  }
 0x1a2   : > { %v846_v22 = vadd.f32 %v5592_v55, %v823_v21  ;;  %v4761_v55 = vld [vmem:[#allocation8 + $0x44] ss:$16 sps:$4 sm:$0xff]  }
 0x1a3   : > { %1551 = vmatprep.subr.bf16.mxu1 %v4761_v55  ;;  %1593 = vmatpush1.bf16.msra.mxu0 %v4763_v31  ;;  %v4827_v55 = vld [vmem:[#allocation8 + $0x1a4] ss:$16 sps:$4 sm:$0xff]   ;;  %v4831_v31 = vld [vmem:[#allocation8 + $0x1ac] ss:$16 sps:$4 sm:$0xff]  }
 0x1a4   : > { %v862_v24 = vmax.f32 %v846_v22, 0.0  ;;  %1552 = vmatpush1.bf16.msra.mxu1 %v4766_v33  ;;  %1594 = vmatprep.subr.bf16.mxu0 %v4771_v35  ;;  %v4829_v33 = vld [vmem:[#allocation8 + $0x1a8] ss:$16 sps:$4 sm:$0xff]  }
 0x1a5   : > { %1553 = vmatprep.subr.bf16.mxu1 %v4767_v34  ;;  %v4832_v34 = vld [vmem:[#allocation8 + $0x1a0] ss:$16 sps:$4 sm:$0xff]  }
 0x1a6   : > { %v870_v25 = vpack.c.bf16 %v862_v24, %v861_v23 }
 0x1a7   : > { %1595 = vmatpush1.bf16.msra.mxu0 %v4769_v36 }
 0x1a8   : > { %1082 = vmatmul.mubr.bf16.gmra.mrb[28].mxu0 %v870_v25  ;;  %1554 = vmatpush1.bf16.msra.mxu1 %v4772_v37 }
 0x1a9   : > { %1555 = vmatprep.subr.bf16.mxu1 %v4773_v38  ;;  %1596 = vmatprep.subr.bf16.mxu0 %v4777_v39 }
 0x1ab   : > { %1597 = vmatpush1.bf16.msra.mxu0 %v4775_v44 }
 0x1ac   : > { %1556 = vmatpush1.bf16.msra.mxu1 %v4778_v45  ;;  %1598 = vmatprep.subr.bf16.mxu0 %v4783_v47  ;;  %v4837_v47 = vld [vmem:[#allocation8 + $0x1cc] ss:$16 sps:$4 sm:$0xff]  }
 0x1ad   : > { %1557 = vmatprep.subr.bf16.mxu1 %v4779_v46  ;;  %v4833_v46 = vld [vmem:[#allocation8 + $0x1c4] ss:$16 sps:$4 sm:$0xff]  }
 0x1af   : > { %1599 = vmatpush1.bf16.msra.mxu0 %v4781_v48 }
 0x1b0   : > { %1558 = vmatpush1.bf16.msra.mxu1 %v4784_v49  ;;  %1600 = vmatprep.subr.bf16.mxu0 %v4789_v40  ;;  %v4838_v40 = vld [vmem:[#allocation8 + $0x1c0] ss:$16 sps:$4 sm:$0xff]  }
 0x1b1   : > { %1559 = vmatprep.subr.bf16.mxu1 %v4785_v50  ;;  %v4835_v50 = vld [vmem:[#allocation8 + $0x1c8] ss:$16 sps:$4 sm:$0xff]  }
 0x1b3   : > { %1601 = vmatpush1.bf16.msra.mxu0 %v4787_v51 }
 0x1b4   : > { %1560 = vmatpush1.bf16.msra.mxu1 %v4790_v52  ;;  %1602 = vmatprep.subr.bf16.mxu0 %v4795_v54  ;;  %v4843_v54 = vld [vmem:[#allocation8 + $0x1ec] ss:$16 sps:$4 sm:$0xff]  }
 0x1b5   : > { %1561 = vmatprep.subr.bf16.mxu1 %v4791_v53  ;;  %v4839_v53 = vld [vmem:[#allocation8 + $0x1e4] ss:$16 sps:$4 sm:$0xff]  }
 0x1b7   : > { %1603 = vmatpush1.bf16.msra.mxu0 %v4793_v56 }
 0x1b8   : > { %1562 = vmatpush1.bf16.msra.mxu1 %v4796_v57  ;;  %1604 = vmatprep.subr.bf16.mxu0 %v4801_v59  ;;  %v4844_v59 = vld [vmem:[#allocation8 + $0x1e0] ss:$16 sps:$4 sm:$0xff]  }
 0x1b9   : > { %1563 = vmatprep.subr.bf16.mxu1 %v4797_v58  ;;  %v4841_v58 = vld [vmem:[#allocation8 + $0x1e8] ss:$16 sps:$4 sm:$0xff]  }
 0x1bb   : > { %1605 = vmatpush1.bf16.msra.mxu0 %v4799_v61  ;;  %v4850_v61 = vld [vmem:[#allocation6 + $0xc] ss:$16 sps:$4 sm:$0xff]  }
 0x1bc   : > { %1564 = vmatpush1.bf16.msra.mxu1 %v4802_v62  ;;  %1606 = vmatprep.subr.bf16.mxu0 %v4807_v0 }
 0x1bd   : > { %1565 = vmatprep.subr.bf16.mxu1 %v4803_v63 }
 0x1bf   : > { %1607 = vmatpush1.bf16.msra.mxu0 %v4805_v3 }
 0x1c0   : > { %1566 = vmatpush1.bf16.msra.mxu1 %v4808_v4  ;;  %1608 = vmatprep.subr.bf16.mxu0 %v4813_v9 }
 0x1c1   : > { %1567 = vmatprep.subr.bf16.mxu1 %v4809_v8 }
 0x1c3   : > { %1609 = vmatpush1.bf16.msra.mxu0 %v4811_v10 }
 0x1c4   : > { %1568 = vmatpush1.bf16.msra.mxu1 %v4814_v11  ;;  %1610 = vmatprep.subr.bf16.mxu0 %v4819_v16 }
 0x1c5   : > { %1569 = vmatprep.subr.bf16.mxu1 %v4815_v15 }
 0x1c7   : > { %1611 = vmatpush1.bf16.msra.mxu0 %v4817_v18 }
 0x1c8   : > { %1570 = vmatpush1.bf16.msra.mxu1 %v4820_v19  ;;  %1612 = vmatprep.subr.bf16.mxu0 %v4825_v27 }
 0x1c9   : > { %1571 = vmatprep.subr.bf16.mxu1 %v4821_v26 }
 0x1cb   : > { %1613 = vmatpush1.bf16.msra.mxu0 %v4823_v42 }
 0x1cc   : > { %1572 = vmatpush1.bf16.msra.mxu1 %v4826_v29  ;;  %1614 = vmatprep.subr.bf16.mxu0 %v4831_v31 }
 0x1cd   : > { %1573 = vmatprep.subr.bf16.mxu1 %v4827_v55 }
 0x1cf   : > { %1615 = vmatpush1.bf16.msra.mxu0 %v4829_v33 }
 0x1d0   : > { %1574 = vmatpush1.bf16.msra.mxu1 %v4832_v34  ;;  %1616 = vmatprep.subr.bf16.mxu0 %v4837_v47 }
 0x1d1   : > { %1575 = vmatprep.subr.bf16.mxu1 %v4833_v46 }
 0x1d3   : > { %1617 = vmatpush1.bf16.msra.mxu0 %v4835_v50 }
 0x1d4   : > { %1576 = vmatpush1.bf16.msra.mxu1 %v4838_v40  ;;  %1618 = vmatprep.subr.bf16.mxu0 %v4843_v54 }
 0x1d5   : > { %1577 = vmatprep.subr.bf16.mxu1 %v4839_v53 }
 0x1d7   : > { %1619 = vmatpush1.bf16.msra.mxu0 %v4841_v58 }
 0x1d8   : > { %1578 = vmatpush1.bf16.msra.mxu1 %v4844_v59  ;;  %2142 = vmatprep.subr.bf16.mxu0 %v4850_v61 }
 0x1d9   : > { %2029 = vmatprep.subr.bf16.mxu1 %v4847_v60 }
 0x200   : > { %v1013_v13 = vpop.f32.mrb[0].mxu0 }
 0x201   : > { %v1015_v17 = vpop.f32.mrb[1].mxu0  ;;  %v1014_v21 = vadd.f32 %v1013_v13, %v5672_v12 }
 0x202   : > { %v1017_v20 = vpop.f32.mrb[2].mxu0  ;;  %v1016_v24 = vadd.f32 %v1015_v17, %v5675_v14 }
 0x203   : > { %v1018_v22 = vadd.f32 %v1017_v20, %v5672_v12  ;;  %v1019_v23 = vpop.f32.mrb[3].mxu0 }
 0x204   : > { %v1020_v25 = vadd.f32 %v1019_v23, %v5675_v14 }
 0x205   : > { %v1092_v28 = vmax.f32 %v1014_v21, %v1018_v22  ;;  %v5681_v41 = vpack.c.bf16 %v1018_v22, %v1014_v21 }
 0x206   : > { %v1105_v43 = vmax.f32 %v1016_v24, %v1020_v25  ;;  %v5683_v30 = vpack.c.bf16 %v1020_v25, %v1016_v24 }
 0x209   : > { %v1023_v32 = vpop.f32.mrb[4].mxu0 }
 0x20a   : > { %v1024_v35 = vadd.f32 %v1023_v32, %v5672_v12  ;;  %v1025_v36 = vpop.f32.mrb[5].mxu0 }
 0x20b   : > { %v1026_v37 = vadd.f32 %v1025_v36, %v5675_v14  ;;  %v1027_v38 = vpop.f32.mrb[6].mxu0 }
 0x20c   : > { %v1093_v39 = vmax.f32 %v1092_v28, %v1024_v35  ;;  %v1028_v44 = vadd.f32 %v1027_v38, %v5672_v12  ;;  %v1029_v45 = vpop.f32.mrb[7].mxu0 }
 0x20d   : > { %v1106_v48 = vmax.f32 %v1105_v43, %v1026_v37  ;;  %v1030_v49 = vadd.f32 %v1029_v45, %v5675_v14 }
 0x20e   : > { %v1094_v51 = vmax.f32 %v1093_v39, %v1028_v44  ;;  %v5689_v52 = vpack.c.bf16 %v1028_v44, %v1024_v35 }
 0x20f   : > { %v1107_v56 = vmax.f32 %v1106_v48, %v1030_v49  ;;  %v5691_v57 = vpack.c.bf16 %v1030_v49, %v1026_v37 }
 0x21c   : > { %v1033_v62 = vpop.f32.mrb[8].mxu0 }
 0x21d   : > { %v1034_v63 = vadd.f32 %v1033_v62, %v5672_v12  ;;  %v1035_v0 = vpop.f32.mrb[9].mxu0 }
 0x21e   : > { %v1036_v3 = vadd.f32 %v1035_v0, %v5675_v14  ;;  %v1037_v4 = vpop.f32.mrb[10].mxu0 }
 0x21f   : > { %v1095_v5 = vmax.f32 %v1094_v51, %v1034_v63  ;;  %v1038_v8 = vadd.f32 %v1037_v4, %v5672_v12  ;;  %v1039_v9 = vpop.f32.mrb[11].mxu0 }
 0x220   : > { %v1108_v10 = vmax.f32 %v1107_v56, %v1036_v3  ;;  %v1040_v11 = vadd.f32 %v1039_v9, %v5675_v14 }
 0x221   : > { %v1096_v13 = vmax.f32 %v1095_v5, %v1038_v8  ;;  %v5697_v15 = vpack.c.bf16 %v1038_v8, %v1034_v63 }
 0x222   : > { %v1109_v16 = vmax.f32 %v1108_v10, %v1040_v11  ;;  %v5699_v17 = vpack.c.bf16 %v1040_v11, %v1036_v3 }
 0x22f   : > { %v1043_v18 = vpop.f32.mrb[12].mxu0 }
 0x230   : > { %v1044_v19 = vadd.f32 %v1043_v18, %v5672_v12  ;;  %v1045_v20 = vpop.f32.mrb[13].mxu0 }
 0x231   : > { %v1046_v21 = vadd.f32 %v1045_v20, %v5675_v14  ;;  %v1047_v22 = vpop.f32.mrb[14].mxu0 }
 0x232   : > { %v1097_v23 = vmax.f32 %v1096_v13, %v1044_v19  ;;  %v1048_v24 = vadd.f32 %v1047_v22, %v5672_v12  ;;  %v1049_v25 = vpop.f32.mrb[15].mxu0 }
 0x233   : > { %v1110_v26 = vmax.f32 %v1109_v16, %v1046_v21  ;;  %v1050_v27 = vadd.f32 %v1049_v25, %v5675_v14 }
 0x234   : > { %v1098_v28 = vmax.f32 %v1097_v23, %v1048_v24  ;;  %v5705_v42 = vpack.c.bf16 %v1048_v24, %v1044_v19 }
 0x235   : > { %v1111_v29 = vmax.f32 %v1110_v26, %v1050_v27  ;;  %v5707_v43 = vpack.c.bf16 %v1050_v27, %v1046_v21 }
 0x236   : > { %v1099_v20 = vrot.slane %v1098_v28, 4 }
 0x237   : > { %v1112_v21 = vrot.slane %v1111_v29, 4 }
 0x238   : > { %v1100_v22 = vmax.f32 %v1098_v28, %v1099_v20 }
 0x239   : > { %v1113_v23 = vmax.f32 %v1111_v29, %v1112_v21 }
 0x23a   : > { %v1101_v25 = vrot.slane %v1100_v22, 2 }
 0x242   : > { %v1053_v55 = vpop.f32.mrb[16].mxu0 }
 0x243   : > { %v1055_v31 = vpop.f32.mrb[17].mxu0  ;;  %v1054_v33 = vadd.f32 %v1053_v55, %v5672_v12  ;;  %v1114_v55 = vrot.slane %v1113_v23, 2 }
 0x244   : > { %v1057_v32 = vpop.f32.mrb[18].mxu0  ;;  %v1056_v36 = vadd.f32 %v1055_v31, %v5675_v14 }
 0x245   : > { %v1058_v34 = vadd.f32 %v1057_v32, %v5672_v12  ;;  %v1059_v35 = vpop.f32.mrb[19].mxu0  ;;  %v1115_v29 = vmax.f32 %v1113_v23, %v1114_v55  ;;  %v4845_v23 = vld [vmem:[#allocation6] ss:$16 sps:$4 sm:$0xff]  }
 0x246   : > { %v1060_v37 = vadd.f32 %v1059_v35, %v5675_v14  ;;  %v4851_v55 = vld [vmem:[#allocation6 + $0x20] ss:$16 sps:$4 sm:$0xff]  }
 0x247   : > { %v1118_v38 = vmax.f32 %v1054_v33, %v1058_v34  ;;  %v5713_v39 = vpack.c.bf16 %v1058_v34, %v1054_v33 }
 0x248   : > { %v1131_v44 = vmax.f32 %v1056_v36, %v1060_v37  ;;  %v5715_v45 = vpack.c.bf16 %v1060_v37, %v1056_v36 }
 0x255   : > { %v1063_v46 = vpop.f32.mrb[20].mxu0 }
 0x256   : > { %v1064_v47 = vadd.f32 %v1063_v46, %v5672_v12  ;;  %v1065_v48 = vpop.f32.mrb[21].mxu0 }
 0x257   : > { %v1066_v49 = vadd.f32 %v1065_v48, %v5675_v14  ;;  %v1067_v50 = vpop.f32.mrb[22].mxu0 }
 0x258   : > { %v1119_v40 = vmax.f32 %v1118_v38, %v1064_v47  ;;  %v1068_v51 = vadd.f32 %v1067_v50, %v5672_v12  ;;  %v1069_v53 = vpop.f32.mrb[23].mxu0  ;;  %v1102_v38 = vmax.f32 %v1100_v22, %v1101_v25 }
 0x259   : > { %v1132_v54 = vmax.f32 %v1131_v44, %v1066_v49  ;;  %v1070_v56 = vadd.f32 %v1069_v53, %v5675_v14 }
 0x25a   : > { %v1120_v58 = vmax.f32 %v1119_v40, %v1068_v51  ;;  %v5721_v59 = vpack.c.bf16 %v1068_v51, %v1064_v47  ;;  %v1103_v50 = vrot.slane %v1102_v38, 1  ;;  %v1116_v51 = vrot.slane %v1115_v29, 1 }
 0x25b   : > { %v1133_v60 = vmax.f32 %v1132_v54, %v1070_v56  ;;  %v5723_v61 = vpack.c.bf16 %v1070_v56, %v1066_v49 }
 0x25c   : > { %v1104_v56 = vmax.f32 %v1102_v38, %v1103_v50  ;;  %v4863_v38 = vld [vmem:[#allocation6 + $0x60] ss:$16 sps:$4 sm:$0xff]   ;;  %v4880_v50 = vld [vmem:[#allocation6 + $0xac] ss:$16 sps:$4 sm:$0xff]  }
 0x268   : > { %v1073_v62 = vpop.f32.mrb[24].mxu0 }
 0x269   : > { %v1074_v63 = vadd.f32 %v1073_v62, %v5672_v12  ;;  %v1075_v0 = vpop.f32.mrb[25].mxu0 }
 0x26a   : > { %v1076_v3 = vadd.f32 %v1075_v0, %v5675_v14  ;;  %v1077_v4 = vpop.f32.mrb[26].mxu0  ;;  %v1144_v0 = vpack.c.bf16 %v1104_v56, %v1104_v56  ;;  %v4884_v56 = vld [vmem:[#allocation6 + $0xc8] ss:$16 sps:$4 sm:$0xff]  }
 0x26b   : > { %v1121_v5 = vmax.f32 %v1120_v58, %v1074_v63  ;;  %v1078_v8 = vadd.f32 %v1077_v4, %v5672_v12  ;;  %v1079_v9 = vpop.f32.mrb[27].mxu0 }
 0x26c   : > { %v1134_v10 = vmax.f32 %v1133_v60, %v1076_v3  ;;  %v1080_v11 = vadd.f32 %v1079_v9, %v5675_v14 }
 0x26d   : > { %v1122_v13 = vmax.f32 %v1121_v5, %v1078_v8  ;;  %v5729_v16 = vpack.c.bf16 %v1078_v8, %v1074_v63 }
 0x26e   : > { %v1135_v18 = vmax.f32 %v1134_v10, %v1080_v11  ;;  %v5731_v19 = vpack.c.bf16 %v1080_v11, %v1076_v3  ;;  %v1216_v10 = vunpack.c.l.b16 %v1144_v0  ;;  %v4898_v0 = vld [vmem:[#allocation6 + $0x10c] ss:$16 sps:$4 sm:$0xff]  }
 0x27b   : > { %v1083_v24 = vpop.f32.mrb[28].mxu0 }
 0x27c   : > { %v1084_v26 = vadd.f32 %v1083_v24, %v5672_v12  ;;  %v1085_v27 = vpop.f32.mrb[29].mxu0  ;;  %v4848_v24 = vld [vmem:[#allocation6 + $0x8] ss:$16 sps:$4 sm:$0xff]  }
 0x27d   : > { %v1086_v31 = vadd.f32 %v1085_v27, %v5675_v14  ;;  %v1087_v32 = vpop.f32.mrb[30].mxu0  ;;  %v4856_v27 = vld [vmem:[#allocation6 + $0x2c] ss:$16 sps:$4 sm:$0xff]  }
 0x27e   : > { %v1123_v33 = vmax.f32 %v1122_v13, %v1084_v26  ;;  %v1088_v34 = vadd.f32 %v1087_v32, %v5672_v12  ;;  %v1089_v35 = vpop.f32.mrb[31].mxu0  ;;  %v4859_v32 = vld [vmem:[#allocation6 + $0x44] ss:$16 sps:$4 sm:$0xff]  }
 0x27f   : > { %v1136_v36 = vmax.f32 %v1135_v18, %v1086_v31  ;;  %v1090_v37 = vadd.f32 %v1089_v35, %v5675_v14  ;;  %v1117_v14 = vmax.f32 %v1115_v29, %v1116_v51  ;;  %v4860_v35 = vld [vmem:[#allocation6 + $0x48] ss:$16 sps:$4 sm:$0xff]   ;;  %v4871_v29 = vld [vmem:[#allocation6 + $0x84] ss:$16 sps:$4 sm:$0xff]  }
 0x280   : > { %v1124_v44 = vmax.f32 %v1123_v33, %v1088_v34  ;;  %v5737_v28 = vpack.c.bf16 %v1088_v34, %v1084_v26  ;;  %v4853_v26 = vld [vmem:[#allocation6 + $0x24] ss:$16 sps:$4 sm:$0xff]   ;;  %v4862_v33 = vld [vmem:[#allocation6 + $0x4c] ss:$16 sps:$4 sm:$0xff]   ;;  %v4857_v34 = vld [vmem:[#allocation6 + $0x40] ss:$16 sps:$4 sm:$0xff]  }
 0x281   : > { %v1137_v46 = vmax.f32 %v1136_v36, %v1090_v37  ;;  %v5739_v47 = vpack.c.bf16 %v1090_v37, %v1086_v31  ;;  %v1145_v5 = vpack.c.bf16 %v1117_v14, %v1117_v14  ;;  %v4854_v31 = vld [vmem:[#allocation6 + $0x28] ss:$16 sps:$4 sm:$0xff]   ;;  %v4865_v36 = vld [vmem:[#allocation6 + $0x64] ss:$16 sps:$4 sm:$0xff]   ;;  %v4868_v37 = vld [vmem:[#allocation6 + $0x6c] ss:$16 sps:$4 sm:$0xff]  }
 0x282   : > { %v1125_v48 = vrot.slane %v1124_v44, 4  ;;  %v4878_v51 = vld [vmem:[#allocation6 + $0xa8] ss:$16 sps:$4 sm:$0xff]   ;;  %v4887_v14 = vld [vmem:[#allocation6 + $0xe0] ss:$16 sps:$4 sm:$0xff]  }
 0x283   : > { %v1138_v49 = vrot.slane %v1137_v46, 4  ;;  %v1217_v13 = vunpack.c.l.b16 %v1145_v5  ;;  %v4901_v5 = vld [vmem:[#allocation6 + $0x124] ss:$16 sps:$4 sm:$0xff]  }
 0x284   : > { %v1126_v40 = vmax.f32 %v1124_v44, %v1125_v48  ;;  %v4866_v44 = vld [vmem:[#allocation6 + $0x68] ss:$16 sps:$4 sm:$0xff]  }
 0x285   : > { %v1139_v53 = vmax.f32 %v1137_v46, %v1138_v49  ;;  %v4869_v46 = vld [vmem:[#allocation6 + $0x80] ss:$16 sps:$4 sm:$0xff]   ;;  %v4872_v48 = vld [vmem:[#allocation6 + $0x88] ss:$16 sps:$4 sm:$0xff]   ;;  %v4877_v49 = vld [vmem:[#allocation6 + $0xa4] ss:$16 sps:$4 sm:$0xff]  }
 0x286   : > { %v1127_v54 = vrot.slane %v1126_v40, 2 }
 0x287   : > { %v1140_v12 = vrot.slane %v1139_v53, 2 }
 0x288   : > { %v1128_v58 = vmax.f32 %v1126_v40, %v1127_v54  ;;  %v4875_v40 = vld [vmem:[#allocation6 + $0xa0] ss:$16 sps:$4 sm:$0xff]   ;;  %v4886_v54 = vld [vmem:[#allocation6 + $0xcc] ss:$16 sps:$4 sm:$0xff]  }
 0x289   : > { %v1141_v60 = vmax.f32 %v1139_v53, %v1140_v12  ;;  %v4883_v53 = vld [vmem:[#allocation6 + $0xc4] ss:$16 sps:$4 sm:$0xff]   ;;  %v4881_v12 = vld [vmem:[#allocation6 + $0xc0] ss:$16 sps:$4 sm:$0xff]  }
 0x28a   : > { %v1129_v62 = vrot.slane %v1128_v58, 1 }
 0x28b   : > { %v1142_v63 = vrot.slane %v1141_v60, 1 }
 0x28c   : > { %v1130_v3 = vmax.f32 %v1128_v58, %v1129_v62  ;;  %v4889_v58 = vld [vmem:[#allocation6 + $0xe4] ss:$16 sps:$4 sm:$0xff]   ;;  %v4890_v62 = vld [vmem:[#allocation6 + $0xe8] ss:$16 sps:$4 sm:$0xff]  }
 0x28d   : > { %v1143_v4 = vmax.f32 %v1141_v60, %v1142_v63  ;;  %v4892_v60 = vld [vmem:[#allocation6 + $0xec] ss:$16 sps:$4 sm:$0xff]   ;;  %v4895_v63 = vld [vmem:[#allocation6 + $0x104] ss:$16 sps:$4 sm:$0xff]  }
 0x28e   : > { %v1146_v8 = vpack.c.bf16 %v1130_v3, %v1130_v3  ;;  %v4893_v3 = vld [vmem:[#allocation6 + $0x100] ss:$16 sps:$4 sm:$0xff]  }
 0x28f   : > { %v1147_v9 = vpack.c.bf16 %v1143_v4, %v1143_v4  ;;  %v4896_v4 = vld [vmem:[#allocation6 + $0x108] ss:$16 sps:$4 sm:$0xff]  }
 0x290   : > { %v1218_v11 = vunpack.c.l.b16 %v1146_v8  ;;  %v4904_v8 = vld [vmem:[#allocation6 + $0x12c] ss:$16 sps:$4 sm:$0xff]  }
 0x291   : > { %v1219_v18 = vunpack.c.l.b16 %v1147_v9  ;;  %v4899_v9 = vld [vmem:[#allocation6 + $0x120] ss:$16 sps:$4 sm:$0xff]  }
 0x292   : > { %v1221_v20 = vsel %vm1220_vm0, %v1218_v11, %v1216_v10  ;;  %v4902_v10 = vld [vmem:[#allocation6 + $0x128] ss:$16 sps:$4 sm:$0xff]   ;;  %v4907_v11 = vld [vmem:[#allocation6 + $0x144] ss:$16 sps:$4 sm:$0xff]  }
 0x293   : > { %v1222_v21 = vsel %vm1220_vm0, %v1219_v18, %v1217_v13  ;;  %v1223_v25 = vpack.c.b16 %v1221_v20, %v1221_v20  ;;  %v4910_v13 = vld [vmem:[#allocation6 + $0x14c] ss:$16 sps:$4 sm:$0xff]   ;;  %v4905_v18 = vld [vmem:[#allocation6 + $0x140] ss:$16 sps:$4 sm:$0xff]   ;;  %v4908_v20 = vld [vmem:[#allocation6 + $0x148] ss:$16 sps:$4 sm:$0xff]  }
 0x294   : > { %v1224_v22 = vpack.c.b16 %v1222_v21, %v1222_v21  ;;  %v4913_v21 = vld [vmem:[#allocation6 + $0x164] ss:$16 sps:$4 sm:$0xff]  }
 0x296   : > { %1579 = vmatprep.mubr.bf16.mxu1 %v1224_v22  ;;  %1620 = vmatprep.mubr.bf16.mxu0 %v1224_v22  ;;  %v4916_v22 = vld [vmem:[#allocation6 + $0x16c] ss:$16 sps:$4 sm:$0xff]  }
 0x297   : > { %1580 = vmatmul.mubr.bf16.vlgmr.msra.gmra.mrb[0].mxu1 %v1223_v25  ;;  %1621 = vmatmul.mubr.bf16.vlgmr.msra.gmra.mrb[32].mxu0 %v1223_v25  ;;  %v4919_v25 = vld [vmem:[#allocation6 + $0x184] ss:$16 sps:$4 sm:$0xff]  }
 0x298   : > { %2030 = vmatpush1.bf16.msra.mxu1 %v4845_v23  ;;  %2143 = vmatpush1.bf16.msra.mxu0 %v4848_v24  ;;  %v4911_v23 = vld [vmem:[#allocation6 + $0x160] ss:$16 sps:$4 sm:$0xff]   ;;  %v4914_v24 = vld [vmem:[#allocation6 + $0x168] ss:$16 sps:$4 sm:$0xff]  }
 0x299   : > { %2061 = vmatprep.mubr.bf16.mxu1 %v5683_v30  ;;  %2174 = vmatprep.mubr.bf16.mxu0 %v5683_v30  ;;  %v4874_v30 = vld [vmem:[#allocation6 + $0x8c] ss:$16 sps:$4 sm:$0xff]  }
 0x29a   : > { %2031 = vmatprep.subr.bf16.mxu1 %v4853_v26  ;;  %2144 = vmatprep.subr.bf16.mxu0 %v4856_v27  ;;  %v4922_v26 = vld [vmem:[#allocation6 + $0x18c] ss:$16 sps:$4 sm:$0xff]   ;;  %v4917_v27 = vld [vmem:[#allocation6 + $0x180] ss:$16 sps:$4 sm:$0xff]  }
 0x29c   : > { %2032 = vmatpush1.bf16.msra.mxu1 %v4851_v55  ;;  %2145 = vmatpush1.bf16.msra.mxu0 %v4854_v31  ;;  %v4920_v55 = vld [vmem:[#allocation6 + $0x188] ss:$16 sps:$4 sm:$0xff]   ;;  %v4925_v31 = vld [vmem:[#allocation6 + $0x1a4] ss:$16 sps:$4 sm:$0xff]  }
 0x29d   : > { %2033 = vmatprep.subr.bf16.mxu1 %v4859_v32  ;;  %2146 = vmatprep.subr.bf16.mxu0 %v4862_v33  ;;  %v4928_v32 = vld [vmem:[#allocation6 + $0x1ac] ss:$16 sps:$4 sm:$0xff]   ;;  %v4923_v33 = vld [vmem:[#allocation6 + $0x1a0] ss:$16 sps:$4 sm:$0xff]  }
 0x2a0   : > { %2034 = vmatpush1.bf16.msra.mxu1 %v4857_v34  ;;  %2147 = vmatpush1.bf16.msra.mxu0 %v4860_v35  ;;  %v4926_v34 = vld [vmem:[#allocation6 + $0x1a8] ss:$16 sps:$4 sm:$0xff]   ;;  %v4931_v35 = vld [vmem:[#allocation6 + $0x1c4] ss:$16 sps:$4 sm:$0xff]  }
 0x2a1   : > { %2035 = vmatprep.subr.bf16.mxu1 %v4865_v36  ;;  %2148 = vmatprep.subr.bf16.mxu0 %v4868_v37  ;;  %v4934_v36 = vld [vmem:[#allocation6 + $0x1cc] ss:$16 sps:$4 sm:$0xff]   ;;  %v4929_v37 = vld [vmem:[#allocation6 + $0x1c0] ss:$16 sps:$4 sm:$0xff]  }
 0x2a4   : > { %2036 = vmatpush1.bf16.msra.mxu1 %v4863_v38  ;;  %2149 = vmatpush1.bf16.msra.mxu0 %v4866_v44  ;;  %v4932_v38 = vld [vmem:[#allocation6 + $0x1c8] ss:$16 sps:$4 sm:$0xff]   ;;  %v4937_v44 = vld [vmem:[#allocation6 + $0x1e4] ss:$16 sps:$4 sm:$0xff]  }
 0x2a5   : > { %2037 = vmatprep.subr.bf16.mxu1 %v4871_v29  ;;  %2150 = vmatprep.subr.bf16.mxu0 %v4874_v30  ;;  %v4940_v29 = vld [vmem:[#allocation6 + $0x1ec] ss:$16 sps:$4 sm:$0xff]   ;;  %v4935_v30 = vld [vmem:[#allocation6 + $0x1e0] ss:$16 sps:$4 sm:$0xff]  }
 0x2a8   : > { %2038 = vmatpush1.bf16.msra.mxu1 %v4869_v46  ;;  %2151 = vmatpush1.bf16.msra.mxu0 %v4872_v48  ;;  %v4938_v46 = vld [vmem:[#allocation6 + $0x1e8] ss:$16 sps:$4 sm:$0xff]   ;;  %v4951_v48 = vld [vmem:[%s6443_s8 + $0x10] sm:$0xff]  }
 0x2a9   : > { %2039 = vmatprep.subr.bf16.mxu1 %v4877_v49  ;;  %2152 = vmatprep.subr.bf16.mxu0 %v4880_v50  ;;  %v4952_v49 = vld [vmem:[%s6443_s8 + $0x90] sm:$0xff]   ;;  %v4953_v50 = vld [vmem:[%s6443_s8 + $0x58] sm:$0xff]  }
 0x2ac   : > { %2040 = vmatpush1.bf16.msra.mxu1 %v4875_v40  ;;  %2153 = vmatpush1.bf16.msra.mxu0 %v4878_v51  ;;  %v4954_v40 = vld [vmem:[%s6443_s8 + $0xd8] sm:$0xff]  }
 0x2ad   : > { %2041 = vmatprep.subr.bf16.mxu1 %v4883_v53  ;;  %2154 = vmatprep.subr.bf16.mxu0 %v4886_v54  ;;  %v4956_v51 = vld [vmem:[%s6443_s8 + $0x98] sm:$0xff]   ;;  %v4957_v53 = vld [vmem:[%s6443_s8 + $0x60] sm:$0xff]  }
 0x2ae   : > { %v4959_v54 = vld [vmem:[%s6443_s8 + $0x20] sm:$0xff]  }
 0x2b0   : > { %2042 = vmatpush1.bf16.msra.mxu1 %v4881_v12  ;;  %2155 = vmatpush1.bf16.msra.mxu0 %v4884_v56  ;;  %v4960_v12 = vld [vmem:[%s6443_s8 + $0xa0] sm:$0xff]   ;;  %v4961_v56 = vld [vmem:[%s6443_s8 + $0x68] sm:$0xff]  }
 0x2b1   : > { %2043 = vmatprep.subr.bf16.mxu1 %v4889_v58  ;;  %2156 = vmatprep.subr.bf16.mxu0 %v4892_v60  ;;  %v4964_v58 = vld [vmem:[%s6443_s8 + $0xa8] sm:$0xff]   ;;  %v4966_v60 = vld [vmem:[%s6443_s8 + $0xf0] sm:$0xff]  }
 0x2b4   : > { %2044 = vmatpush1.bf16.msra.mxu1 %v4887_v14  ;;  %2157 = vmatpush1.bf16.msra.mxu0 %v4890_v62  ;;  %v4967_v14 = vld [vmem:[%s6443_s8 + $0x30] sm:$0xff]  }
 0x2b5   : > { %2045 = vmatprep.subr.bf16.mxu1 %v4895_v63  ;;  %2158 = vmatprep.subr.bf16.mxu0 %v4898_v0  ;;  %v4968_v62 = vld [vmem:[%s6443_s8 + $0xb0] sm:$0xff]   ;;  %v4969_v63 = vld [vmem:[%s6443_s8 + $0x78] sm:$0xff]  }
 0x2b6   : > { %v4970_v0 = vld [vmem:[%s6443_s8 + $0xf8] sm:$0xff]  }
 0x2b8   : > { %2046 = vmatpush1.bf16.msra.mxu1 %v4893_v3  ;;  %2159 = vmatpush1.bf16.msra.mxu0 %v4896_v4  ;;  %v4971_v3 = vld [vmem:[%s6443_s8 + $0x38] sm:$0xff]  }
 0x2b9   : > { %2047 = vmatprep.subr.bf16.mxu1 %v4901_v5  ;;  %2160 = vmatprep.subr.bf16.mxu0 %v4904_v8  ;;  %v4972_v4 = vld [vmem:[%s6443_s8 + $0xb8] sm:$0xff]   ;;  %v5270_v5 = vmov 1966171168  }
 0x2ba   : > { %v2262_v8 = vunpack.c.l.s4 %v5270_v5 }
 0x2bc   : > { %2048 = vmatpush1.bf16.msra.mxu1 %v4899_v9  ;;  %2161 = vmatpush1.bf16.msra.mxu0 %v4902_v10  ;;  %v2263_v9 = vunpack.c.0.s8 %v2262_v8 }
 0x2bd   : > { %2049 = vmatprep.subr.bf16.mxu1 %v4907_v11  ;;  %2162 = vmatprep.subr.bf16.mxu0 %v4910_v13 }
 0x2be   : > { %v5872_v13 = vsub.s32 %v2263_v9, %v5660_v1 }
 0x2c0   : > { %2050 = vmatpush1.bf16.msra.mxu1 %v4905_v18  ;;  %2163 = vmatpush1.bf16.msra.mxu0 %v4908_v20 }
 0x2c1   : > { %2051 = vmatprep.subr.bf16.mxu1 %v4913_v21  ;;  %2164 = vmatprep.subr.bf16.mxu0 %v4916_v22 }
 0x2c4   : > { %2052 = vmatpush1.bf16.msra.mxu1 %v4911_v23  ;;  %2165 = vmatpush1.bf16.msra.mxu0 %v4914_v24 }
 0x2c5   : > { %2053 = vmatprep.subr.bf16.mxu1 %v4919_v25  ;;  %2166 = vmatprep.subr.bf16.mxu0 %v4922_v26 }
 0x2c8   : > { %2054 = vmatpush1.bf16.msra.mxu1 %v4917_v27  ;;  %2167 = vmatpush1.bf16.msra.mxu0 %v4920_v55 }
 0x2c9   : > { %2055 = vmatprep.subr.bf16.mxu1 %v4925_v31  ;;  %2168 = vmatprep.subr.bf16.mxu0 %v4928_v32 }
 0x2cc   : > { %2056 = vmatpush1.bf16.msra.mxu1 %v4923_v33  ;;  %2169 = vmatpush1.bf16.msra.mxu0 %v4926_v34  ;;  %v4975_v33 = vld [vmem:[#allocation9 + $0x4] ss:$12 sps:$4 sm:$0xff]   ;;  %v5884_v34 = vld [vmem:[#allocation9 + $0x8] ss:$12 sps:$4 sm:$0xff]  }
 0x2cd   : > { %2057 = vmatprep.subr.bf16.mxu1 %v4931_v35  ;;  %2170 = vmatprep.subr.bf16.mxu0 %v4934_v36  ;;  %v5889_v36 = vsub.s32 2, %v5660_v1 }
 0x2d0   : > { %2058 = vmatpush1.bf16.msra.mxu1 %v4929_v37  ;;  %2171 = vmatpush1.bf16.msra.mxu0 %v4932_v38  ;;  %v5892_v37 = vsub.s32 3, %v5660_v1  ;;  %v2395_v38 = vld [vmem:[%s6442_s7] sm:$0xf] }
 0x2d1   : > { %2059 = vmatprep.subr.bf16.mxu1 %v4937_v44  ;;  %2172 = vmatprep.subr.bf16.mxu0 %v4940_v29 }
 0x2d4   : > { %2060 = vmatpush1.bf16.msra.mxu1 %v4935_v30  ;;  %2173 = vmatpush1.bf16.msra.mxu0 %v4938_v46  ;;  %v5904_v30 = vrot.slane %v2395_v38, %v5889_v36  ;;  %v5907_v46 = vrot.slane %v2395_v38, %v5666_v6 }
 0x2d7   : > { %2062 = vmatmul.mubr.bf16.vlgmr.msra.gmra.mrb[4].mxu1 %v5681_v41  ;;  %2175 = vmatmul.mubr.bf16.vlgmr.msra.gmra.mrb[36].mxu0 %v5681_v41  ;;  %v4941_v41 = vld [vmem:[%s6443_s8 + $0x40] sm:$0xff]  }
 0x2d8   : > { %2071 = vmatprep.mubr.bf16.mxu1 %v5691_v57  ;;  %2184 = vmatprep.mubr.bf16.mxu0 %v5691_v57  ;;  %v4943_v57 = vld [vmem:[%s6443_s8] sm:$0xff]  }
 0x2d9   : > { %4335 = vmatprep.subr.bf16.mxu1 %v4941_v41 }
 0x2da   : > { %4336 = vmatpush3.bf16.msra.mxu1 %v4943_v57 }
 0x2df   : > { %2072 = vmatmul.mubr.bf16.gmra.mrb[8].mxu1 %v5689_v52  ;;  %2185 = vmatmul.mubr.bf16.gmra.mrb[40].mxu0 %v5689_v52  ;;  %v4942_v52 = vld [vmem:[%s6443_s8 + $0xc0] sm:$0xff]  }
 0x2e0   : > { %2081 = vmatprep.mubr.bf16.mxu1 %v5699_v17  ;;  %2194 = vmatprep.mubr.bf16.mxu0 %v5699_v17  ;;  %v4945_v17 = vld [vmem:[%s6443_s8 + $0x48] sm:$0xff]  }
 0x2e1   : > { %4399 = vmatprep.subr.bf16.mxu0 %v4942_v52  ;;  %4337 = vmatprep.subr.bf16.mxu1 %v4945_v17  ;;  %v5916_v52 = vrot.slane %v2395_v38, %v5892_v37  ;;  %v5919_v17 = vrot.slane %v2395_v38, %v5669_v7 }
 0x2e7   : > { %2082 = vmatmul.mubr.bf16.gmra.mrb[12].mxu1 %v5697_v15  ;;  %2195 = vmatmul.mubr.bf16.gmra.mrb[44].mxu0 %v5697_v15  ;;  %v4944_v15 = vld [vmem:[%s6443_s8 + $0x80] sm:$0xff]  }
 0x2e8   : > { %2091 = vmatprep.mubr.bf16.mxu1 %v5707_v43  ;;  %2204 = vmatprep.mubr.bf16.mxu0 %v5707_v43  ;;  %v4947_v43 = vld [vmem:[%s6443_s8 + $0x8] sm:$0xff]  }
 0x2e9   : > { %4400 = vmatpush3.bf16.msra.mxu0 %v4944_v15  ;;  %4338 = vmatpush3.bf16.msra.mxu1 %v4947_v43 }
 0x2ef   : > { %2092 = vmatmul.mubr.bf16.gmra.mrb[16].mxu1 %v5705_v42  ;;  %2205 = vmatmul.mubr.bf16.gmra.mrb[48].mxu0 %v5705_v42  ;;  %v4946_v42 = vld [vmem:[%s6443_s8 + $0xc8] sm:$0xff]  }
 0x2f0   : > { %2101 = vmatprep.mubr.bf16.mxu1 %v5715_v45  ;;  %2214 = vmatprep.mubr.bf16.mxu0 %v5715_v45  ;;  %v4949_v45 = vld [vmem:[%s6443_s8 + $0x50] sm:$0xff]  }
 0x2f1   : > { %4401 = vmatprep.subr.bf16.mxu0 %v4946_v42  ;;  %4339 = vmatprep.subr.bf16.mxu1 %v4949_v45 }
 0x2f2   : > { %4340 = vmatpush3.bf16.msra.mxu1 %v4951_v48 }
 0x2f3   : > { %4341 = vmatprep.subr.bf16.mxu1 %v4953_v50 }
 0x2f7   : > { %2102 = vmatmul.mubr.bf16.gmra.mrb[20].mxu1 %v5713_v39  ;;  %2215 = vmatmul.mubr.bf16.gmra.mrb[52].mxu0 %v5713_v39  ;;  %v4948_v39 = vld [vmem:[%s6443_s8 + $0x88] sm:$0xff]  }
 0x2f8   : > { %2111 = vmatprep.mubr.bf16.mxu1 %v5723_v61  ;;  %2224 = vmatprep.mubr.bf16.mxu0 %v5723_v61  ;;  %v4950_v61 = vld [vmem:[%s6443_s8 + $0xd0] sm:$0xff]  }
 0x2f9   : > { %4402 = vmatpush3.bf16.msra.mxu0 %v4948_v39 }
 0x2fa   : > { %4403 = vmatprep.subr.bf16.mxu0 %v4950_v61 }
 0x2fd   : > { %4404 = vmatpush3.bf16.msra.mxu0 %v4952_v49 }
 0x2fe   : > { %4405 = vmatprep.subr.bf16.mxu0 %v4954_v40 }
 0x2ff   : > { %2112 = vmatmul.mubr.bf16.gmra.mrb[24].mxu1 %v5721_v59  ;;  %2225 = vmatmul.mubr.bf16.gmra.mrb[56].mxu0 %v5721_v59  ;;  %v4955_v59 = vld [vmem:[%s6443_s8 + $0x18] sm:$0xff]  }
 0x300   : > { %2121 = vmatprep.mubr.bf16.mxu1 %v5731_v19  ;;  %2234 = vmatprep.mubr.bf16.mxu0 %v5731_v19  ;;  %v4958_v19 = vld [vmem:[%s6443_s8 + $0xe0] sm:$0xff]  }
 0x301   : > { %4342 = vmatpush3.bf16.msra.mxu1 %v4955_v59  ;;  %4406 = vmatpush3.bf16.msra.mxu0 %v4956_v51 }
 0x302   : > { %4343 = vmatprep.subr.bf16.mxu1 %v4957_v53  ;;  %4407 = vmatprep.subr.bf16.mxu0 %v4958_v19 }
 0x305   : > { %4344 = vmatpush3.bf16.msra.mxu1 %v4959_v54  ;;  %4408 = vmatpush3.bf16.msra.mxu0 %v4960_v12 }
 0x306   : > { %4345 = vmatprep.subr.bf16.mxu1 %v4961_v56 }
 0x307   : > { %2122 = vmatmul.mubr.bf16.gmra.mrb[28].mxu1 %v5729_v16  ;;  %2235 = vmatmul.mubr.bf16.gmra.mrb[60].mxu0 %v5729_v16  ;;  %v4962_v16 = vld [vmem:[%s6443_s8 + $0xe8] sm:$0xff]  }
 0x308   : > { %2131 = vmatprep.mubr.bf16.mxu1 %v5739_v47  ;;  %2244 = vmatprep.mubr.bf16.mxu0 %v5739_v47  ;;  %v4963_v47 = vld [vmem:[%s6443_s8 + $0x28] sm:$0xff]  }
 0x309   : > { %4409 = vmatprep.subr.bf16.mxu0 %v4962_v16  ;;  %4346 = vmatpush3.bf16.msra.mxu1 %v4963_v47 }
 0x30a   : > { %4410 = vmatpush3.bf16.msra.mxu0 %v4964_v58 }
 0x30b   : > { %4411 = vmatprep.subr.bf16.mxu0 %v4966_v60 }
 0x30e   : > { %4412 = vmatpush3.bf16.msra.mxu0 %v4968_v62 }
 0x30f   : > { %2132 = vmatmul.mubr.bf16.gmra.mrb[32].mxu1 %v5737_v28  ;;  %2245 = vmatmul.mubr.bf16.gmra.mrb[64].mxu0 %v5737_v28  ;;  %v4965_v28 = vld [vmem:[%s6443_s8 + $0x70] sm:$0xff]  }
 0x310   : > { %4347 = vmatprep.subr.bf16.mxu1 %v4965_v28  ;;  %4413 = vmatprep.subr.bf16.mxu0 %v4970_v0 }
 0x311   : > { %4348 = vmatpush3.bf16.msra.mxu1 %v4967_v14 }
 0x312   : > { %4349 = vmatprep.subr.bf16.mxu1 %v4969_v63  ;;  %4414 = vmatpush3.bf16.msra.mxu0 %v4972_v4 }
 0x313   : > { %4511 = vmatprep.subr.bf16.mxu0 %v5884_v34 }
 0x315   : > { %4350 = vmatpush3.bf16.msra.mxu1 %v4971_v3 }
 0x316   : > { %3219 = vmatprep.subr.bf16.mxu1 %v4975_v33 }
 0x36a   : > { %v1581_v10 = vpop.f32.mrb[0].mxu1  ;;  %v1622_v11 = vpop.f32.mrb[32].mxu0 }
 0x36b   : > { %v1583_v18 = vpop.f32.mrb[1].mxu1  ;;  %v1624_v20 = vpop.f32.mrb[33].mxu0 }
 0x36c   : > { %v2259_v21 = vcombine.low %v1581_v10, %v1583_v18  ;;  %v2260_v22 = vcombine.low %v1622_v11, %v1624_v20  ;;  %v1585_v23 = vpop.f32.mrb[2].mxu1  ;;  %v1626_v24 = vpop.f32.mrb[34].mxu0 }
 0x36d   : > { %v1586_v25 = vpop.f32.mrb[3].mxu1  ;;  %v1627_v26 = vpop.f32.mrb[35].mxu0 }
 0x36e   : > { %v5875_v27 = vrot.slane %v2259_v21, %v5872_v13  ;;  %v5878_v55 = vrot.slane %v2260_v22, %v5872_v13 }
 0x370   : > { %v2275_v31 = vcombine.low %v5875_v27, %v5878_v55  ;;  %v2276_v32 = vcombine.high %v5875_v27, %v5878_v55 }
 0x372   : > { %v2283_v35 = vrot.slane %v2275_v31, %v5872_v13 }
 0x374   : > { %v5898_v44 = vrot.slane %v2283_v35, %v5666_v6  ;;  %v5901_v29 = vrot.slane %v2283_v35, %v5889_v36  ;;  %v5910_v41 = vrot.slane %v2283_v35, %v5669_v7  ;;  %v5913_v1 = vrot.slane %v2283_v35, %v5892_v37 }
 0x3aa   : > { %v2063_v57 = vpop.f32.mrb[4].mxu1  ;;  %v2176_v15 = vpop.f32.mrb[36].mxu0 }
 0x3ab   : > { %v2331_v42 = vadd.f32 %v5898_v44, %v2063_v57  ;;  %v2333_v43 = vadd.f32 %v5901_v29, %v2176_v15  ;;  %v2065_v39 = vpop.f32.mrb[5].mxu1  ;;  %v2178_v45 = vpop.f32.mrb[37].mxu0  ;;  %v4973_v57 = vld [vmem:[#allocation9] ss:$12 sps:$4 sm:$0xff]  }
 0x3ac   : > { %v2332_v61 = vadd.f32 %v5910_v41, %v2065_v39  ;;  %v2334_v48 = vadd.f32 %v5913_v1, %v2178_v45  ;;  %v2067_v49 = vpop.f32.mrb[6].mxu1  ;;  %v2180_v50 = vpop.f32.mrb[38].mxu0 }
 0x3ad   : > { %v2417_v40 = vadd.f32 %v5907_v46, %v2331_v42  ;;  %v2419_v59 = vadd.f32 %v5904_v30, %v2333_v43  ;;  %v2335_v51 = vadd.f32 %v5898_v44, %v2067_v49  ;;  %v2337_v53 = vadd.f32 %v5901_v29, %v2180_v50  ;;  %v2069_v19 = vpop.f32.mrb[7].mxu1  ;;  %v2182_v54 = vpop.f32.mrb[39].mxu0 }
 0x3ae   : > { %v2418_v12 = vadd.f32 %v5919_v17, %v2332_v61  ;;  %v2420_v56 = vadd.f32 %v5916_v52, %v2334_v48  ;;  %v2336_v16 = vadd.f32 %v5910_v41, %v2069_v19  ;;  %v2338_v47 = vadd.f32 %v5913_v1, %v2182_v54  ;;  %v4978_v48 = vld [vmem:[#allocation9 + $0x1c] ss:$12 sps:$4 sm:$0xff]  }
 0x3af   : > { %v2421_v58 = vadd.f32 %v5907_v46, %v2335_v51  ;;  %v2423_v28 = vadd.f32 %v5904_v30, %v2337_v53  ;;  %v2481_v62 = vmax.f32 %v2417_v40, 0.0  ;;  %v2483_v63 = vmax.f32 %v2419_v59, 0.0  ;;  %v5949_v51 = vld [vmem:[#allocation9 + $0x20] ss:$12 sps:$4 sm:$0xff]  }
 0x3b0   : > { %v2422_v60 = vadd.f32 %v5919_v17, %v2336_v16  ;;  %v2424_v14 = vadd.f32 %v5916_v52, %v2338_v47  ;;  %v2482_v4 = vmax.f32 %v2418_v12, 0.0  ;;  %v2484_v5 = vmax.f32 %v2420_v56, 0.0  ;;  %v4976_v16 = vld [vmem:[#allocation9 + $0x18] ss:$12 sps:$4 sm:$0xff]  }
 0x3b1   : > { %v2485_v0 = vmax.f32 %v2421_v58, 0.0  ;;  %v2487_v3 = vmax.f32 %v2423_v28, 0.0  ;;  %v5957_v54 = vrot.slane %v2276_v32, %v5872_v13 }
 0x3b2   : > { %v2486_v8 = vmax.f32 %v2422_v60, 0.0  ;;  %v2488_v9 = vmax.f32 %v2424_v14, 0.0  ;;  %v2073_v10 = vpop.f32.mrb[8].mxu1  ;;  %v2186_v11 = vpop.f32.mrb[40].mxu0  ;;  %v4981_v14 = vld [vmem:[#allocation9 + $0x34] ss:$12 sps:$4 sm:$0xff]  }
 0x3b3   : > { %v2545_v18 = vpack.c.bf16 %v2485_v0, %v2481_v62  ;;  %v2547_v20 = vpack.c.bf16 %v2487_v3, %v2483_v63  ;;  %v2339_v21 = vadd.f32 %v5898_v44, %v2073_v10  ;;  %v2341_v22 = vadd.f32 %v5901_v29, %v2186_v11  ;;  %v2075_v23 = vpop.f32.mrb[9].mxu1  ;;  %v2188_v24 = vpop.f32.mrb[41].mxu0 }
 0x3b4   : > { %v2340_v25 = vadd.f32 %v5910_v41, %v2075_v23  ;;  %v2342_v26 = vadd.f32 %v5913_v1, %v2188_v24  ;;  %v2077_v31 = vpop.f32.mrb[10].mxu1  ;;  %v2190_v33 = vpop.f32.mrb[42].mxu0  ;;  %v2546_v35 = vpack.c.bf16 %v2486_v8, %v2482_v4  ;;  %v2548_v38 = vpack.c.bf16 %v2488_v9, %v2484_v5 }
 0x3b5   : > { %v2425_v15 = vadd.f32 %v5907_v46, %v2339_v21  ;;  %v2427_v42 = vadd.f32 %v5904_v30, %v2341_v22  ;;  %v2343_v43 = vadd.f32 %v5898_v44, %v2077_v31  ;;  %v2345_v39 = vadd.f32 %v5901_v29, %v2190_v33  ;;  %v2079_v45 = vpop.f32.mrb[11].mxu1  ;;  %v2192_v61 = vpop.f32.mrb[43].mxu0  ;;  %v4979_v22 = vld [vmem:[#allocation9 + $0x30] ss:$12 sps:$4 sm:$0xff]  }
 0x3b6   : > { %v2426_v49 = vadd.f32 %v5919_v17, %v2340_v25  ;;  %v2428_v50 = vadd.f32 %v5916_v52, %v2342_v26  ;;  %v2344_v40 = vadd.f32 %v5910_v41, %v2079_v45  ;;  %v2346_v59 = vadd.f32 %v5913_v1, %v2192_v61  ;;  %2872 = vmatprep.mubr.bf16.mxu1 %v2546_v35  ;;  %v4985_v35 = vld [vmem:[#allocation9 + $0x4c] ss:$12 sps:$4 sm:$0xff]  }
 0x3b7   : > { %v2429_v53 = vadd.f32 %v5907_v46, %v2343_v43  ;;  %v2431_v19 = vadd.f32 %v5904_v30, %v2345_v39  ;;  %2969 = vmatprep.mubr.bf16.mxu0 %v2548_v38  ;;  %2873 = vmatmul.mubr.bf16.vlgmr.msra.gmra.mrb[36].mxu1 %v2545_v18  ;;  %v2489_v47 = vmax.f32 %v2425_v15, 0.0  ;;  %v2491_v58 = vmax.f32 %v2427_v42, 0.0  ;;  %v5975_v43 = vld [vmem:[#allocation9 + $0x38] ss:$12 sps:$4 sm:$0xff]  }
 0x3b8   : > { %v2430_v12 = vadd.f32 %v5919_v17, %v2344_v40  ;;  %v2432_v56 = vadd.f32 %v5916_v52, %v2346_v59  ;;  %2970 = vmatmul.mubr.bf16.vlgmr.msra.gmra.mrb[68].mxu0 %v2547_v20  ;;  %3220 = vmatpush1.bf16.msra.mxu1 %v4973_v57  ;;  %v2490_v62 = vmax.f32 %v2426_v49, 0.0  ;;  %v2492_v63 = vmax.f32 %v2428_v50, 0.0  ;;  %v4983_v40 = vld [vmem:[#allocation9 + $0x48] ss:$12 sps:$4 sm:$0xff]  }
 0x3b9   : > { %v2493_v28 = vmax.f32 %v2429_v53, 0.0  ;;  %v2495_v60 = vmax.f32 %v2431_v19, 0.0  ;;  %3221 = vmatprep.subr.bf16.mxu1 %v4978_v48  ;;  %4512 = vmatpush3.bf16.msra.mxu0 %v5884_v34  ;;  %v5979_v39 = vrot.slane %v5957_v54, %v5666_v6  ;;  %v5985_v48 = vrot.slane %v5957_v54, %v5669_v7 }
 0x3ba   : > { %v2494_v27 = vmax.f32 %v2430_v12, 0.0  ;;  %v2496_v13 = vmax.f32 %v2432_v56, 0.0  ;;  %v2083_v55 = vpop.f32.mrb[12].mxu1  ;;  %v2196_v32 = vpop.f32.mrb[44].mxu0  ;;  %4513 = vmatprep.subr.bf16.mxu0 %v5949_v51  ;;  %v4989_v56 = vld [vmem:[#allocation9 + $0x64] ss:$12 sps:$4 sm:$0xff]  }
 0x3bb   : > { %v2347_v0 = vadd.f32 %v5898_v44, %v2083_v55  ;;  %v2349_v3 = vadd.f32 %v5901_v29, %v2196_v32  ;;  %v2085_v4 = vpop.f32.mrb[13].mxu1  ;;  %v2198_v5 = vpop.f32.mrb[45].mxu0  ;;  %v2549_v8 = vpack.c.bf16 %v2493_v28, %v2489_v47  ;;  %v2551_v9 = vpack.c.bf16 %v2495_v60, %v2491_v58 }
 0x3bc   : > { %v2348_v10 = vadd.f32 %v5910_v41, %v2085_v4  ;;  %v2350_v34 = vadd.f32 %v5913_v1, %v2198_v5  ;;  %v2087_v11 = vpop.f32.mrb[14].mxu1  ;;  %v2200_v18 = vpop.f32.mrb[46].mxu0  ;;  %v2550_v20 = vpack.c.bf16 %v2494_v27, %v2490_v62  ;;  %v2552_v21 = vpack.c.bf16 %v2496_v13, %v2492_v63  ;;  %3222 = vmatpush1.bf16.msra.mxu1 %v4976_v16 }
 0x3bd   : > { %v2433_v23 = vadd.f32 %v5907_v46, %v2347_v0  ;;  %v2435_v24 = vadd.f32 %v5904_v30, %v2349_v3  ;;  %v2351_v25 = vadd.f32 %v5898_v44, %v2087_v11  ;;  %v2353_v26 = vadd.f32 %v5901_v29, %v2200_v18  ;;  %v2089_v31 = vpop.f32.mrb[15].mxu1  ;;  %v2202_v33 = vpop.f32.mrb[47].mxu0  ;;  %3223 = vmatprep.subr.bf16.mxu1 %v4981_v14 }
 0x3be   : > { %v2434_v38 = vadd.f32 %v5919_v17, %v2348_v10  ;;  %v2436_v57 = vadd.f32 %v5916_v52, %v2350_v34  ;;  %v2352_v15 = vadd.f32 %v5910_v41, %v2089_v31  ;;  %v2354_v42 = vadd.f32 %v5913_v1, %v2202_v33  ;;  %2880 = vmatprep.mubr.bf16.mxu1 %v2550_v20 }
 0x3bf   : > { %v2437_v45 = vadd.f32 %v5907_v46, %v2351_v25  ;;  %v2439_v61 = vadd.f32 %v5904_v30, %v2353_v26  ;;  %2977 = vmatprep.mubr.bf16.mxu0 %v2552_v21  ;;  %2881 = vmatmul.mubr.bf16.gmra.mrb[40].mxu1 %v2549_v8  ;;  %v2497_v59 = vmax.f32 %v2433_v23, 0.0  ;;  %v2499_v53 = vmax.f32 %v2435_v24, 0.0 }
 0x3c0   : > { %v2438_v49 = vadd.f32 %v5919_v17, %v2352_v15  ;;  %v2440_v50 = vadd.f32 %v5916_v52, %v2354_v42  ;;  %2978 = vmatmul.mubr.bf16.gmra.mrb[72].mxu0 %v2551_v9  ;;  %3224 = vmatpush1.bf16.msra.mxu1 %v4979_v22  ;;  %v2498_v16 = vmax.f32 %v2434_v38, 0.0  ;;  %v2500_v47 = vmax.f32 %v2436_v57, 0.0  ;;  %v4987_v9 = vld [vmem:[#allocation9 + $0x60] ss:$12 sps:$4 sm:$0xff]  }
 0x3c1   : > { %v2501_v19 = vmax.f32 %v2437_v45, 0.0  ;;  %v2503_v12 = vmax.f32 %v2439_v61, 0.0  ;;  %3225 = vmatprep.subr.bf16.mxu1 %v4985_v35  ;;  %4514 = vmatpush3.bf16.msra.mxu0 %v5949_v51  ;;  %v6005_v26 = vrot.slane %v5957_v54, %v5889_v36  ;;  %v6011_v31 = vrot.slane %v5957_v54, %v5892_v37 }
 0x3c2   : > { %v2502_v58 = vmax.f32 %v2438_v49, 0.0  ;;  %v2504_v28 = vmax.f32 %v2440_v50, 0.0  ;;  %v2093_v60 = vpop.f32.mrb[16].mxu1  ;;  %v2206_v14 = vpop.f32.mrb[48].mxu0  ;;  %4515 = vmatprep.subr.bf16.mxu0 %v5975_v43 }
 0x3c3   : > { %v2355_v62 = vadd.f32 %v5898_v44, %v2093_v60  ;;  %v2357_v63 = vadd.f32 %v5901_v29, %v2206_v14  ;;  %v2095_v27 = vpop.f32.mrb[17].mxu1  ;;  %v2208_v13 = vpop.f32.mrb[49].mxu0  ;;  %v2553_v55 = vpack.c.bf16 %v2501_v19, %v2497_v59  ;;  %v2555_v32 = vpack.c.bf16 %v2503_v12, %v2499_v53 }
 0x3c4   : > { %v2356_v0 = vadd.f32 %v5910_v41, %v2095_v27  ;;  %v2358_v51 = vadd.f32 %v5913_v1, %v2208_v13  ;;  %v2097_v3 = vpop.f32.mrb[18].mxu1  ;;  %v2210_v4 = vpop.f32.mrb[50].mxu0  ;;  %v2554_v5 = vpack.c.bf16 %v2502_v58, %v2498_v16  ;;  %v2556_v8 = vpack.c.bf16 %v2504_v28, %v2500_v47  ;;  %3226 = vmatpush1.bf16.msra.mxu1 %v4983_v40 }
 0x3c5   : > { %v2441_v10 = vadd.f32 %v5907_v46, %v2355_v62  ;;  %v2443_v34 = vadd.f32 %v5904_v30, %v2357_v63  ;;  %v2359_v11 = vadd.f32 %v5898_v44, %v2097_v3  ;;  %v2361_v18 = vadd.f32 %v5901_v29, %v2210_v4  ;;  %v2099_v20 = vpop.f32.mrb[19].mxu1  ;;  %v2212_v21 = vpop.f32.mrb[51].mxu0  ;;  %3227 = vmatprep.subr.bf16.mxu1 %v4989_v56 }
 0x3c6   : > { %v2442_v22 = vadd.f32 %v5919_v17, %v2356_v0  ;;  %v2444_v23 = vadd.f32 %v5916_v52, %v2358_v51  ;;  %v2360_v24 = vadd.f32 %v5910_v41, %v2099_v20  ;;  %v2362_v25 = vadd.f32 %v5913_v1, %v2212_v21  ;;  %2888 = vmatprep.mubr.bf16.mxu1 %v2554_v5 }
 0x3c7   : > { %v2445_v44 = vadd.f32 %v5907_v46, %v2359_v11  ;;  %v2447_v29 = vadd.f32 %v5904_v30, %v2361_v18  ;;  %2985 = vmatprep.mubr.bf16.mxu0 %v2556_v8  ;;  %2889 = vmatmul.mubr.bf16.gmra.mrb[44].mxu1 %v2553_v55  ;;  %v2505_v1 = vmax.f32 %v2441_v10, 0.0  ;;  %v2507_v35 = vmax.f32 %v2443_v34, 0.0 }
 0x3c8   : > { %v2446_v33 = vadd.f32 %v5919_v17, %v2360_v24  ;;  %v2448_v41 = vadd.f32 %v5916_v52, %v2362_v25  ;;  %2986 = vmatmul.mubr.bf16.gmra.mrb[76].mxu0 %v2555_v32  ;;  %3228 = vmatpush1.bf16.msra.mxu1 %v4987_v9  ;;  %v2506_v15 = vmax.f32 %v2442_v22, 0.0  ;;  %v2508_v42 = vmax.f32 %v2444_v23, 0.0 }
 0x3c9   : > { %v2509_v38 = vmax.f32 %v2445_v44, 0.0  ;;  %v2511_v57 = vmax.f32 %v2447_v29, 0.0  ;;  %4516 = vmatpush3.bf16.msra.mxu0 %v5975_v43 }
 0x3ca   : > { %v2510_v45 = vmax.f32 %v2446_v33, 0.0  ;;  %v2512_v61 = vmax.f32 %v2448_v41, 0.0  ;;  %v2103_v49 = vpop.f32.mrb[20].mxu1  ;;  %v2216_v50 = vpop.f32.mrb[52].mxu0 }
 0x3cb   : > { %v2363_v37 = vadd.f32 %v5979_v39, %v2103_v49  ;;  %v2365_v54 = vadd.f32 %v6005_v26, %v2216_v50  ;;  %v2105_v40 = vpop.f32.mrb[21].mxu1  ;;  %v2218_v59 = vpop.f32.mrb[53].mxu0  ;;  %v2557_v53 = vpack.c.bf16 %v2509_v38, %v2505_v1  ;;  %v2559_v19 = vpack.c.bf16 %v2511_v57, %v2507_v35 }
 0x3cc   : > { %v2364_v12 = vadd.f32 %v5985_v48, %v2105_v40  ;;  %v2366_v56 = vadd.f32 %v6011_v31, %v2218_v59  ;;  %v2107_v16 = vpop.f32.mrb[22].mxu1  ;;  %v2220_v43 = vpop.f32.mrb[54].mxu0  ;;  %v2558_v47 = vpack.c.bf16 %v2510_v45, %v2506_v15  ;;  %v2560_v58 = vpack.c.bf16 %v2512_v61, %v2508_v42 }
 0x3cd   : > { %v2449_v28 = vadd.f32 %v5907_v46, %v2363_v37  ;;  %v2451_v60 = vadd.f32 %v5904_v30, %v2365_v54  ;;  %v2367_v14 = vadd.f32 %v5979_v39, %v2107_v16  ;;  %v2369_v62 = vadd.f32 %v6005_v26, %v2220_v43  ;;  %v2109_v63 = vpop.f32.mrb[23].mxu1  ;;  %v2222_v27 = vpop.f32.mrb[55].mxu0 }
 0x3ce   : > { %v2450_v13 = vadd.f32 %v5919_v17, %v2364_v12  ;;  %v2452_v55 = vadd.f32 %v5916_v52, %v2366_v56  ;;  %v2368_v32 = vadd.f32 %v5985_v48, %v2109_v63  ;;  %v2370_v0 = vadd.f32 %v6011_v31, %v2222_v27  ;;  %2896 = vmatprep.mubr.bf16.mxu1 %v2558_v47 }
 0x3cf   : > { %v2453_v51 = vadd.f32 %v5907_v46, %v2367_v14  ;;  %v2455_v3 = vadd.f32 %v5904_v30, %v2369_v62  ;;  %2993 = vmatprep.mubr.bf16.mxu0 %v2560_v58  ;;  %2897 = vmatmul.mubr.bf16.gmra.mrb[48].mxu1 %v2557_v53  ;;  %v2513_v8 = vmax.f32 %v2449_v28, 0.0  ;;  %v2515_v9 = vmax.f32 %v2451_v60, 0.0 }
 0x3d0   : > { %v2454_v4 = vadd.f32 %v5919_v17, %v2368_v32  ;;  %v2456_v5 = vadd.f32 %v5916_v52, %v2370_v0  ;;  %2994 = vmatmul.mubr.bf16.gmra.mrb[80].mxu0 %v2559_v19  ;;  %v2514_v11 = vmax.f32 %v2450_v13, 0.0  ;;  %v2516_v18 = vmax.f32 %v2452_v55, 0.0 }
 0x3d1   : > { %v2517_v10 = vmax.f32 %v2453_v51, 0.0  ;;  %v2519_v34 = vmax.f32 %v2455_v3, 0.0 }
 0x3d2   : > { %v2518_v20 = vmax.f32 %v2454_v4, 0.0  ;;  %v2520_v21 = vmax.f32 %v2456_v5, 0.0  ;;  %v2113_v22 = vpop.f32.mrb[24].mxu1  ;;  %v2226_v23 = vpop.f32.mrb[56].mxu0 }
 0x3d3   : > { %v2371_v24 = vadd.f32 %v5979_v39, %v2113_v22  ;;  %v2373_v25 = vadd.f32 %v6005_v26, %v2226_v23  ;;  %v2115_v44 = vpop.f32.mrb[25].mxu1  ;;  %v2228_v29 = vpop.f32.mrb[57].mxu0  ;;  %v2561_v33 = vpack.c.bf16 %v2517_v10, %v2513_v8  ;;  %v2563_v41 = vpack.c.bf16 %v2519_v34, %v2515_v9 }
 0x3d4   : > { %v2372_v1 = vadd.f32 %v5985_v48, %v2115_v44  ;;  %v2374_v35 = vadd.f32 %v6011_v31, %v2228_v29  ;;  %v2117_v38 = vpop.f32.mrb[26].mxu1  ;;  %v2230_v57 = vpop.f32.mrb[58].mxu0  ;;  %v2562_v15 = vpack.c.bf16 %v2518_v20, %v2514_v11  ;;  %v2564_v42 = vpack.c.bf16 %v2520_v21, %v2516_v18 }
 0x3d5   : > { %v2457_v45 = vadd.f32 %v5907_v46, %v2371_v24  ;;  %v2459_v61 = vadd.f32 %v5904_v30, %v2373_v25  ;;  %v2375_v49 = vadd.f32 %v5979_v39, %v2117_v38  ;;  %v2377_v50 = vadd.f32 %v6005_v26, %v2230_v57  ;;  %v2119_v37 = vpop.f32.mrb[27].mxu1  ;;  %v2232_v54 = vpop.f32.mrb[59].mxu0 }
 0x3d6   : > { %v2458_v40 = vadd.f32 %v5919_v17, %v2372_v1  ;;  %v2460_v59 = vadd.f32 %v5916_v52, %v2374_v35  ;;  %v2376_v53 = vadd.f32 %v5985_v48, %v2119_v37  ;;  %v2378_v19 = vadd.f32 %v6011_v31, %v2232_v54  ;;  %2904 = vmatprep.mubr.bf16.mxu1 %v2562_v15 }
 0x3d7   : > { %v2461_v12 = vadd.f32 %v5907_v46, %v2375_v49  ;;  %v2463_v56 = vadd.f32 %v5904_v30, %v2377_v50  ;;  %3001 = vmatprep.mubr.bf16.mxu0 %v2564_v42  ;;  %2905 = vmatmul.mubr.bf16.gmra.mrb[52].mxu1 %v2561_v33  ;;  %v2521_v47 = vmax.f32 %v2457_v45, 0.0  ;;  %v2523_v58 = vmax.f32 %v2459_v61, 0.0 }
 0x3d8   : > { %v2462_v16 = vadd.f32 %v5919_v17, %v2376_v53  ;;  %v2464_v43 = vadd.f32 %v5916_v52, %v2378_v19  ;;  %3002 = vmatmul.mubr.bf16.gmra.mrb[84].mxu0 %v2563_v41  ;;  %v2522_v14 = vmax.f32 %v2458_v40, 0.0  ;;  %v2524_v62 = vmax.f32 %v2460_v59, 0.0 }
 0x3d9   : > { %v2525_v28 = vmax.f32 %v2461_v12, 0.0  ;;  %v2527_v60 = vmax.f32 %v2463_v56, 0.0 }
 0x3da   : > { %v2526_v63 = vmax.f32 %v2462_v16, 0.0  ;;  %v2528_v27 = vmax.f32 %v2464_v43, 0.0  ;;  %v2123_v13 = vpop.f32.mrb[28].mxu1  ;;  %v2236_v55 = vpop.f32.mrb[60].mxu0 }
 0x3db   : > { %v2379_v32 = vadd.f32 %v5979_v39, %v2123_v13  ;;  %v2381_v0 = vadd.f32 %v6005_v26, %v2236_v55  ;;  %v2125_v51 = vpop.f32.mrb[29].mxu1  ;;  %v2238_v3 = vpop.f32.mrb[61].mxu0  ;;  %v2565_v4 = vpack.c.bf16 %v2525_v28, %v2521_v47  ;;  %v2567_v5 = vpack.c.bf16 %v2527_v60, %v2523_v58 }
 0x3dc   : > { %v2380_v8 = vadd.f32 %v5985_v48, %v2125_v51  ;;  %v2382_v9 = vadd.f32 %v6011_v31, %v2238_v3  ;;  %v2127_v10 = vpop.f32.mrb[30].mxu1  ;;  %v2240_v34 = vpop.f32.mrb[62].mxu0  ;;  %v2566_v11 = vpack.c.bf16 %v2526_v63, %v2522_v14  ;;  %v2568_v18 = vpack.c.bf16 %v2528_v27, %v2524_v62 }
 0x3dd   : > { %v2465_v20 = vadd.f32 %v5907_v46, %v2379_v32  ;;  %v2467_v21 = vadd.f32 %v5904_v30, %v2381_v0  ;;  %v2383_v22 = vadd.f32 %v5979_v39, %v2127_v10  ;;  %v2385_v23 = vadd.f32 %v6005_v26, %v2240_v34  ;;  %v2129_v24 = vpop.f32.mrb[31].mxu1  ;;  %v2242_v25 = vpop.f32.mrb[63].mxu0 }
 0x3de   : > { %v2466_v44 = vadd.f32 %v5919_v17, %v2380_v8  ;;  %v2468_v29 = vadd.f32 %v5916_v52, %v2382_v9  ;;  %v2384_v33 = vadd.f32 %v5985_v48, %v2129_v24  ;;  %v2386_v41 = vadd.f32 %v6011_v31, %v2242_v25  ;;  %2912 = vmatprep.mubr.bf16.mxu1 %v2566_v11  ;;  %v4997_v25 = vld [vmem:[#allocation9 + $0x94] ss:$12 sps:$4 sm:$0xff]  }
 0x3df   : > { %v2469_v1 = vadd.f32 %v5907_v46, %v2383_v22  ;;  %v2471_v35 = vadd.f32 %v5904_v30, %v2385_v23  ;;  %3009 = vmatprep.mubr.bf16.mxu0 %v2568_v18  ;;  %2913 = vmatmul.mubr.bf16.gmra.mrb[56].mxu1 %v2565_v4  ;;  %v2529_v15 = vmax.f32 %v2465_v20, 0.0  ;;  %v2531_v42 = vmax.f32 %v2467_v21, 0.0 }
 0x3e0   : > { %v2470_v38 = vadd.f32 %v5919_v17, %v2384_v33  ;;  %v2472_v57 = vadd.f32 %v5916_v52, %v2386_v41  ;;  %3010 = vmatmul.mubr.bf16.gmra.mrb[88].mxu0 %v2567_v5  ;;  %v2530_v49 = vmax.f32 %v2466_v44, 0.0  ;;  %v2532_v50 = vmax.f32 %v2468_v29, 0.0  ;;  %v4998_v44 = vld [vmem:[#allocation9 + $0x68] ss:$12 sps:$4 sm:$0xff]   ;;  %v4995_v29 = vld [vmem:[#allocation9 + $0x90] ss:$12 sps:$4 sm:$0xff]  }
 0x3e1   : > { %v2533_v45 = vmax.f32 %v2469_v1, 0.0  ;;  %v2535_v61 = vmax.f32 %v2471_v35, 0.0  ;;  %v5001_v33 = vld [vmem:[#allocation9 + $0xac] ss:$12 sps:$4 sm:$0xff]   ;;  %v4999_v1 = vld [vmem:[#allocation9 + $0xa8] ss:$12 sps:$4 sm:$0xff]  }
 0x3e2   : > { %v2534_v37 = vmax.f32 %v2470_v38, 0.0  ;;  %v2536_v54 = vmax.f32 %v2472_v57, 0.0  ;;  %v2133_v40 = vpop.f32.mrb[32].mxu1  ;;  %v2246_v59 = vpop.f32.mrb[64].mxu0  ;;  %v5002_v41 = vld [vmem:[#allocation9 + $0x80] ss:$12 sps:$4 sm:$0xff]  }
 0x3e3   : > { %v2387_v53 = vadd.f32 %v5979_v39, %v2133_v40  ;;  %v2389_v19 = vadd.f32 %v6005_v26, %v2246_v59  ;;  %v2135_v12 = vpop.f32.mrb[33].mxu1  ;;  %v2248_v56 = vpop.f32.mrb[65].mxu0  ;;  %v2569_v16 = vpack.c.bf16 %v2533_v45, %v2529_v15  ;;  %v2571_v43 = vpack.c.bf16 %v2535_v61, %v2531_v42  ;;  %v5003_v35 = vld [vmem:[#allocation9 + $0x98] ss:$12 sps:$4 sm:$0xff]   ;;  %v5004_v38 = vld [vmem:[#allocation9 + $0xb0] ss:$12 sps:$4 sm:$0xff]  }
 0x3e4   : > { %v2388_v47 = vadd.f32 %v5985_v48, %v2135_v12  ;;  %v2390_v58 = vadd.f32 %v6011_v31, %v2248_v56  ;;  %v2137_v28 = vpop.f32.mrb[34].mxu1  ;;  %v2250_v60 = vpop.f32.mrb[66].mxu0  ;;  %v2570_v14 = vpack.c.bf16 %v2534_v37, %v2530_v49  ;;  %v2572_v62 = vpack.c.bf16 %v2536_v54, %v2532_v50  ;;  %v6084_v42 = vld [vmem:[%s6444_s9] ss:$0 sm:$0xff] }
 0x3e5   : > { %v2473_v63 = vadd.f32 %v5907_v46, %v2387_v53  ;;  %v2475_v27 = vadd.f32 %v5904_v30, %v2389_v19  ;;  %v2391_v13 = vadd.f32 %v5979_v39, %v2137_v28  ;;  %v2393_v55 = vadd.f32 %v6005_v26, %v2250_v60  ;;  %v2139_v32 = vpop.f32.mrb[35].mxu1  ;;  %v2252_v0 = vpop.f32.mrb[67].mxu0 }
 0x3e6   : > { %v2474_v51 = vadd.f32 %v5919_v17, %v2388_v47  ;;  %v2476_v3 = vadd.f32 %v5916_v52, %v2390_v58  ;;  %v2392_v4 = vadd.f32 %v5985_v48, %v2139_v32  ;;  %v2394_v5 = vadd.f32 %v6011_v31, %v2252_v0  ;;  %2920 = vmatprep.mubr.bf16.mxu1 %v2570_v14 }
 0x3e7   : > { %v2477_v8 = vadd.f32 %v5907_v46, %v2391_v13  ;;  %v2479_v9 = vadd.f32 %v5904_v30, %v2393_v55  ;;  %3017 = vmatprep.mubr.bf16.mxu0 %v2572_v62  ;;  %2921 = vmatmul.mubr.bf16.gmra.mrb[60].mxu1 %v2569_v16  ;;  %v2537_v10 = vmax.f32 %v2473_v63, 0.0  ;;  %v2539_v34 = vmax.f32 %v2475_v27, 0.0  ;;  %v4993_v30 = vld [vmem:[#allocation9 + $0x7c] ss:$12 sps:$4 sm:$0xff]  }
 0x3e8   : > { %v2478_v39 = vadd.f32 %v5919_v17, %v2392_v4  ;;  %v2480_v26 = vadd.f32 %v5916_v52, %v2394_v5  ;;  %3018 = vmatmul.mubr.bf16.gmra.mrb[92].mxu0 %v2571_v43  ;;  %v2538_v20 = vmax.f32 %v2474_v51, 0.0  ;;  %v2540_v48 = vmax.f32 %v2476_v3, 0.0  ;;  %v4994_v52 = vld [vmem:[#allocation9 + $0x50] ss:$12 sps:$4 sm:$0xff]   ;;  %v4991_v17 = vld [vmem:[#allocation9 + $0x78] ss:$12 sps:$4 sm:$0xff]   ;;  %3229 = vmatprep.subr.bf16.mxu1 %v4993_v30 }
 0x3e9   : > { %v2541_v11 = vmax.f32 %v2477_v8, 0.0  ;;  %v2543_v18 = vmax.f32 %v2479_v9, 0.0  ;;  %4517 = vmatprep.subr.bf16.mxu0 %v4994_v52  ;;  %3230 = vmatpush1.bf16.msra.mxu1 %v4991_v17 }
 0x3ea   : > { %v2542_v21 = vmax.f32 %v2478_v39, 0.0  ;;  %v2544_v31 = vmax.f32 %v2480_v26, 0.0  ;;  %4518 = vmatpush3.bf16.msra.mxu0 %v4994_v52  ;;  %3231 = vmatprep.subr.bf16.mxu1 %v4997_v25 }
 0x3eb   : > { %v2573_v22 = vpack.c.bf16 %v2541_v11, %v2537_v10  ;;  %v2575_v23 = vpack.c.bf16 %v2543_v18, %v2539_v34  ;;  %4519 = vmatprep.subr.bf16.mxu0 %v4998_v44 }
 0x3ec   : > { %v2574_v46 = vpack.c.bf16 %v2542_v21, %v2538_v20  ;;  %v2576_v24 = vpack.c.bf16 %v2544_v31, %v2540_v48 }
 0x3ed   : > { %3232 = vmatpush1.bf16.msra.mxu1 %v4995_v29 }
 0x3ee   : > { %2928 = vmatprep.mubr.bf16.mxu1 %v2574_v46  ;;  %3025 = vmatprep.mubr.bf16.mxu0 %v2576_v24 }
 0x3ef   : > { %2929 = vmatmul.mubr.bf16.gmra.mrb[64].mxu1 %v2573_v22  ;;  %4520 = vmatpush3.bf16.msra.mxu0 %v4998_v44 }
 0x3f0   : > { %3026 = vmatmul.mubr.bf16.gmra.mrb[96].mxu0 %v2575_v23  ;;  %3251 = vmatprep.mubr.bf16.mxu1 %v5269_v2 }
 0x3f1   : > { %3233 = vmatprep.subr.bf16.mxu1 %v5001_v33  ;;  %4521 = vmatprep.subr.bf16.mxu0 %v5002_v41 }
 0x3f2   : > { %3234 = vmatpush1.bf16.msra.mxu1 %v4999_v1 }
 0x3f3   : > { %4522 = vmatpush3.bf16.msra.mxu0 %v5002_v41 }
 0x3f4   : > { %4523 = vmatprep.subr.bf16.mxu0 %v5003_v35 }
 0x3f7   : > { %4524 = vmatpush3.bf16.msra.mxu0 %v5003_v35 }
 0x3f8   : > { %4525 = vmatprep.subr.bf16.mxu0 %v5004_v38 }
 0x3fb   : > { %4526 = vmatpush3.bf16.msra.mxu0 %v5004_v38 }
 0x48a   : > { %v4351_v57 = vpop.f32.mrb[36].mxu1 }
 0x48b   : > { %v4415_v15 = vpop.f32.mrb[68].mxu0  ;;  %v4352_v45 = vpop.f32.mrb[37].mxu1 }
 0x48c   : > { %v4353_v61 = vadd.f32 %v4352_v45, %v4351_v57  ;;  %v4416_v49 = vpop.f32.mrb[69].mxu0  ;;  %v4354_v50 = vpop.f32.mrb[38].mxu1 }
 0x48d   : > { %v4417_v37 = vadd.f32 %v4416_v49, %v4415_v15  ;;  %v4418_v54 = vpop.f32.mrb[70].mxu0  ;;  %v4355_v40 = vpop.f32.mrb[39].mxu1 }
 0x48e   : > { %v2875_v59 = vadd.f32 %v4353_v61, %v6084_v42  ;;  %v4356_v53 = vadd.f32 %v4355_v40, %v4354_v50  ;;  %v4419_v19 = vpop.f32.mrb[71].mxu0 }
 0x48f   : > { %v4420_v12 = vadd.f32 %v4419_v19, %v4418_v54 }
 0x490   : > { %v6087_v56 = vadd.f32 %v4417_v37, %v2875_v59  ;;  %v2878_v16 = vadd.f32 %v4356_v53, %v6084_v42 }
 0x492   : > { %v6090_v43 = vadd.f32 %v4420_v12, %v2878_v16  ;;  %v4357_v47 = vpop.f32.mrb[40].mxu1 }
 0x493   : > { %v4421_v58 = vpop.f32.mrb[72].mxu0  ;;  %v4358_v28 = vpop.f32.mrb[41].mxu1 }
 0x494   : > { %v3034_v60 = vpack.c.bf16 %v6090_v43, %v6087_v56  ;;  %v4359_v14 = vadd.f32 %v4358_v28, %v4357_v47  ;;  %v4422_v62 = vpop.f32.mrb[73].mxu0  ;;  %v4360_v63 = vpop.f32.mrb[42].mxu1 }
 0x495   : > { %v4423_v27 = vadd.f32 %v4422_v62, %v4421_v58  ;;  %v4424_v13 = vpop.f32.mrb[74].mxu0  ;;  %v4361_v55 = vpop.f32.mrb[43].mxu1 }
 0x496   : > { %v2883_v32 = vadd.f32 %v4359_v14, %v6084_v42  ;;  %v4362_v0 = vadd.f32 %v4361_v55, %v4360_v63  ;;  %v4425_v51 = vpop.f32.mrb[75].mxu0  ;;  %3252 = vmatmul.mubr.bf16.vlgmr.msra.gmra.mrb[68].mxu1 %v3034_v60  ;;  %4527 = vmatprep.mubr.bf16.mxu0 %v3034_v60 }
 0x497   : > { %v4426_v3 = vadd.f32 %v4425_v51, %v4424_v13  ;;  %3261 = vmatprep.mubr.bf16.mxu1 %v5269_v2 }
 0x498   : > { %v6096_v4 = vadd.f32 %v4423_v27, %v2883_v32  ;;  %v2886_v5 = vadd.f32 %v4362_v0, %v6084_v42 }
 0x49a   : > { %v6099_v8 = vadd.f32 %v4426_v3, %v2886_v5  ;;  %v4363_v9 = vpop.f32.mrb[44].mxu1 }
 0x49b   : > { %v4427_v39 = vpop.f32.mrb[76].mxu0  ;;  %v4364_v26 = vpop.f32.mrb[45].mxu1 }
 0x49c   : > { %v4365_v10 = vadd.f32 %v4364_v26, %v4363_v9  ;;  %v4428_v34 = vpop.f32.mrb[77].mxu0  ;;  %v4366_v11 = vpop.f32.mrb[46].mxu1  ;;  %v3035_v18 = vpack.c.bf16 %v6099_v8, %v6096_v4 }
 0x49d   : > { %v4429_v20 = vadd.f32 %v4428_v34, %v4427_v39  ;;  %v4430_v48 = vpop.f32.mrb[78].mxu0  ;;  %v4367_v21 = vpop.f32.mrb[47].mxu1 }
 0x49e   : > { %v2891_v31 = vadd.f32 %v4365_v10, %v6084_v42  ;;  %v4368_v22 = vadd.f32 %v4367_v21, %v4366_v11  ;;  %v4431_v23 = vpop.f32.mrb[79].mxu0  ;;  %3262 = vmatmul.mubr.bf16.gmra.mrb[72].mxu1 %v3035_v18  ;;  %4528 = vmatmul.mubr.bf16.vlgmr.msra.gmra.mrb[100].mxu0 %v3035_v18 }
 0x49f   : > { %v4432_v46 = vadd.f32 %v4431_v23, %v4430_v48  ;;  %3271 = vmatprep.mubr.bf16.mxu1 %v5269_v2 }
 0x4a0   : > { %v6105_v24 = vadd.f32 %v4429_v20, %v2891_v31  ;;  %v2894_v30 = vadd.f32 %v4368_v22, %v6084_v42 }
 0x4a2   : > { %v6108_v52 = vadd.f32 %v4432_v46, %v2894_v30  ;;  %v4369_v17 = vpop.f32.mrb[48].mxu1 }
 0x4a3   : > { %v4433_v25 = vpop.f32.mrb[80].mxu0  ;;  %v4370_v44 = vpop.f32.mrb[49].mxu1 }
 0x4a4   : > { %v4371_v29 = vadd.f32 %v4370_v44, %v4369_v17  ;;  %v4434_v33 = vpop.f32.mrb[81].mxu0  ;;  %v4372_v41 = vpop.f32.mrb[50].mxu1  ;;  %v3036_v1 = vpack.c.bf16 %v6108_v52, %v6105_v24 }
 0x4a5   : > { %v4435_v35 = vadd.f32 %v4434_v33, %v4433_v25  ;;  %v4436_v38 = vpop.f32.mrb[82].mxu0  ;;  %v4373_v57 = vpop.f32.mrb[51].mxu1 }
 0x4a6   : > { %v2899_v15 = vadd.f32 %v4371_v29, %v6084_v42  ;;  %v4374_v45 = vadd.f32 %v4373_v57, %v4372_v41  ;;  %v4437_v61 = vpop.f32.mrb[83].mxu0  ;;  %3272 = vmatmul.mubr.bf16.gmra.mrb[76].mxu1 %v3036_v1  ;;  %4531 = vmatprep.mubr.bf16.mxu0 %v3036_v1 }
 0x4a7   : > { %v4438_v49 = vadd.f32 %v4437_v61, %v4436_v38  ;;  %3281 = vmatprep.mubr.bf16.mxu1 %v5269_v2 }
 0x4a8   : > { %v6114_v50 = vadd.f32 %v4435_v35, %v2899_v15  ;;  %v2902_v37 = vadd.f32 %v4374_v45, %v6084_v42 }
 0x4aa   : > { %v6117_v54 = vadd.f32 %v4438_v49, %v2902_v37  ;;  %v4375_v40 = vpop.f32.mrb[52].mxu1 }
 0x4ab   : > { %v4439_v59 = vpop.f32.mrb[84].mxu0  ;;  %v4376_v53 = vpop.f32.mrb[53].mxu1 }
 0x4ac   : > { %v4377_v19 = vadd.f32 %v4376_v53, %v4375_v40  ;;  %v4440_v12 = vpop.f32.mrb[85].mxu0  ;;  %v4378_v16 = vpop.f32.mrb[54].mxu1  ;;  %v3037_v47 = vpack.c.bf16 %v6117_v54, %v6114_v50 }
 0x4ad   : > { %v4441_v58 = vadd.f32 %v4440_v12, %v4439_v59  ;;  %v4442_v28 = vpop.f32.mrb[86].mxu0  ;;  %v4379_v60 = vpop.f32.mrb[55].mxu1 }
 0x4ae   : > { %v2907_v14 = vadd.f32 %v4377_v19, %v6084_v42  ;;  %v4380_v62 = vadd.f32 %v4379_v60, %v4378_v16  ;;  %v4443_v63 = vpop.f32.mrb[87].mxu0  ;;  %3282 = vmatmul.mubr.bf16.gmra.mrb[80].mxu1 %v3037_v47  ;;  %4532 = vmatmul.mubr.bf16.gmra.mrb[104].mxu0 %v3037_v47 }
 0x4af   : > { %v4444_v27 = vadd.f32 %v4443_v63, %v4442_v28  ;;  %3291 = vmatprep.mubr.bf16.mxu1 %v5269_v2 }
 0x4b0   : > { %v6123_v13 = vadd.f32 %v4441_v58, %v2907_v14  ;;  %v2910_v55 = vadd.f32 %v4380_v62, %v6084_v42 }
 0x4b2   : > { %v6126_v32 = vadd.f32 %v4444_v27, %v2910_v55  ;;  %v4381_v0 = vpop.f32.mrb[56].mxu1 }
 0x4b3   : > { %v4445_v51 = vpop.f32.mrb[88].mxu0  ;;  %v4382_v3 = vpop.f32.mrb[57].mxu1 }
 0x4b4   : > { %v4383_v5 = vadd.f32 %v4382_v3, %v4381_v0  ;;  %v4446_v9 = vpop.f32.mrb[89].mxu0  ;;  %v4384_v39 = vpop.f32.mrb[58].mxu1  ;;  %v3038_v26 = vpack.c.bf16 %v6126_v32, %v6123_v13 }
 0x4b5   : > { %v4447_v10 = vadd.f32 %v4446_v9, %v4445_v51  ;;  %v4448_v34 = vpop.f32.mrb[90].mxu0  ;;  %v4385_v11 = vpop.f32.mrb[59].mxu1 }
 0x4b6   : > { %v2915_v18 = vadd.f32 %v4383_v5, %v6084_v42  ;;  %v4386_v20 = vadd.f32 %v4385_v11, %v4384_v39  ;;  %v4449_v48 = vpop.f32.mrb[91].mxu0  ;;  %3292 = vmatmul.mubr.bf16.gmra.mrb[84].mxu1 %v3038_v26  ;;  %4535 = vmatprep.mubr.bf16.mxu0 %v3038_v26  ;;  %v3074_v5 = vld [vmem:[%s6446_s11] sm:$0x7] }
 0x4b7   : > { %v4450_v21 = vadd.f32 %v4449_v48, %v4448_v34  ;;  %3301 = vmatprep.mubr.bf16.mxu1 %v5269_v2  ;;  %v6161_v9 = vrot.slane %v3074_v5, %v5666_v6  ;;  %v6171_v6 = vrot.slane %v3074_v5, %v5889_v36 }
 0x4b8   : > { %v6132_v31 = vadd.f32 %v4447_v10, %v2915_v18  ;;  %v2918_v22 = vadd.f32 %v4386_v20, %v6084_v42 }
 0x4ba   : > { %v6135_v23 = vadd.f32 %v4450_v21, %v2918_v22  ;;  %v4387_v46 = vpop.f32.mrb[60].mxu1 }
 0x4bb   : > { %v4451_v30 = vpop.f32.mrb[92].mxu0  ;;  %v4388_v17 = vpop.f32.mrb[61].mxu1 }
 0x4bc   : > { %v4389_v25 = vadd.f32 %v4388_v17, %v4387_v46  ;;  %v4452_v44 = vpop.f32.mrb[93].mxu0  ;;  %v4390_v29 = vpop.f32.mrb[62].mxu1  ;;  %v3039_v33 = vpack.c.bf16 %v6135_v23, %v6132_v31 }
 0x4bd   : > { %v4453_v41 = vadd.f32 %v4452_v44, %v4451_v30  ;;  %v4454_v1 = vpop.f32.mrb[94].mxu0  ;;  %v4391_v35 = vpop.f32.mrb[63].mxu1 }
 0x4be   : > { %v2923_v38 = vadd.f32 %v4389_v25, %v6084_v42  ;;  %v4392_v57 = vadd.f32 %v4391_v35, %v4390_v29  ;;  %v4455_v15 = vpop.f32.mrb[95].mxu0  ;;  %3302 = vmatmul.mubr.bf16.gmra.mrb[88].mxu1 %v3039_v33  ;;  %4536 = vmatmul.mubr.bf16.gmra.mrb[108].mxu0 %v3039_v33 }
 0x4bf   : > { %v4456_v45 = vadd.f32 %v4455_v15, %v4454_v1  ;;  %3311 = vmatprep.mubr.bf16.mxu1 %v5269_v2 }
 0x4c0   : > { %v6141_v61 = vadd.f32 %v4453_v41, %v2923_v38  ;;  %v2926_v49 = vadd.f32 %v4392_v57, %v6084_v42 }
 0x4c2   : > { %v6144_v37 = vadd.f32 %v4456_v45, %v2926_v49  ;;  %v4393_v40 = vpop.f32.mrb[64].mxu1 }
 0x4c3   : > { %v4457_v59 = vpop.f32.mrb[96].mxu0  ;;  %v4394_v53 = vpop.f32.mrb[65].mxu1 }
 0x4c4   : > { %v4395_v19 = vadd.f32 %v4394_v53, %v4393_v40  ;;  %v4458_v12 = vpop.f32.mrb[97].mxu0  ;;  %v4396_v16 = vpop.f32.mrb[66].mxu1  ;;  %v3040_v47 = vpack.c.bf16 %v6144_v37, %v6141_v61 }
 0x4c5   : > { %v4459_v58 = vadd.f32 %v4458_v12, %v4457_v59  ;;  %v4460_v28 = vpop.f32.mrb[98].mxu0  ;;  %v4397_v60 = vpop.f32.mrb[67].mxu1 }
 0x4c6   : > { %v2931_v14 = vadd.f32 %v4395_v19, %v6084_v42  ;;  %v4398_v62 = vadd.f32 %v4397_v60, %v4396_v16  ;;  %v4461_v63 = vpop.f32.mrb[99].mxu0  ;;  %3312 = vmatmul.mubr.bf16.gmra.mrb[92].mxu1 %v3040_v47  ;;  %4539 = vmatprep.mubr.bf16.mxu0 %v3040_v47 }
 0x4c7   : > { %v4462_v27 = vadd.f32 %v4461_v63, %v4460_v28  ;;  %3321 = vmatprep.mubr.bf16.mxu1 %v5269_v2  ;;  %v6164_v2 = vrot.slane %v3074_v5, %v5669_v7 }
 0x4c8   : > { %v6150_v55 = vadd.f32 %v4459_v58, %v2931_v14  ;;  %v2934_v0 = vadd.f32 %v4398_v62, %v6084_v42 }
 0x4ca   : > { %v6153_v51 = vadd.f32 %v4462_v27, %v2934_v0 }
 0x4cc   : > { %v3041_v3 = vpack.c.bf16 %v6153_v51, %v6150_v55 }
 0x4ce   : > { %3322 = vmatmul.mubr.bf16.gmra.mrb[96].mxu1 %v3041_v3  ;;  %4540 = vmatmul.mubr.bf16.gmra.mrb[112].mxu0 %v3041_v3 }
 0x569   : > { %v3253_v39 = vpop.f32.mrb[68].mxu1 }
 0x56a   : > { %v3255_v26 = vpop.f32.mrb[69].mxu1  ;;  %v3254_v10 = vadd.f32 %v3253_v39, %v6161_v9 }
 0x56b   : > { %v3257_v42 = vpop.f32.mrb[70].mxu1  ;;  %v3256_v18 = vadd.f32 %v3255_v26, %v6164_v2 }
 0x56c   : > { %v3258_v34 = vadd.f32 %v3257_v42, %v6161_v9  ;;  %v3259_v11 = vpop.f32.mrb[71].mxu1 }
 0x56d   : > { %v3260_v20 = vadd.f32 %v3259_v11, %v6164_v2 }
 0x56e   : > { %v3429_v48 = vpack.c.bf16 %v3258_v34, %v3254_v10 }
 0x56f   : > { %v3437_v21 = vpack.c.bf16 %v3260_v20, %v3256_v18 }
 0x570   : > { %4551 = vmatprep.mubr.bf16.mxu0 %v3429_v48 }
 0x571   : > { %v3263_v22 = vpop.f32.mrb[72].mxu1  ;;  %v4529_v7 = vpop.f32.mrb[100].mxu0  ;;  %4543 = vmatprep.subr.bf16.mxu0 %v3437_v21 }
 0x572   : > { %v3265_v46 = vpop.f32.mrb[73].mxu1  ;;  %v3366_v30 = vpop.f32.mrb[101].mxu0  ;;  %4544 = vmatpush3.bf16.xpose.msra.mxu0 %v3437_v21  ;;  %v6174_v44 = vadd.f32 %v3263_v22, %v6161_v9  ;;  %v3375_v29 = vadd.f32 %v4529_v7, %v6171_v6 }
 0x573   : > { %v3267_v17 = vpop.f32.mrb[74].mxu1  ;;  %v4530_v25 = vpop.f32.mrb[102].mxu0  ;;  %v3266_v35 = vadd.f32 %v3265_v46, %v6164_v2  ;;  %v3367_v38 = vadd.f32 %v3366_v30, %v6171_v6 }
 0x574   : > { %v3268_v33 = vadd.f32 %v3267_v17, %v6161_v9  ;;  %v3378_v41 = vadd.f32 %v4530_v25, %v6171_v6  ;;  %v3269_v36 = vpop.f32.mrb[75].mxu1  ;;  %v3369_v1 = vpop.f32.mrb[103].mxu0 }
 0x575   : > { %v3270_v57 = vadd.f32 %v3269_v36, %v6164_v2  ;;  %v3370_v15 = vadd.f32 %v3369_v1, %v6171_v6 }
 0x576   : > { %v3430_v45 = vpack.c.bf16 %v3268_v33, %v6174_v44  ;;  %v6184_v49 = vpack.c.bf16 %v3378_v41, %v3375_v29 }
 0x577   : > { %v3438_v40 = vpack.c.bf16 %v3270_v57, %v3266_v35  ;;  %v3445_v59 = vpack.c.bf16 %v3370_v15, %v3367_v38 }
 0x579   : > { %v3273_v53 = vpop.f32.mrb[76].mxu1  ;;  %4545 = vmatprep.subr.bf16.mxu0 %v3438_v40 }
 0x57a   : > { %v3275_v19 = vpop.f32.mrb[77].mxu1  ;;  %4546 = vmatpush3.bf16.xpose.msra.mxu0 %v3438_v40  ;;  %v3274_v16 = vadd.f32 %v3273_v53, %v6161_v9 }
 0x57b   : > { %v3277_v12 = vpop.f32.mrb[78].mxu1  ;;  %v3276_v28 = vadd.f32 %v3275_v19, %v6164_v2 }
 0x57c   : > { %v3278_v47 = vadd.f32 %v3277_v12, %v6161_v9  ;;  %v3279_v58 = vpop.f32.mrb[79].mxu1 }
 0x57d   : > { %v3280_v60 = vadd.f32 %v3279_v58, %v6164_v2 }
 0x57e   : > { %v3431_v14 = vpack.c.bf16 %v3278_v47, %v3274_v16 }
 0x57f   : > { %v3439_v62 = vpack.c.bf16 %v3280_v60, %v3276_v28 }
 0x581   : > { %v3283_v63 = vpop.f32.mrb[80].mxu1  ;;  %v4533_v27 = vpop.f32.mrb[104].mxu0  ;;  %4547 = vmatprep.subr.bf16.mxu0 %v3439_v62 }
 0x582   : > { %v3285_v0 = vpop.f32.mrb[81].mxu1  ;;  %v3382_v3 = vpop.f32.mrb[105].mxu0  ;;  %4548 = vmatpush3.bf16.xpose.msra.mxu0 %v3439_v62  ;;  %v3284_v26 = vadd.f32 %v3283_v63, %v6161_v9  ;;  %v3391_v42 = vadd.f32 %v4533_v27, %v6171_v6 }
 0x583   : > { %v3287_v5 = vpop.f32.mrb[82].mxu1  ;;  %v4534_v39 = vpop.f32.mrb[106].mxu0  ;;  %v3286_v20 = vadd.f32 %v3285_v0, %v6164_v2  ;;  %v3383_v48 = vadd.f32 %v3382_v3, %v6171_v6 }
 0x584   : > { %v3288_v10 = vadd.f32 %v3287_v5, %v6161_v9  ;;  %v3394_v34 = vadd.f32 %v4534_v39, %v6171_v6  ;;  %v3289_v11 = vpop.f32.mrb[83].mxu1  ;;  %v3385_v18 = vpop.f32.mrb[107].mxu0 }
 0x585   : > { %v3290_v21 = vadd.f32 %v3289_v11, %v6164_v2  ;;  %v3386_v22 = vadd.f32 %v3385_v18, %v6171_v6 }
 0x586   : > { %v3432_v7 = vpack.c.bf16 %v3288_v10, %v3284_v26  ;;  %v3448_v46 = vpack.c.bf16 %v3394_v34, %v3391_v42 }
 0x587   : > { %v3440_v30 = vpack.c.bf16 %v3290_v21, %v3286_v20  ;;  %v3447_v17 = vpack.c.bf16 %v3386_v22, %v3383_v48 }
 0x589   : > { %v3293_v25 = vpop.f32.mrb[84].mxu1  ;;  %4549 = vmatprep.subr.bf16.mxu0 %v3440_v30 }
 0x58a   : > { %v3295_v44 = vpop.f32.mrb[85].mxu1  ;;  %4550 = vmatpush3.bf16.xpose.msra.mxu0 %v3440_v30  ;;  %v3294_v33 = vadd.f32 %v3293_v25, %v6161_v9 }
 0x58b   : > { %v3297_v29 = vpop.f32.mrb[86].mxu1  ;;  %4575 = vmatprep.subr.bf16.mxu0 %v3445_v59  ;;  %v3296_v1 = vadd.f32 %v3295_v44, %v6164_v2 }
 0x58c   : > { %v3298_v41 = vadd.f32 %v3297_v29, %v6161_v9  ;;  %v3299_v36 = vpop.f32.mrb[87].mxu1 }
 0x58d   : > { %v3300_v35 = vadd.f32 %v3299_v36, %v6164_v2 }
 0x58e   : > { %v3433_v38 = vpack.c.bf16 %v3298_v41, %v3294_v33 }
 0x58f   : > { %v3441_v57 = vpack.c.bf16 %v3300_v35, %v3296_v1 }
 0x590   : > { %4567 = vmatprep.mubr.bf16.mxu1 %v3433_v38 }
 0x591   : > { %v3303_v15 = vpop.f32.mrb[88].mxu1  ;;  %v4537_v40 = vpop.f32.mrb[108].mxu0  ;;  %4552 = vmatmul.mubr.bf16.vlgmr.msra.gmra.mrb[116].mxu0 %v3430_v45  ;;  %4559 = vmatprep.subr.bf16.mxu1 %v3441_v57 }
 0x592   : > { %v6203_v53 = vadd.f32 %v3303_v15, %v6161_v9  ;;  %v3305_v19 = vpop.f32.mrb[89].mxu1  ;;  %v3398_v12 = vpop.f32.mrb[109].mxu0  ;;  %4555 = vmatprep.mubr.bf16.mxu0 %v3431_v14  ;;  %4560 = vmatpush3.bf16.xpose.msra.mxu1 %v3441_v57  ;;  %v3407_v58 = vadd.f32 %v4537_v40, %v6171_v6 }
 0x593   : > { %4576 = vmatpush3.bf16.msra.mxu0 %v3445_v59  ;;  %v3307_v16 = vpop.f32.mrb[90].mxu1  ;;  %v4538_v47 = vpop.f32.mrb[110].mxu0  ;;  %v3306_v63 = vadd.f32 %v3305_v19, %v6164_v2  ;;  %v3399_v27 = vadd.f32 %v3398_v12, %v6171_v6 }
 0x594   : > { %v3308_v28 = vadd.f32 %v3307_v16, %v6161_v9  ;;  %v3410_v60 = vadd.f32 %v4538_v47, %v6171_v6  ;;  %4577 = vmatprep.subr.bf16.mxu0 %v6184_v49  ;;  %v3309_v45 = vpop.f32.mrb[91].mxu1  ;;  %v3401_v62 = vpop.f32.mrb[111].mxu0 }
 0x595   : > { %v3310_v14 = vadd.f32 %v3309_v45, %v6164_v2  ;;  %v3402_v59 = vadd.f32 %v3401_v62, %v6171_v6 }
 0x596   : > { %v3434_v0 = vpack.c.bf16 %v3308_v28, %v6203_v53  ;;  %v3450_v3 = vpack.c.bf16 %v3410_v60, %v3407_v58 }
 0x597   : > { %v3442_v5 = vpack.c.bf16 %v3310_v14, %v3306_v63  ;;  %v3449_v39 = vpack.c.bf16 %v3402_v59, %v3399_v27  ;;  %4578 = vmatpush3.bf16.msra.mxu0 %v6184_v49 }
 0x598   : > { %4579 = vmatprep.subr.bf16.mxu0 %v3447_v17 }
 0x599   : > { %v3313_v26 = vpop.f32.mrb[92].mxu1  ;;  %4556 = vmatmul.mubr.bf16.gmra.mrb[120].mxu0 %v3432_v7  ;;  %4561 = vmatprep.subr.bf16.mxu1 %v3442_v5 }
 0x59a   : > { %v3314_v42 = vadd.f32 %v3313_v26, %v6161_v9  ;;  %v3315_v10 = vpop.f32.mrb[93].mxu1  ;;  %4562 = vmatpush3.bf16.xpose.msra.mxu1 %v3442_v5 }
 0x59b   : > { %4580 = vmatpush3.bf16.msra.mxu0 %v3447_v17  ;;  %v3317_v34 = vpop.f32.mrb[94].mxu1  ;;  %v3316_v20 = vadd.f32 %v3315_v10, %v6164_v2 }
 0x59c   : > { %v3318_v11 = vadd.f32 %v3317_v34, %v6161_v9  ;;  %4581 = vmatprep.subr.bf16.mxu0 %v3448_v46  ;;  %v3319_v18 = vpop.f32.mrb[95].mxu1 }
 0x59d   : > { %v3320_v48 = vadd.f32 %v3319_v18, %v6164_v2 }
 0x59e   : > { %v3435_v21 = vpack.c.bf16 %v3318_v11, %v3314_v42 }
 0x59f   : > { %v3443_v49 = vpack.c.bf16 %v3320_v48, %v3316_v20  ;;  %4582 = vmatpush3.bf16.msra.mxu0 %v3448_v46 }
 0x5a1   : > { %v3323_v22 = vpop.f32.mrb[96].mxu1  ;;  %v4541_v7 = vpop.f32.mrb[112].mxu0  ;;  %4563 = vmatprep.subr.bf16.mxu1 %v3443_v49 }
 0x5a2   : > { %v3324_v30 = vadd.f32 %v3323_v22, %v6161_v9  ;;  %v3325_v25 = vpop.f32.mrb[97].mxu1  ;;  %v3414_v44 = vpop.f32.mrb[113].mxu0  ;;  %4564 = vmatpush3.bf16.xpose.msra.mxu1 %v3443_v49  ;;  %v3423_v33 = vadd.f32 %v4541_v7, %v6171_v6 }
 0x5a3   : > { %v3327_v17 = vpop.f32.mrb[98].mxu1  ;;  %v4542_v29 = vpop.f32.mrb[114].mxu0  ;;  %v3326_v46 = vadd.f32 %v3325_v25, %v6164_v2  ;;  %v3415_v38 = vadd.f32 %v3414_v44, %v6171_v6 }
 0x5a4   : > { %v3328_v41 = vadd.f32 %v3327_v17, %v6161_v9  ;;  %v3426_v36 = vadd.f32 %v4542_v29, %v6171_v6  ;;  %v3329_v1 = vpop.f32.mrb[99].mxu1  ;;  %v3417_v35 = vpop.f32.mrb[115].mxu0 }
 0x5a5   : > { %v3330_v57 = vadd.f32 %v3329_v1, %v6164_v2  ;;  %v3418_v15 = vadd.f32 %v3417_v35, %v6171_v6 }
 0x5a6   : > { %v3436_v40 = vpack.c.bf16 %v3328_v41, %v3324_v30  ;;  %v3452_v53 = vpack.c.bf16 %v3426_v36, %v3423_v33 }
 0x5a7   : > { %v3444_v19 = vpack.c.bf16 %v3330_v57, %v3326_v46  ;;  %v3451_v12 = vpack.c.bf16 %v3418_v15, %v3415_v38 }
 0x5a9   : > { %4565 = vmatprep.subr.bf16.mxu1 %v3444_v19 }
 0x5aa   : > { %4566 = vmatpush3.bf16.xpose.msra.mxu1 %v3444_v19 }
 0x5ab   : > { %4591 = vmatprep.subr.bf16.mxu1 %v3449_v39 }
 0x5b1   : > { %4568 = vmatmul.mubr.bf16.vlgmr.msra.gmra.mrb[100].mxu1 %v3434_v0 }
 0x5b2   : > { %4571 = vmatprep.mubr.bf16.mxu1 %v3435_v21  ;;  %4592 = vmatpush3.bf16.msra.mxu1 %v3449_v39 }
 0x5b3   : > { %4593 = vmatprep.subr.bf16.mxu1 %v3450_v3 }
 0x5b6   : > { %4594 = vmatpush3.bf16.msra.mxu1 %v3450_v3 }
 0x5b7   : > { %4595 = vmatprep.subr.bf16.mxu1 %v3451_v12 }
 0x5b9   : > { %4572 = vmatmul.mubr.bf16.gmra.mrb[104].mxu1 %v3436_v40 }
 0x5ba   : > { %4596 = vmatpush3.bf16.msra.mxu1 %v3451_v12 }
 0x5bb   : > { %4597 = vmatprep.subr.bf16.mxu1 %v3452_v53 }
 0x5be   : > { %4598 = vmatpush3.bf16.msra.mxu1 %v3452_v53 }
 0x664   : > { %v4553_v9 = vpop.f32.mrb[116].mxu0 }
 0x665   : > { %v3487_v2 = vpop.f32.mrb[117].mxu0  ;;  %v3590_v6 = vsel %vm3583_vm1, %v4553_v9, -inf }
 0x666   : > { %3591 = vmax.xlane.f32.xlu0 %v3590_v6  ;;  %v4554_v16 = vpop.f32.mrb[118].mxu0  ;;  %v3584_v47 = vsel %vm3583_vm1, %v3487_v2, -inf }
 0x667   : > { %3585 = vmax.xlane.f32.xlu1 %v3584_v47  ;;  %v3490_v58 = vpop.f32.mrb[119].mxu0  ;;  %v3593_v60 = vsel %vm3583_vm1, %v4554_v16, -inf }
 0x668   : > { %v3587_v28 = vsel %vm3583_vm1, %v3490_v58, -inf }
 0x66a   : > { %3588 = vmax.xlane.f32.xlu0 %v3587_v28 }
 0x66b   : > { %3594 = vmax.xlane.f32.xlu1 %v3593_v60 }
 0x66c   : > { %v6231_v45 = vpop.f32.mrb[120].mxu0 }
 0x66d   : > { %v3503_v62 = vpop.f32.mrb[121].mxu0  ;;  %v3602_v20 = vsel %vm3583_vm1, %v6231_v45, -inf }
 0x66e   : > { %v6233_v63 = vpop.f32.mrb[122].mxu0  ;;  %v3596_v27 = vsel %vm3583_vm1, %v3503_v62, -inf }
 0x66f   : > { %3597 = vmax.xlane.f32.xlu0 %v3596_v27  ;;  %v3506_v14 = vpop.f32.mrb[123].mxu0  ;;  %v3605_v49 = vsel %vm3583_vm1, %v6233_v63, -inf }
 0x670   : > { %v3599_v59 = vsel %vm3583_vm1, %v3506_v14, -inf }
 0x671   : > { %3600 = vmax.xlane.f32.xlu1 %v3599_v59 }
 0x684   : > { %v6237_v0 = vpop.f32.mrb[100].mxu1 }
 0x685   : > { %v6239_v3 = vpop.f32.mrb[101].mxu1  ;;  %v3614_v5 = vsel %vm3583_vm1, %v6237_v0, -inf }
 0x686   : > { %3615 = vmax.xlane.f32.xlu0 %v3614_v5  ;;  %v6243_v39 = vpop.f32.mrb[102].mxu1  ;;  %v3608_v10 = vsel %vm3583_vm1, %v6239_v3, -inf }
 0x687   : > { %v6245_v26 = vpop.f32.mrb[103].mxu1  ;;  %v3617_v42 = vsel %vm3583_vm1, %v6243_v39, -inf }
 0x688   : > { %3618 = vmax.xlane.f32.xlu1 %v3617_v42  ;;  %v3611_v34 = vsel %vm3583_vm1, %v6245_v26, -inf }
 0x68a   : > { %3609 = vmax.xlane.f32.xlu0 %v3608_v10 }
 0x68c   : > { %3612 = vmax.xlane.f32.xlu1 %v3611_v34  ;;  %v6253_v11 = vpop.f32.mrb[104].mxu1 }
 0x68d   : > { %v6255_v18 = vpop.f32.mrb[105].mxu1  ;;  %v3626_v30 = vsel %vm3583_vm1, %v6253_v11, -inf }
 0x68e   : > { %3603 = vmax.xlane.f32.xlu0 %v3602_v20  ;;  %v6259_v48 = vpop.f32.mrb[106].mxu1  ;;  %v3620_v22 = vsel %vm3583_vm1, %v6255_v18, -inf }
 0x68f   : > { %v6261_v21 = vpop.f32.mrb[107].mxu1  ;;  %v3629_v25 = vsel %vm3583_vm1, %v6259_v48, -inf }
 0x690   : > { %3606 = vmax.xlane.f32.xlu1 %v3605_v49  ;;  %v3623_v7 = vsel %vm3583_vm1, %v6261_v21, -inf }
 0x692   : > { %3621 = vmax.xlane.f32.xlu0 %v3620_v22 }
 0x694   : > { %3624 = vmax.xlane.f32.xlu1 %v3623_v7 }
 0x696   : > { %3627 = vmax.xlane.f32.xlu0 %v3626_v30 }
 0x698   : > { %3630 = vmax.xlane.f32.xlu1 %v3629_v25 }
 0x6f3   : > { %v3592_v44 = vpop.xlane.xlu0 %3591 }
 0x6f4   : > { %v3634_v17 = vsub.f32 %v4553_v9, %v3592_v44  ;;  %v3586_v29 = vpop.xlane.xlu1 %3585 }
 0x6f5   : > { %v3632_v33 = vsub.f32 %v3487_v2, %v3586_v29 }
 0x6f6   : > { %v3652_v41 = vmul.f32 1.442695, %v3634_v17 }
 0x6f7   : > { %v3648_v36 = vmul.f32 1.442695, %v3632_v33  ;;  %v3589_v1 = vpop.xlane.xlu0 %3588 }
 0x6f8   : > { %5005 = vpow2.f32 %v3652_v41  ;;  %v3633_v35 = vsub.f32 %v3490_v58, %v3589_v1  ;;  %v3595_v46 = vpop.xlane.xlu1 %3594 }
 0x6f9   : > { %v3635_v38 = vsub.f32 %v4554_v16, %v3595_v46  ;;  %5007 = vpow2.f32 %v3648_v36 }
 0x6fa   : > { %v3650_v57 = vmul.f32 1.442695, %v3633_v35 }
 0x6fb   : > { %v3654_v15 = vmul.f32 1.442695, %v3635_v38 }
 0x6fc   : > { %v3598_v40 = vpop.xlane.xlu0 %3597 }
 0x6fd   : > { %5009 = vpow2.f32 %v3654_v15  ;;  %v3636_v53 = vsub.f32 %v3503_v62, %v3598_v40 }
 0x6fe   : > { %v3601_v19 = vpop.xlane.xlu1 %3600  ;;  %5011 = vpow2.f32 %v3650_v57 }
 0x6ff   : > { %v3656_v12 = vmul.f32 1.442695, %v3636_v53  ;;  %v3637_v6 = vsub.f32 %v3506_v14, %v3601_v19 }
 0x701   : > { %5013 = vpow2.f32 %v3656_v12  ;;  %v3658_v9 = vmul.f32 1.442695, %v3637_v6 }
 0x702   : > { %v6273_v2 = vpop.eup %5005 }
 0x703   : > { %5015 = vpow2.f32 %v3658_v9  ;;  %v3686_v47 = vsel %vm3583_vm1, %v6273_v2, 0.0  ;;  %v6277_v58 = vpop.eup %5007 }
 0x704   : > { %3687 = vadd.xlane.f32.xlu0 %v3686_v47  ;;  %v3680_v28 = vsel %vm3583_vm1, %v6277_v58, 0.0 }
 0x707   : > { %v6279_v16 = vpop.eup %5009 }
 0x708   : > { %3681 = vadd.xlane.f32.xlu0 %v3680_v28  ;;  %v3689_v60 = vsel %vm3583_vm1, %v6279_v16, 0.0  ;;  %v6285_v62 = vpop.eup %5011 }
 0x709   : > { %3690 = vadd.xlane.f32.xlu1 %v3689_v60  ;;  %v3683_v59 = vsel %vm3583_vm1, %v6285_v62, 0.0 }
 0x70b   : > { %v6287_v27 = vpop.eup %5013 }
 0x70c   : > { %v3692_v14 = vsel %vm3583_vm1, %v6287_v27, 0.0 }
 0x70d   : > { %v6293_v5 = vpop.eup %5015  ;;  %3693 = vadd.xlane.f32.xlu0 %v3692_v14  ;;  %3684 = vadd.xlane.f32.xlu1 %v3683_v59 }
 0x70e   : > { %v3695_v42 = vsel %vm3583_vm1, %v6293_v5, 0.0 }
 0x711   : > { %3696 = vadd.xlane.f32.xlu1 %v3695_v42 }
 0x713   : > { %v3616_v10 = vpop.xlane.xlu0 %3615 }
 0x714   : > { %v3642_v34 = vsub.f32 %v6237_v0, %v3616_v10 }
 0x715   : > { %v3619_v20 = vpop.xlane.xlu1 %3618 }
 0x716   : > { %v3668_v49 = vmul.f32 1.442695, %v3642_v34  ;;  %v3643_v22 = vsub.f32 %v6243_v39, %v3619_v20 }
 0x717   : > { %v3610_v7 = vpop.xlane.xlu0 %3609 }
 0x718   : > { %5017 = vpow2.f32 %v3668_v49  ;;  %v3670_v30 = vmul.f32 1.442695, %v3643_v22  ;;  %v3640_v25 = vsub.f32 %v6239_v3, %v3610_v7 }
 0x719   : > { %v3613_v44 = vpop.xlane.xlu1 %3612 }
 0x71a   : > { %5019 = vpow2.f32 %v3670_v30  ;;  %v3664_v17 = vmul.f32 1.442695, %v3640_v25  ;;  %v3641_v29 = vsub.f32 %v6245_v26, %v3613_v44 }
 0x71b   : > { %v3604_v33 = vpop.xlane.xlu0 %3603 }
 0x71c   : > { %5021 = vpow2.f32 %v3664_v17  ;;  %v3666_v41 = vmul.f32 1.442695, %v3641_v29  ;;  %v3638_v36 = vsub.f32 %v6231_v45, %v3604_v33 }
 0x71d   : > { %v3607_v0 = vpop.xlane.xlu1 %3606 }
 0x71e   : > { %5023 = vpow2.f32 %v3666_v41  ;;  %v3660_v1 = vmul.f32 1.442695, %v3638_v36  ;;  %v3639_v39 = vsub.f32 %v6233_v63, %v3607_v0 }
 0x71f   : > { %v3622_v35 = vpop.xlane.xlu0 %3621 }
 0x720   : > { %5025 = vpow2.f32 %v3660_v1  ;;  %v3662_v46 = vmul.f32 1.442695, %v3639_v39  ;;  %v3644_v3 = vsub.f32 %v6255_v18, %v3622_v35 }
 0x721   : > { %v3625_v38 = vpop.xlane.xlu1 %3624 }
 0x722   : > { %v6304_v57 = vpop.eup %5017  ;;  %5027 = vpow2.f32 %v3662_v46  ;;  %v3672_v26 = vmul.f32 1.442695, %v3644_v3  ;;  %v3645_v15 = vsub.f32 %v6261_v21, %v3625_v38 }
 0x723   : > { %v3628_v40 = vpop.xlane.xlu0 %3627  ;;  %v3710_v45 = vsel %vm3583_vm1, %v6304_v57, 0.0 }
 0x724   : > { %v6309_v53 = vpop.eup %5019  ;;  %5029 = vpow2.f32 %v3672_v26  ;;  %v3674_v63 = vmul.f32 1.442695, %v3645_v15  ;;  %v3646_v19 = vsub.f32 %v6253_v11, %v3628_v40  ;;  %3711 = vadd.xlane.f32.xlu0 %v3710_v45 }
 0x725   : > { %v3631_v12 = vpop.xlane.xlu1 %3630  ;;  %v3713_v18 = vsel %vm3583_vm1, %v6309_v53, 0.0 }
 0x726   : > { %v6314_v6 = vpop.eup %5021  ;;  %5031 = vpow2.f32 %v3674_v63  ;;  %v3676_v9 = vmul.f32 1.442695, %v3646_v19  ;;  %v3647_v21 = vsub.f32 %v6259_v48, %v3631_v12  ;;  %3714 = vadd.xlane.f32.xlu1 %v3713_v18 }
 0x727   : > { %v3704_v47 = vsel %vm3583_vm1, %v6314_v6, 0.0 }
 0x728   : > { %v6319_v28 = vpop.eup %5023  ;;  %5033 = vpow2.f32 %v3676_v9  ;;  %v3678_v60 = vmul.f32 1.442695, %v3647_v21  ;;  %3705 = vadd.xlane.f32.xlu0 %v3704_v47 }
 0x729   : > { %v3707_v11 = vsel %vm3583_vm1, %v6319_v28, 0.0 }
 0x72a   : > { %v6323_v14 = vpop.eup %5025  ;;  %5035 = vpow2.f32 %v3678_v60  ;;  %3708 = vadd.xlane.f32.xlu1 %v3707_v11 }
 0x72b   : > { %v3698_v59 = vsel %vm3583_vm1, %v6323_v14, 0.0 }
 0x72c   : > { %v6327_v48 = vpop.eup %5027  ;;  %3699 = vadd.xlane.f32.xlu0 %v3698_v59 }
 0x72d   : > { %v3701_v42 = vsel %vm3583_vm1, %v6327_v48, 0.0 }
 0x72e   : > { %v6331_v10 = vpop.eup %5029  ;;  %3702 = vadd.xlane.f32.xlu1 %v3701_v42 }
 0x72f   : > { %v3716_v34 = vsel %vm3583_vm1, %v6331_v10, 0.0 }
 0x730   : > { %v6335_v20 = vpop.eup %5031  ;;  %3717 = vadd.xlane.f32.xlu0 %v3716_v34 }
 0x731   : > { %v3719_v49 = vsel %vm3583_vm1, %v6335_v20, 0.0 }
 0x732   : > { %v6339_v22 = vpop.eup %5033  ;;  %3720 = vadd.xlane.f32.xlu1 %v3719_v49 }
 0x733   : > { %v3722_v7 = vsel %vm3583_vm1, %v6339_v22, 0.0 }
 0x734   : > { %v6343_v30 = vpop.eup %5035  ;;  %3723 = vadd.xlane.f32.xlu0 %v3722_v7 }
 0x735   : > { %v3725_v25 = vsel %vm3583_vm1, %v6343_v30, 0.0 }
 0x736   : > { %3726 = vadd.xlane.f32.xlu1 %v3725_v25 }
 0x791   : > { %v3688_v44 = vpop.xlane.xlu0 %3687 }
 0x795   : > { %v3682_v17 = vpop.xlane.xlu0 %3681 }
 0x796   : > { %v3691_v29 = vpop.xlane.xlu1 %3690 }
 0x797   : > { %5037 = vrcp.f32 %v3691_v29 }
 0x798   : > { %5039 = vrcp.f32 %v3682_v17 }
 0x799   : > { %5041 = vrcp.f32 %v3688_v44 }
 0x79a   : > { %v3694_v33 = vpop.xlane.xlu0 %3693  ;;  %v3685_v41 = vpop.xlane.xlu1 %3684 }
 0x79b   : > { %5043 = vrcp.f32 %v3685_v41 }
 0x79c   : > { %5045 = vrcp.f32 %v3694_v33 }
 0x79e   : > { %v3697_v36 = vpop.xlane.xlu1 %3696 }
 0x79f   : > { %5047 = vrcp.f32 %v3697_v36 }
 0x7a1   : > { %v5038_v0 = vpop.eup %5037 }
 0x7a2   : > { %v5040_v1 = vpop.eup %5039  ;;  %v3747_v46 = vmul.f32 %v5038_v0, %v6279_v16 }
 0x7a3   : > { %v5042_v39 = vpop.eup %5041  ;;  %v3744_v38 = vmul.f32 %v5040_v1, %v6277_v58 }
 0x7a4   : > { %v3746_v15 = vmul.f32 %v5042_v39, %v6273_v2 }
 0x7a5   : > { %v5044_v35 = vpop.eup %5043 }
 0x7a6   : > { %v5046_v3 = vpop.eup %5045  ;;  %v3745_v26 = vmul.f32 %v5044_v35, %v6285_v62  ;;  %v3761_v63 = vpack.c.bf16 %v3747_v46, %v3746_v15 }
 0x7a7   : > { %v3748_v19 = vmul.f32 %v5046_v3, %v6287_v27 }
 0x7a8   : > { %v3760_v45 = vpack.c.bf16 %v3745_v26, %v3744_v38  ;;  %v3923_v38 = vstv %s3922_s21 }
 0x7a9   : > { %v5048_v40 = vpop.eup %5047 }
 0x7aa   : > { %v3749_v12 = vmul.f32 %v5048_v40, %v6293_v5  ;;  %4583 = vmatprep.mubr.msk.bf16.mxu0 %vm3583_vm1, %v3760_v45 }
 0x7ab   : > { %4584 = vmatmul.mubr.msk.bf16.vlgmr.msra.gmra.mrb[124].mxu0 %vm3583_vm1, %v3761_v63 }
 0x7ac   : > { %v3762_v18 = vpack.c.bf16 %v3749_v12, %v3748_v19 }
 0x7ae   : > { %4587 = vmatprep.mubr.msk.bf16.mxu0 %vm3583_vm1, %v3762_v18 }
 0x7b1   : > { %v3712_v16 = vpop.xlane.xlu0 %3711 }
 0x7b3   : > { %v3715_v58 = vpop.xlane.xlu1 %3714 }
 0x7b4   : > { %5049 = vrcp.f32 %v3715_v58 }
 0x7b5   : > { %v3706_v62 = vpop.xlane.xlu0 %3705 }
 0x7b6   : > { %5051 = vrcp.f32 %v3706_v62 }
 0x7b7   : > { %5053 = vrcp.f32 %v3712_v16  ;;  %v3709_v2 = vpop.xlane.xlu1 %3708 }
 0x7b8   : > { %5055 = vrcp.f32 %v3709_v2 }
 0x7b9   : > { %v3700_v9 = vpop.xlane.xlu0 %3699 }
 0x7ba   : > { %5057 = vrcp.f32 %v3700_v9 }
 0x7bb   : > { %v3703_v27 = vpop.xlane.xlu1 %3702 }
 0x7bc   : > { %5059 = vrcp.f32 %v3703_v27 }
 0x7bd   : > { %v3718_v5 = vpop.xlane.xlu0 %3717 }
 0x7be   : > { %5061 = vrcp.f32 %v3718_v5  ;;  %v5050_v21 = vpop.eup %5049 }
 0x7bf   : > { %v3721_v47 = vpop.xlane.xlu1 %3720  ;;  %v3755_v34 = vmul.f32 %v5050_v21, %v6309_v53 }
 0x7c0   : > { %v5052_v60 = vpop.eup %5051  ;;  %5063 = vrcp.f32 %v3721_v47 }
 0x7c1   : > { %v5054_v11 = vpop.eup %5053  ;;  %v3724_v59 = vpop.xlane.xlu0 %3723  ;;  %v3752_v7 = vmul.f32 %v5052_v60, %v6314_v6 }
 0x7c2   : > { %v5056_v42 = vpop.eup %5055  ;;  %5065 = vrcp.f32 %v3724_v59  ;;  %v3754_v17 = vmul.f32 %v5054_v11, %v6304_v57 }
 0x7c3   : > { %v3727_v49 = vpop.xlane.xlu1 %3726  ;;  %v3753_v25 = vmul.f32 %v5056_v42, %v6319_v28 }
 0x7c4   : > { %v5058_v44 = vpop.eup %5057  ;;  %5067 = vrcp.f32 %v3727_v49  ;;  %v3765_v41 = vpack.c.bf16 %v3755_v34, %v3754_v17 }
 0x7c5   : > { %v3764_v29 = vpack.c.bf16 %v3753_v25, %v3752_v7  ;;  %v3750_v36 = vmul.f32 %v5058_v44, %v6323_v14 }
 0x7c6   : > { %v5060_v33 = vpop.eup %5059 }
 0x7c7   : > { %4599 = vmatprep.mubr.msk.bf16.mxu1 %vm3583_vm1, %v3764_v29  ;;  %v3751_v0 = vmul.f32 %v5060_v33, %v6327_v48 }
 0x7c8   : > { %v5062_v53 = vpop.eup %5061  ;;  %4600 = vmatmul.mubr.msk.bf16.vlgmr.msra.gmra.mrb[108].mxu1 %vm3583_vm1, %v3765_v41 }
 0x7c9   : > { %v3763_v1 = vpack.c.bf16 %v3751_v0, %v3750_v36  ;;  %v3756_v28 = vmul.f32 %v5062_v53, %v6331_v10 }
 0x7ca   : > { %v5064_v6 = vpop.eup %5063 }
 0x7cb   : > { %4588 = vmatmul.mubr.msk.bf16.gmra.mrb[128].mxu0 %vm3583_vm1, %v3763_v1  ;;  %v3757_v57 = vmul.f32 %v5064_v6, %v6335_v20 }
 0x7cc   : > { %v5066_v39 = vpop.eup %5065 }
 0x7cd   : > { %v3766_v35 = vpack.c.bf16 %v3757_v57, %v3756_v28  ;;  %v3758_v14 = vmul.f32 %v5066_v39, %v6339_v22 }
 0x7ce   : > { %v5068_v46 = vpop.eup %5067 }
 0x7cf   : > { %4603 = vmatprep.mubr.msk.bf16.mxu1 %vm3583_vm1, %v3766_v35  ;;  %v3759_v48 = vmul.f32 %v5068_v46, %v6343_v30 }
 0x7d1   : > { %v3767_v3 = vpack.c.bf16 %v3759_v48, %v3758_v14 }
 0x7d3   : > { %4604 = vmatmul.mubr.msk.bf16.gmra.mrb[112].mxu1 %vm3583_vm1, %v3767_v3 }
 0x87e   : > { %v4585_v26 = vpop.f32.mrb[124].mxu0 }
 0x87f   : > { %v3926_v15 = vmul.f32 %v4585_v26, %v3923_v38  ;;  %v3814_v40 = vpop.f32.mrb[125].mxu0 }
 0x880   : > { %v3924_v10 = vmul.f32 %v3923_v38, %v3814_v40  ;;  %v4586_v45 = vpop.f32.mrb[126].mxu0 }
 0x881   : > { %v3942_v20 = vadd.f32 %v3926_v15, %v6096_v4  ;;  %v3927_v63 = vmul.f32 %v4586_v45, %v3923_v38  ;;  %v3817_v19 = vpop.f32.mrb[127].mxu0 }
 0x882   : > { %v3940_v12 = vadd.f32 %v3924_v10, %v6087_v56  ;;  %v3925_v18 = vmul.f32 %v3923_v38, %v3817_v19 }
 0x883   : > { %v3943_v22 = vadd.f32 %v3927_v63, %v6099_v8 }
 0x884   : > { %v3956_v30 = vmax.f32 %v3940_v12, %v3942_v20  ;;  %v3941_v16 = vadd.f32 %v3925_v18, %v6090_v43 }
 0x886   : > { %v3957_v58 = vmax.f32 %v3941_v16, %v3943_v22 }
 0x89b   : > { %v4601_v62 = vpop.f32.mrb[108].mxu1 }
 0x89c   : > { %v3934_v2 = vmul.f32 %v4601_v62, %v3923_v38  ;;  %v3891_v9 = vpop.f32.mrb[109].mxu1 }
 0x89d   : > { %v3932_v27 = vmul.f32 %v3923_v38, %v3891_v9  ;;  %v4602_v5 = vpop.f32.mrb[110].mxu1 }
 0x89e   : > { %v3950_v21 = vadd.f32 %v3934_v2, %v6132_v31  ;;  %v3935_v47 = vmul.f32 %v4602_v5, %v3923_v38  ;;  %v4589_v4 = vpop.f32.mrb[128].mxu0  ;;  %v3894_v60 = vpop.f32.mrb[111].mxu1 }
 0x89f   : > { %v3948_v11 = vadd.f32 %v3932_v27, %v6123_v13  ;;  %v3933_v56 = vmul.f32 %v3923_v38, %v3894_v60  ;;  %v3830_v59 = vpop.f32.mrb[129].mxu0  ;;  %v3930_v42 = vmul.f32 %v4589_v4, %v3923_v38 }
 0x8a0   : > { %v3951_v8 = vadd.f32 %v3935_v47, %v6135_v23  ;;  %v3928_v34 = vmul.f32 %v3923_v38, %v3830_v59  ;;  %v4590_v43 = vpop.f32.mrb[130].mxu0 }
 0x8a1   : > { %v3969_v49 = vmax.f32 %v3948_v11, %v3950_v21  ;;  %v3949_v7 = vadd.f32 %v3933_v56, %v6126_v32  ;;  %v3833_v25 = vpop.f32.mrb[131].mxu0  ;;  %v3931_v17 = vmul.f32 %v4590_v43, %v3923_v38  ;;  %v3946_v33 = vadd.f32 %v3930_v42, %v6114_v50 }
 0x8a2   : > { %v3944_v44 = vadd.f32 %v3928_v34, %v6105_v24  ;;  %v3929_v31 = vmul.f32 %v3923_v38, %v3833_v25 }
 0x8a3   : > { %v3970_v29 = vmax.f32 %v3949_v7, %v3951_v8  ;;  %v3947_v23 = vadd.f32 %v3931_v17, %v6117_v54 }
 0x8a4   : > { %v3958_v41 = vmax.f32 %v3956_v30, %v3944_v44  ;;  %v3945_v13 = vadd.f32 %v3929_v31, %v6108_v52 }
 0x8a6   : > { %v3960_v36 = vmax.f32 %v3958_v41, %v3946_v33  ;;  %v3959_v0 = vmax.f32 %v3957_v58, %v3945_v13  ;;  %v4605_v53 = vpop.f32.mrb[112].mxu1 }
 0x8a7   : > { %v3907_v1 = vpop.f32.mrb[113].mxu1  ;;  %v3938_v28 = vmul.f32 %v4605_v53, %v3923_v38 }
 0x8a8   : > { %v3961_v6 = vmax.f32 %v3959_v0, %v3947_v23  ;;  %v3936_v32 = vmul.f32 %v3923_v38, %v3907_v1  ;;  %v4606_v57 = vpop.f32.mrb[114].mxu1 }
 0x8a9   : > { %v3910_v39 = vpop.f32.mrb[115].mxu1  ;;  %v3939_v46 = vmul.f32 %v4606_v57, %v3923_v38  ;;  %v3954_v52 = vadd.f32 %v3938_v28, %v6150_v55 }
 0x8aa   : > { %v3962_v24 = vmax.f32 %v3960_v36, %v3961_v6  ;;  %v3952_v35 = vadd.f32 %v3936_v32, %v6141_v61  ;;  %v3937_v50 = vmul.f32 %v3923_v38, %v3910_v39 }
 0x8ab   : > { %v3955_v15 = vadd.f32 %v3939_v46, %v6153_v51 }
 0x8ac   : > { %v3963_v14 = vrot.slane %v3962_v24, 4  ;;  %v3971_v48 = vmax.f32 %v3969_v49, %v3952_v35  ;;  %v3953_v54 = vadd.f32 %v3937_v50, %v6144_v37 }
 0x8ae   : > { %v3964_v3 = vmax.f32 %v3962_v24, %v3963_v14  ;;  %v3973_v26 = vmax.f32 %v3971_v48, %v3954_v52  ;;  %v3972_v40 = vmax.f32 %v3970_v29, %v3953_v54 }
 0x8b0   : > { %v3974_v10 = vmax.f32 %v3972_v40, %v3955_v15  ;;  %v3965_v45 = vrot.slane %v3964_v3, 2 }
 0x8b2   : > { %v3975_v20 = vmax.f32 %v3973_v26, %v3974_v10  ;;  %v3966_v61 = vmax.f32 %v3964_v3, %v3965_v45 }
 0x8b4   : > { %v3976_v63 = vrot.slane %v3975_v20, 4  ;;  %v3967_v12 = vrot.slane %v3966_v61, 1 }
 0x8b6   : > { %v3977_v19 = vmax.f32 %v3975_v20, %v3976_v63  ;;  %v3968_v37 = vmax.f32 %v3966_v61, %v3967_v12 }
 0x8b8   : > { %v3978_v38 = vrot.slane %v3977_v19, 2 }
 0x8ba   : > { %v3979_v55 = vmax.f32 %v3977_v19, %v3978_v38 }
 0x8bc   : > { %v3980_v18 = vrot.slane %v3979_v55, 1 }
 0x8be   : > { %v3981_v22 = vmax.f32 %v3979_v55, %v3980_v18 }
 0x8c0   : > { %v3984_v51 = vsel %vm1220_vm0, %v3981_v22, %v3968_v37 }
 0x8c1   : > { %3986 = vst [vmem:[%s496_s29] sm:$0x3] %v3984_v51 }
 0x8c2   : > { %5194 = shalt.err (!%p5191_p0)
}
 0x8c3   : > { %s5195_s5 = scalar_lea.hbm %s6392_s23, 32  ;;  %s5199_s21 = scalar_lea.hbm %s6484_s14, 64 }
 0x8c4   : > { %p5196_p6 = scmp.ne.s32.totalorder %s6392_s23, %s5195_s5  ;;  %p5200_p13 = scmp.lt.u32.totalorder %s6392_s23, %s6484_s14 }
 0x8c5   : > { %p5201_p12 = scmp.lt.u32.totalorder %s5199_s21, %s5195_s5  ;;  %p5203_p2 = scmp.lt.u32.totalorder %s5195_s5, %s6392_s23 }
 0x8c6   : > { %p5197_p9 = pnand %p5196_p6, %p6485_p3 }
 0x8c7   : > { %p5202_p1 = por %p5201_p12, %p5200_p13 }
 0x8c8   : > { %p5198_p10 = pneg %p5197_p9 }
 0x8c9   : > { %p5204_p4 = por %p5203_p2, %p5202_p1 }
 0x8cb   : > { %p5205_p7 = pnand %p5204_p4, %p5198_p10 }
 0x8cd   : > { %5208 = shalt.err (!%p5205_p7)
}
 0x8ce   : > { %4623 = dma.vmem_to_hbm [thread:$0]  (%p6485_p3), %s6394_s20, 32, %s6392_s23, %s3988_s30  }
 0x8cf PF: > { %s6486_s25 = sld [smem:[#allocation18_spill]]  ;;  %s6487_s29 = sld [smem:[#allocation16_spill]] }
 0x8d0   : > { %s6488_s15 = sld [smem:[#allocation21_spill]] }
 0x8d5   : > { %p4650_p8 = scmp.ge.s32.totalorder %s6486_s25, 2  ;;  %s4013_s17 = sand.u32 1, %s6487_s29  }
 0x8d6   : > { %p6489_p11 = scmp.ne.s32.totalorder %s6488_s15, 0  ;;  %s4014_s26 = scalar_lea.sflag [#allocation5], %s4013_s17 }
 0x8d8   : > { %p4639_p5 = pnand %p4650_p8, %p6489_p11 }
 0x8da   : > { %5238 = dma.done.wait (!%p4639_p5), %s4014_s26, 32  }
 0x8db   : > { %5240 = vsyncadd (!%p4639_p5), %s4014_s26, 4294967264  ;;  %s6490_s30 = sld [smem:[#allocation19_spill]]  ;;  %s6491_s12 = sld [smem:[#allocation17_spill]] }
 0x8dc   : > { %s6492_s29 = sld [smem:[#allocation20_spill]]  ;;  %s6493_s27 = smov %s5247_s28 }
 0x8e1   : > { %p27_p0 = scmp.ge.s32.totalorder %s6490_s30, 4   ;;  %s6494_s28 = smov %s6491_s12 }
 0x8e3   :  { %29 = sbr.rel (!%p27_p0) target bundleno = 10 (0xa), region = 124 }
 0x8ea   :  { %4019 = vsyncpa [#allocation4], 1 }
 0x8eb   :  { %4021 = vsyncpa [#allocation4 + $0x1], 1 }
 0x8ec   :  { %4022 = vsyncpa [#allocation7], 1 }
 0x8ed   :  { %4023 = vsyncpa [#allocation10], 1 }
 0x8ee   :  { %4024 = vsyncpa [#allocation5], 1 }
 0x8ef   :  { %4026 = vsyncpa [#allocation5 + $0x1], 1 }

</bundles_post_ra>
